<compile_context>
chip_gen: v5e
topology: v5e:2x2
jax: 0.10.0
libtpu: 0.0.40
codegen_flags: <defaults>
</compile_context>

<pallas_src>
import jax
import jax.numpy as jnp
from jax import lax
from jax.experimental import pallas as pl
from jax.experimental.pallas import tpu as pltpu

LEAKY_SLOPE = 0.01
BN_EPS = 1e-5
_PREC = lax.Precision.HIGHEST


# ------------------------------ Pallas kernel -------------------------------

def _conv_block_kernel(x_ref, wband_ref, bias_ref, gamma_ref, beta_ref,
                       sel_ref, sel_t_ref, o_ref, xp_ref):
    """Fused Conv3x3(+bias) -> LeakyReLU(0.01) -> BatchNorm2d (batch stats).

    x_ref     : (N, H, W*Cin)       input rows, channels flattened into lanes
    wband_ref : (3, W*Cin, W*Cout)  width-banded conv weights (one per dy tap)
    bias_ref  : (1, W*Cout)         conv bias tiled along W
    gamma_ref : (1, Cout)           BN scale
    beta_ref  : (1, Cout)           BN shift
    sel_ref   : (W*Cout, Cout)      channel-group selection matrix
    sel_t_ref : (Cout, W*Cout)      its transpose (broadcast back to lanes)
    o_ref     : (N*H, W*Cout)       lane-dense output slab
    xp_ref    : (N, H+2, W*Cin)     VMEM scratch holding the vertical halo
    """
    n, h, wcin = x_ref.shape
    rows_out, wcout = o_ref.shape
    cout = gamma_ref.shape[-1]
    cnt = rows_out * (wcout // cout)          # = N*H*W elements per channel

    # --- vertical halo in VMEM (no wrapper-side jnp.pad / HBM round-trip) ---
    xp_ref[...] = jnp.zeros(xp_ref.shape, xp_ref.dtype)
    xp_ref[:, 1:h + 1, :] = x_ref[...]
    xp = xp_ref[...]

    # --- conv: 3 banded matmuls; horizontal taps + padding live in wband ----
    acc = jnp.zeros((rows_out, wcout), jnp.float32)
    for dy in range(3):
        rows = xp[:, dy:dy + h, :].reshape(rows_out, wcin)
        acc = acc + jnp.dot(rows, wband_ref[dy],
                            preferred_element_type=jnp.float32,
                            precision=_PREC)
    acc = acc + bias_ref[...]

    # --- LeakyReLU(0.01) -----------------------------------------------------
    a = jnp.where(acc >= 0, acc, LEAKY_SLOPE * acc)

    # --- BatchNorm2d, training-mode batch stats (biased var), one pass -------
    col_sum = jnp.sum(a, axis=0, keepdims=True)            # (1, W*Cout)
    col_sq = jnp.sum(a * a, axis=0, keepdims=True)         # (1, W*Cout)
    ch_sum = jnp.dot(col_sum, sel_ref[...],
                     preferred_element_type=jnp.float32, precision=_PREC)
    ch_sq = jnp.dot(col_sq, sel_ref[...],
                    preferred_element_type=jnp.float32, precision=_PREC)
    mean = ch_sum / cnt                                     # (1, Cout)
    var = ch_sq / cnt - mean * mean                         # biased (PyTorch)
    scale = gamma_ref[...] * lax.rsqrt(var + BN_EPS)        # (1, Cout)
    shift = beta_ref[...] - mean * scale
    scale_row = jnp.dot(scale, sel_t_ref[...],
                        preferred_element_type=jnp.float32, precision=_PREC)
    shift_row = jnp.dot(shift, sel_t_ref[...],
                        preferred_element_type=jnp.float32, precision=_PREC)

    o_ref[...] = (a * scale_row + shift_row).astype(o_ref.dtype)


# ------------------------------- wrapper -------------------------------------

def _build_banded_weight(w, width):
    """(3, 3, Cin, Cout) -> (3, W*Cin, W*Cout) banded matrices that encode the
    horizontal taps and the horizontal 'SAME' zero padding."""
    kh, kw, cin, cout = w.shape
    xi = jnp.arange(width)[:, None]          # input column
    xo = jnp.arange(width)[None, :]          # output column
    d = xi - xo
    valid = (d >= -1) & (d <= 1)
    dx = jnp.clip(d + 1, 0, kw - 1)
    wg = w[:, dx]                            # (3, W, W, Cin, Cout), [dy,xi,xo,c,o]
    wg = wg * valid[None, :, :, None, None].astype(w.dtype)
    # -> [dy, xi, c, xo, o] -> (3, W*Cin, W*Cout)
    return jnp.transpose(wg, (0, 1, 3, 2, 4)).reshape(kh, width * cin,
                                                      width * cout)


def conv_block(x, w, b, gamma, beta):
    """NHWC ConvBlock forward: conv3x3(s1, p1) + bias -> LeakyReLU -> BatchNorm."""
    n, h, width, cin = x.shape
    cout = w.shape[-1]

    # One-time, tiny wrapper-side parameter packing (layout plumbing only).
    wband = _build_banded_weight(w.astype(jnp.float32), width)
    bias_row = jnp.tile(b.astype(jnp.float32), width)[None, :]       # (1, W*Cout)
    sel = jnp.tile(jnp.eye(cout, dtype=jnp.float32), (width, 1))     # (W*Cout, Cout)
    sel_t = sel.T                                                    # (Cout, W*Cout)
    x_rows = x.astype(jnp.float32).reshape(n, h, width * cin)        # free reshape

    out2d = pl.pallas_call(
        _conv_block_kernel,
        out_shape=jax.ShapeDtypeStruct((n * h, width * cout), jnp.float32),
        in_specs=[pl.BlockSpec(memory_space=pltpu.MemorySpace.VMEM)] * 7,
        out_specs=pl.BlockSpec(memory_space=pltpu.MemorySpace.VMEM),
        scratch_shapes=[pltpu.VMEM((n, h + 2, width * cin), jnp.float32)],
        compiler_params=pltpu.CompilerParams(
            vmem_limit_bytes=32 * 1024 * 1024),
    )(x_rows, wband, bias_row,
      gamma.astype(jnp.float32).reshape(1, cout),
      beta.astype(jnp.float32).reshape(1, cout),
      sel, sel_t)

    # TODO(synk): for large N*H*W, grid over (N, H-rows) with "parallel"
    # dimension_semantics (v7x dual TensorCore) and a cross-tile two-pass
    # BatchNorm reduction; at this size one VMEM-resident program is optimal.
    return out2d.reshape(n, h, width, cout).astype(x.dtype)


# --------------------------- pure-JAX reference -------------------------------

def conv_block_ref(x, w, b, gamma, beta):
    y = lax.conv_general_dilated(x, w, (1, 1), "SAME",
                                 dimension_numbers=("NHWC", "HWIO", "NHWC"),
                                 precision=_PREC)
    y = y + b.reshape(1, 1, 1, -1)
    a = jnp.where(y >= 0, y, LEAKY_SLOPE * y)
    mean = jnp.mean(a, axis=(0, 1, 2), keepdims=True)
    var = jnp.mean((a - mean) ** 2, axis=(0, 1, 2), keepdims=True)
    return (a - mean) * lax.rsqrt(var + BN_EPS) * gamma.reshape(1, 1, 1, -1) \
        + beta.reshape(1, 1, 1, -1)


# ---------------------------------- main --------------------------------------

if __name__ == "__main__":
    key = jax.random.PRNGKey(0)
    k_x, k_w, k_b = jax.random.split(key, 3)

    N, H, W, CIN, COUT = 2, 16, 16, 4, 16
    # NHWC input (equivalent to PyTorch NCHW x of shape (2, 4, 16, 16)).
    x = jax.random.normal(k_x, (N, H, W, CIN), jnp.float32)

    # PyTorch Conv2d default init (uniform +/- 1/sqrt(fan_in)); BN affine init.
    fan_in = CIN * 3 * 3
    bound = (1.0 / fan_in) ** 0.5
    w = jax.random.uniform(k_w, (3, 3, CIN, COUT), jnp.float32, -bound, bound)
    b = jax.random.uniform(k_b, (COUT,), jnp.float32, -bound, bound)
    gamma = jnp.ones((COUT,), jnp.float32)
    beta = jnp.zeros((COUT,), jnp.float32)

    out = jax.block_until_ready(conv_block(x, w, b, gamma, beta))
    ref = jax.block_until_ready(conv_block_ref(x, w, b, gamma, beta))

    assert out.shape == (N, H, W, COUT)
    err = jnp.max(jnp.abs(out - ref))
    assert jnp.allclose(out, ref, atol=2e-3, rtol=2e-3), f"max abs err = {err}"
    print("KERNEL_OK")
</pallas_src>

<mosaic_0001>
module attributes {stable_mosaic.version = 11 : i64} {
  func.func @_conv_block_kernel(%arg0: memref<2x16x64xf32, #tpu.memory_space<vmem>>, %arg1: memref<3x64x256xf32, #tpu.memory_space<vmem>>, %arg2: memref<1x256xf32, #tpu.memory_space<vmem>>, %arg3: memref<1x16xf32, #tpu.memory_space<vmem>>, %arg4: memref<1x16xf32, #tpu.memory_space<vmem>>, %arg5: memref<256x16xf32, #tpu.memory_space<vmem>>, %arg6: memref<16x256xf32, #tpu.memory_space<vmem>>, %arg7: memref<32x256xf32, #tpu.memory_space<vmem>>, %arg8: memref<2x18x64xf32, #tpu.memory_space<vmem>>) attributes {dimension_semantics = [], scalar_prefetch = 0 : i64, scratch_operands = 1 : i64, tpu.core_type = #tpu.core_type<tc>} {
    %cst = arith.constant 0.000000e+00 : f32
    %0 = vector.broadcast %cst : f32 to vector<2x18x64xf32>
    %c0 = arith.constant 0 : index
    %c0_0 = arith.constant 0 : index
    %c0_1 = arith.constant 0 : index
    %1 = vector.load %arg8[%c0, %c0_0, %c0_1] : memref<2x18x64xf32, #tpu.memory_space<vmem>>, vector<2x18x64xf32>
    tpu.vector_store %arg8[%c0, %c0_0, %c0_1], %0 {strides = array<i32>} : memref<2x18x64xf32, #tpu.memory_space<vmem>>, vector<2x18x64xf32>,
    %c0_2 = arith.constant 0 : index
    %c0_3 = arith.constant 0 : index
    %c0_4 = arith.constant 0 : index
    %2 = vector.load %arg0[%c0_2, %c0_3, %c0_4] : memref<2x16x64xf32, #tpu.memory_space<vmem>>, vector<2x16x64xf32>
    %c0_5 = arith.constant 0 : index
    %c1 = arith.constant 1 : index
    %c0_6 = arith.constant 0 : index
    %3 = vector.load %arg8[%c0_5, %c1, %c0_6] : memref<2x18x64xf32, #tpu.memory_space<vmem>>, vector<2x16x64xf32>
    tpu.vector_store %arg8[%c0_5, %c1, %c0_6], %2 {strides = array<i32>} : memref<2x18x64xf32, #tpu.memory_space<vmem>>, vector<2x16x64xf32>,
    %c0_7 = arith.constant 0 : index
    %c0_8 = arith.constant 0 : index
    %c0_9 = arith.constant 0 : index
    %4 = vector.load %arg8[%c0_7, %c0_8, %c0_9] : memref<2x18x64xf32, #tpu.memory_space<vmem>>, vector<2x18x64xf32>
    %cst_10 = arith.constant 0.000000e+00 : f32
    %5 = vector.broadcast %cst_10 : f32 to vector<32x256xf32>
    %6 = vector.extract_strided_slice %4 {offsets = [0, 0, 0], sizes = [2, 16, 64], strides = [1, 1, 1]} : vector<2x18x64xf32> to vector<2x16x64xf32>
    %7 = vector.shape_cast %6 : vector<2x16x64xf32> to vector<32x64xf32>
    %c0_11 = arith.constant 0 : index
    %c0_12 = arith.constant 0 : index
    %c0_13 = arith.constant 0 : index
    %8 = vector.load %arg1[%c0_11, %c0_12, %c0_13] : memref<3x64x256xf32, #tpu.memory_space<vmem>>, vector<1x64x256xf32>
    %9 = vector.shape_cast %8 : vector<1x64x256xf32> to vector<64x256xf32>
    %cst_14 = arith.constant dense<0.000000e+00> : vector<32x256xf32>
    %10 = tpu.matmul %7, %9, %cst_14 {dimension_numbers = #tpu.dot_dimension_numbers<[1], [0], [0], [1], [0, 0, 1, 1], [], []>, precision = #tpu.contract_precision<fp32>} : vector<32x64xf32>, vector<64x256xf32>, vector<32x256xf32> -> vector<32x256xf32>
    %11 = arith.addf %5, %10 : vector<32x256xf32>
    %12 = vector.extract_strided_slice %4 {offsets = [0, 1, 0], sizes = [2, 16, 64], strides = [1, 1, 1]} : vector<2x18x64xf32> to vector<2x16x64xf32>
    %13 = vector.shape_cast %12 : vector<2x16x64xf32> to vector<32x64xf32>
    %c1_15 = arith.constant 1 : index
    %c0_16 = arith.constant 0 : index
    %c0_17 = arith.constant 0 : index
    %14 = vector.load %arg1[%c1_15, %c0_16, %c0_17] : memref<3x64x256xf32, #tpu.memory_space<vmem>>, vector<1x64x256xf32>
    %15 = vector.shape_cast %14 : vector<1x64x256xf32> to vector<64x256xf32>
    %cst_18 = arith.constant dense<0.000000e+00> : vector<32x256xf32>
    %16 = tpu.matmul %13, %15, %cst_18 {dimension_numbers = #tpu.dot_dimension_numbers<[1], [0], [0], [1], [0, 0, 1, 1], [], []>, precision = #tpu.contract_precision<fp32>} : vector<32x64xf32>, vector<64x256xf32>, vector<32x256xf32> -> vector<32x256xf32>
    %17 = arith.addf %11, %16 : vector<32x256xf32>
    %18 = vector.extract_strided_slice %4 {offsets = [0, 2, 0], sizes = [2, 16, 64], strides = [1, 1, 1]} : vector<2x18x64xf32> to vector<2x16x64xf32>
    %19 = vector.shape_cast %18 : vector<2x16x64xf32> to vector<32x64xf32>
    %c2 = arith.constant 2 : index
    %c0_19 = arith.constant 0 : index
    %c0_20 = arith.constant 0 : index
    %20 = vector.load %arg1[%c2, %c0_19, %c0_20] : memref<3x64x256xf32, #tpu.memory_space<vmem>>, vector<1x64x256xf32>
    %21 = vector.shape_cast %20 : vector<1x64x256xf32> to vector<64x256xf32>
    %cst_21 = arith.constant dense<0.000000e+00> : vector<32x256xf32>
    %22 = tpu.matmul %19, %21, %cst_21 {dimension_numbers = #tpu.dot_dimension_numbers<[1], [0], [0], [1], [0, 0, 1, 1], [], []>, precision = #tpu.contract_precision<fp32>} : vector<32x64xf32>, vector<64x256xf32>, vector<32x256xf32> -> vector<32x256xf32>
    %23 = arith.addf %17, %22 : vector<32x256xf32>
    %c0_22 = arith.constant 0 : index
    %c0_23 = arith.constant 0 : index
    %24 = vector.load %arg2[%c0_22, %c0_23] : memref<1x256xf32, #tpu.memory_space<vmem>>, vector<1x256xf32>
    %25 = vector.broadcast %24 : vector<1x256xf32> to vector<32x256xf32>
    %26 = arith.addf %23, %25 : vector<32x256xf32>
    %cst_24 = arith.constant 0.000000e+00 : f32
    %27 = vector.broadcast %cst_24 : f32 to vector<32x256xf32>
    %28 = arith.cmpf oge, %26, %27 : vector<32x256xf32>
    %cst_25 = arith.constant 0.00999999977 : f32
    %29 = vector.broadcast %cst_25 : f32 to vector<32x256xf32>
    %30 = arith.mulf %29, %26 : vector<32x256xf32>
    %31 = arith.select %28, %26, %30 : vector<32x256xi1>, vector<32x256xf32>
    %cst_26 = arith.constant dense<0.000000e+00> : vector<256xf32>
    %32 = vector.multi_reduction <add>, %31, %cst_26 [0] : vector<32x256xf32> to vector<256xf32>
    %33 = vector.shape_cast %32 : vector<256xf32> to vector<1x256xf32>
    %34 = arith.mulf %31, %31 : vector<32x256xf32>
    %cst_27 = arith.constant dense<0.000000e+00> : vector<256xf32>
    %35 = vector.multi_reduction <add>, %34, %cst_27 [0] : vector<32x256xf32> to vector<256xf32>
    %36 = vector.shape_cast %35 : vector<256xf32> to vector<1x256xf32>
    %c0_28 = arith.constant 0 : index
    %c0_29 = arith.constant 0 : index
    %37 = vector.load %arg5[%c0_28, %c0_29] : memref<256x16xf32, #tpu.memory_space<vmem>>, vector<256x16xf32>
    %cst_30 = arith.constant dense<0.000000e+00> : vector<1x16xf32>
    %38 = tpu.matmul %33, %37, %cst_30 {dimension_numbers = #tpu.dot_dimension_numbers<[1], [0], [0], [1], [0, 0, 1, 1], [], []>, precision = #tpu.contract_precision<fp32>} : vector<1x256xf32>, vector<256x16xf32>, vector<1x16xf32> -> vector<1x16xf32>
    %c0_31 = arith.constant 0 : index
    %c0_32 = arith.constant 0 : index
    %39 = vector.load %arg5[%c0_31, %c0_32] : memref<256x16xf32, #tpu.memory_space<vmem>>, vector<256x16xf32>
    %cst_33 = arith.constant dense<0.000000e+00> : vector<1x16xf32>
    %40 = tpu.matmul %36, %39, %cst_33 {dimension_numbers = #tpu.dot_dimension_numbers<[1], [0], [0], [1], [0, 0, 1, 1], [], []>, precision = #tpu.contract_precision<fp32>} : vector<1x256xf32>, vector<256x16xf32>, vector<1x16xf32> -> vector<1x16xf32>
    %cst_34 = arith.constant 5.120000e+02 : f32
    %41 = vector.broadcast %cst_34 : f32 to vector<1x16xf32>
    %42 = arith.divf %38, %41 : vector<1x16xf32>
    %cst_35 = arith.constant 5.120000e+02 : f32
    %43 = vector.broadcast %cst_35 : f32 to vector<1x16xf32>
    %44 = arith.divf %40, %43 : vector<1x16xf32>
    %45 = arith.mulf %42, %42 : vector<1x16xf32>
    %46 = arith.subf %44, %45 : vector<1x16xf32>
    %c0_36 = arith.constant 0 : index
    %c0_37 = arith.constant 0 : index
    %47 = vector.load %arg3[%c0_36, %c0_37] : memref<1x16xf32, #tpu.memory_space<vmem>>, vector<1x16xf32>
    %cst_38 = arith.constant 9.99999974E-6 : f32
    %48 = vector.broadcast %cst_38 : f32 to vector<1x16xf32>
    %49 = arith.addf %46, %48 : vector<1x16xf32>
    %50 = math.rsqrt %49 : vector<1x16xf32>
    %51 = arith.mulf %47, %50 : vector<1x16xf32>
    %c0_39 = arith.constant 0 : index
    %c0_40 = arith.constant 0 : index
    %52 = vector.load %arg4[%c0_39, %c0_40] : memref<1x16xf32, #tpu.memory_space<vmem>>, vector<1x16xf32>
    %53 = arith.mulf %42, %51 : vector<1x16xf32>
    %54 = arith.subf %52, %53 : vector<1x16xf32>
    %c0_41 = arith.constant 0 : index
    %c0_42 = arith.constant 0 : index
    %55 = vector.load %arg6[%c0_41, %c0_42] : memref<16x256xf32, #tpu.memory_space<vmem>>, vector<16x256xf32>
    %cst_43 = arith.constant dense<0.000000e+00> : vector<1x256xf32>
    %56 = tpu.matmul %51, %55, %cst_43 {dimension_numbers = #tpu.dot_dimension_numbers<[1], [0], [0], [1], [0, 0, 1, 1], [], []>, precision = #tpu.contract_precision<fp32>} : vector<1x16xf32>, vector<16x256xf32>, vector<1x256xf32> -> vector<1x256xf32>
    %c0_44 = arith.constant 0 : index
    %c0_45 = arith.constant 0 : index
    %57 = vector.load %arg6[%c0_44, %c0_45] : memref<16x256xf32, #tpu.memory_space<vmem>>, vector<16x256xf32>
    %cst_46 = arith.constant dense<0.000000e+00> : vector<1x256xf32>
    %58 = tpu.matmul %54, %57, %cst_46 {dimension_numbers = #tpu.dot_dimension_numbers<[1], [0], [0], [1], [0, 0, 1, 1], [], []>, precision = #tpu.contract_precision<fp32>} : vector<1x16xf32>, vector<16x256xf32>, vector<1x256xf32> -> vector<1x256xf32>
    %59 = vector.broadcast %56 : vector<1x256xf32> to vector<32x256xf32>
    %60 = arith.mulf %31, %59 : vector<32x256xf32>
    %61 = vector.broadcast %58 : vector<1x256xf32> to vector<32x256xf32>
    %62 = arith.addf %60, %61 : vector<32x256xf32>
    %c0_47 = arith.constant 0 : index
    %c0_48 = arith.constant 0 : index
    %63 = vector.load %arg7[%c0_47, %c0_48] : memref<32x256xf32, #tpu.memory_space<vmem>>, vector<32x256xf32>
    tpu.vector_store %arg7[%c0_47, %c0_48], %62 {strides = array<i32>} : memref<32x256xf32, #tpu.memory_space<vmem>>, vector<32x256xf32>,
    return
  }
}

</mosaic_0001>

<bundles_post_ra>
// kernel: tpu_custom_call.1
= control target key start
LH: loop header
LB: loop body
LE: loop exit
PB: predicated region body
PF: predicated region fallthrough
CT: control target
= control target key end

     0   :  { %12 = vsyncpa [#allocation4], 0  ;;  %s6851_s0 = inlined_call_operand.vmem [shape: f32[2,16,64], index: 0, kind: input, shape index: {}]   ;;  %s6852_s1 = inlined_call_operand.hbm [shape: f32[3,64,256], index: 1, kind: input, shape index: {}]   ;;  %s6853_s2 = inlined_call_operand.vmem [shape: f32[1,256], index: 2, kind: input, shape index: {}]   ;;  %s6854_s3 = inlined_call_operand.vmem [shape: f32[1,16], index: 3, kind: input, shape index: {}]   ;;  %s6855_s4 = inlined_call_operand.vmem [shape: f32[1,16], index: 4, kind: input, shape index: {}]   ;;  %s6856_s5 = inlined_call_operand.vmem [shape: f32[256,16], index: 5, kind: input, shape index: {}]   ;;  %s6857_s6 = inlined_call_operand.vmem [shape: f32[16,256], index: 6, kind: input, shape index: {}]   ;;  %s6858_s7 = inlined_call_operand.hbm [shape: f32[32,256], index: 7, kind: output, shape index: {}]  }
   0x1   :  { %13 = vsyncpa [#allocation5], 0  ;;  %s20_s26 = sshll.u32 %s6852_s1, 4  ;;  %s4422_s27 = smov [#allocation3]   ;;  %s21_s26 = int_to_ptr.hbm [resolvable:$true] %s20_s26 }
   0x2   :  { %s22_s28 = sshll.u32 %s4422_s27, 4  ;;  %s4423_s29 = smov 256   ;;  %s23_s28 = int_to_ptr.vmem [resolvable:$true] %s22_s28 }
   0x3   :  { %s4424_s30 = smov 16  }
   0x4   :  { %28 = dma.hbm_to_vmem [thread:$0]  %s21_s26, 6144, %s23_s28, [#allocation4], %s4423_s29, %s4423_s29, %s4424_s30  }
   0x5   :  { %4418 = dma.done.wait [#allocation4], 6144  }
   0x6   :  { %4419 = vsyncadd [#allocation4], 4294961152  ;;  %vm43_vm0 = vcmask 523264   ;;  %vm46_vm1 = vcmask 517120   ;;  %v4425_v0 = vmov 0.0   ;;  %v113_v1 = vld [vmem:[#allocation3 + $0xf0] sm:$0xff] }
   0x7   :  { %44 = vst.msk [vmem:[#allocation2] sm:$0xff] %vm43_vm0, %v4425_v0  ;;  %v111_v2 = vld [vmem:[#allocation3 + $0xe0] sm:$0xff]  ;;  %v109_v3 = vld [vmem:[#allocation3 + $0xd0] sm:$0xff]  ;;  %v4478_v4 = vand.u32 4294901760, %v113_v1  ;;  %v52_v20 = vld [vmem:[%s6851_s0 + $0x8] sm:$0xff]  ;;  %vm87_vm2 = vcmask 1046528  }
   0x8   :  { %45 = vst.msk [vmem:[#allocation2 + $0x8] sm:$0xff] %vm43_vm0, %v4425_v0  ;;  %v4480_v5 = vand.u32 4294901760, %v111_v2  ;;  %v4482_v6 = vand.u32 4294901760, %v109_v3  ;;  %v107_v7 = vld [vmem:[#allocation3 + $0xc0] sm:$0xff]  ;;  %v105_v8 = vld [vmem:[#allocation3 + $0xb0] sm:$0xff]  ;;  %v54_v30 = vld [vmem:[%s6851_s0 + $0x18] sm:$0xff] }
   0x9   :  { %47 = vst.msk [vmem:[#allocation2 + $0x10] sm:$0x3] %vm46_vm1, %v4425_v0  ;;  %v103_v9 = vld [vmem:[#allocation3 + $0xa0] sm:$0xff]  ;;  %v4484_v10 = vand.u32 4294901760, %v107_v7  ;;  %v4486_v11 = vand.u32 4294901760, %v105_v8  ;;  %v101_v13 = vld [vmem:[#allocation3 + $0x90] sm:$0xff]  ;;  %v4494_v16 = vsub.f32 %v113_v1, %v4478_v4  ;;  %315 = vmatpush.msra.mxu3 %v4478_v4  ;;  %132 = vmatpush.msra.mxu0 %v4478_v4 }
   0xa   :  { %48 = vst.msk [vmem:[#allocation2 + $0x18] sm:$0xff] %vm43_vm0, %v4425_v0  ;;  %v4488_v12 = vand.u32 4294901760, %v103_v9  ;;  %v99_v14 = vld [vmem:[#allocation3 + $0x80] sm:$0xff]  ;;  %v51_v15 = vld [vmem:[%s6851_s0] sm:$0xff]  ;;  %v4497_v17 = vsub.f32 %v111_v2, %v4480_v5  ;;  %v4502_v18 = vsub.f32 %v109_v3, %v4482_v6  ;;  %v4504_v19 = vand.u32 4294901760, %v101_v13  ;;  %v114_v42 = vld [vmem:[#allocation3 + $0xf8] sm:$0xff] }
   0xb   :  { %49 = vst.msk [vmem:[#allocation2 + $0x20] sm:$0xff] %vm43_vm0, %v4425_v0  ;;  %v53_v21 = vld [vmem:[%s6851_s0 + $0x10] sm:$0xff]  ;;  %v4513_v22 = vsub.f32 %v107_v7, %v4484_v10  ;;  %v4516_v23 = vsub.f32 %v105_v8, %v4486_v11  ;;  %v4521_v25 = vand.u32 4294901760, %v99_v14  ;;  %263 = vmatpush.msra.mxu2 %v4494_v16  ;;  %317 = vmatpush.msra.mxu3 %v4480_v5  ;;  %v190_v26 = vand.u32 4294901760, %v4494_v16  ;;  %v112_v43 = vld [vmem:[#allocation3 + $0xe8] sm:$0xff]  ;;  %v110_v44 = vld [vmem:[#allocation3 + $0xd8] sm:$0xff] }
   0xc   :  { %50 = vst.msk [vmem:[#allocation2 + $0x28] sm:$0x3] %vm46_vm1, %v4425_v0  ;;  %v4519_v24 = vsub.f32 %v103_v9, %v4488_v12  ;;  %v196_v27 = vand.u32 4294901760, %v4497_v17  ;;  %v202_v28 = vand.u32 4294901760, %v4502_v18  ;;  %v4530_v29 = vsub.f32 %v101_v13, %v4504_v19  ;;  %134 = vmatpush.msra.mxu0 %v4480_v5  ;;  %v108_v47 = vld [vmem:[#allocation3 + $0xc8] sm:$0xff]  ;;  %s4341_s22 = sshll.u32 %s6858_s7, 4  ;;  %s4342_s22 = int_to_ptr.hbm [resolvable:$true] %s4341_s22 }
   0xd   :  { %55 = vst.msk [vmem:[#allocation2 + $0x1] sm:$0xff] %vm43_vm0, %v51_v15  ;;  %v208_v31 = vand.u32 4294901760, %v4513_v22  ;;  %v214_v32 = vand.u32 4294901760, %v4516_v23  ;;  %v4540_v33 = vsub.f32 %v99_v14, %v4521_v25  ;;  %266 = vmatpush.msra.mxu2 %v4497_v17  ;;  %v191_v35 = vsub.f32 %v4494_v16, %v190_v26  ;;  %319 = vmatpush.msra.mxu3 %v4482_v6 }
   0xe   :  { %56 = vst.msk [vmem:[#allocation2 + $0x9] sm:$0xff] %vm43_vm0, %v52_v20  ;;  %v220_v34 = vand.u32 4294901760, %v4519_v24  ;;  %v197_v36 = vsub.f32 %v4497_v17, %v196_v27  ;;  %v203_v37 = vsub.f32 %v4502_v18, %v202_v28  ;;  %136 = vmatpush.msra.mxu0 %v4482_v6  ;;  %v226_v41 = vand.u32 4294901760, %v4530_v29 }
   0xf   :  { %57 = vst.msk [vmem:[#allocation2 + $0x19] sm:$0xff] %vm43_vm0, %v53_v21  ;;  %v209_v38 = vsub.f32 %v4513_v22, %v208_v31  ;;  %v4562_v39 = vsub.f32 %v4516_v23, %v214_v32  ;;  %269 = vmatpush.msra.mxu2 %v4502_v18  ;;  %v192_v45 = vand.u32 4294901760, %v191_v35  ;;  %321 = vmatpush.msra.mxu3 %v4484_v10  ;;  %v232_v50 = vand.u32 4294901760, %v4540_v33 }
  0x10   :  { %v4567_v40 = vsub.f32 %v4519_v24, %v220_v34  ;;  %58 = vst.msk [vmem:[#allocation2 + $0x21] sm:$0xff] %vm43_vm0, %v54_v30  ;;  %v198_v46 = vand.u32 4294901760, %v197_v36  ;;  %138 = vmatpush.msra.mxu0 %v4484_v10  ;;  %v204_v48 = vand.u32 4294901760, %v203_v37  ;;  %v4579_v53 = vand.u32 4294901760, %v114_v42  ;;  %v106_v30 = vld [vmem:[#allocation3 + $0xb8] sm:$0xff] }
  0x11   :  { %v210_v49 = vand.u32 4294901760, %v209_v38  ;;  %193 = vmatpush.msra.mxu1 %v192_v45  ;;  %272 = vmatpush.msra.mxu2 %v4513_v22  ;;  %v216_v51 = vand.u32 4294901760, %v4562_v39  ;;  %v4581_v54 = vand.u32 4294901760, %v112_v43  ;;  %v4583_v55 = vand.u32 4294901760, %v110_v44 }
  0x12   :  { %323 = vmatpush.msra.mxu3 %v4486_v11  ;;  %140 = vmatpush.msra.mxu0 %v4486_v11  ;;  %v222_v58 = vand.u32 4294901760, %v4567_v40  ;;  %v4594_v59 = vsub.f32 %v4530_v29, %v226_v41  ;;  %v4596_v61 = vand.u32 4294901760, %v108_v47  ;;  %v4603_v1 = vsub.f32 %v114_v42, %v4579_v53 }
  0x13   :  { %199 = vmatpush.msra.mxu1 %v198_v46  ;;  %275 = vmatpush.msra.mxu2 %v4516_v23  ;;  %v4606_v2 = vsub.f32 %v112_v43, %v4581_v54  ;;  %v4613_v3 = vsub.f32 %v4540_v33, %v232_v50  ;;  %v4617_v8 = vsub.f32 %v110_v44, %v4583_v55  ;;  %v4649_v46 = vand.u32 4294901760, %v106_v30 }
  0x14   :  { %v4577_v52 = vld [vmem:[#allocation2] sm:$0xff]  ;;  %325 = vmatpush.msra.mxu3 %v4488_v12  ;;  %142 = vmatpush.msra.mxu0 %v4488_v12  ;;  %v4620_v9 = vsub.f32 %v108_v47, %v4596_v61  ;;  %v520_v20 = vand.u32 4294901760, %v4603_v1  ;;  %vm1451_vm3 = vcmask 1045504  }
  0x15   :  { %v4587_v56 = vld [vmem:[#allocation2 + $0x8] sm:$0xff]  ;;  %v88_v57 = vrot.slane %v4577_v52, 1  ;;  %v61_v60 = vld [vmem:[#allocation2 + $0x10] sm:$0x3]  ;;  %205 = vmatpush.msra.mxu1 %v204_v48  ;;  %278 = vmatpush.msra.mxu2 %v4519_v24  ;;  %v6861_v21 = vand.u32 4294901760, %v4606_v2  ;;  %v6860_v38 = vand.u32 4294901760, %v4617_v8 }
  0x16   :  { %v89_v62 = vrot.slane %v4587_v56, 1  ;;  %v91_v63 = vrot.slane %v61_v60, 1  ;;  %v4600_v0 = vld [vmem:[#allocation2 + $0x18] sm:$0xff]  ;;  %327 = vmatpush.msra.mxu3 %v4504_v19  ;;  %144 = vmatpush.msra.mxu0 %v4504_v19  ;;  %v521_v42 = vsub.f32 %v4603_v1, %v520_v20  ;;  %v6859_v47 = vand.u32 4294901760, %v4620_v9 }
  0x17   :  { %v93_v7 = vrot.slane %v4600_v0, 1  ;;  %v4625_v15 = vld [vmem:[#allocation2 + $0x20] sm:$0xff]  ;;  %211 = vmatpush.msra.mxu1 %v210_v49  ;;  %281 = vmatpush.msra.mxu2 %v4530_v29  ;;  %v527_v43 = vsub.f32 %v4606_v2, %v6861_v21  ;;  %v64_v45 = vld [vmem:[#allocation2 + $0x28] sm:$0x3]  ;;  %v228_v49 = vand.u32 4294901760, %v4594_v59 }
  0x18   :  { %v90_v13 = vsel %vm87_vm2, %v88_v57, %v89_v62  ;;  %v92_v14 = vsel %vm87_vm2, %v89_v62, %v91_v63  ;;  %v94_v37 = vrot.slane %v4625_v15, 1  ;;  %329 = vmatpush.msra.mxu3 %v4521_v25  ;;  %146 = vmatpush.msra.mxu0 %v4521_v25  ;;  %v522_v60 = vand.u32 4294901760, %v521_v42  ;;  %v104_v62 = vld [vmem:[#allocation3 + $0xa8] sm:$0xff] }
  0x19   :  { %v115_v35 = vsel %vm43_vm0, %v90_v13, 0  ;;  %v117_v36 = vsel %vm43_vm0, %v92_v14, 0  ;;  %217 = vmatpush.msra.mxu1 %v216_v51  ;;  %284 = vmatpush.msra.mxu2 %v4540_v33  ;;  %v528_v51 = vand.u32 4294901760, %v527_v43  ;;  %v102_v13 = vld [vmem:[#allocation3 + $0x98] sm:$0xff]  ;;  %v234_v14 = vand.u32 4294901760, %v4613_v3  ;;  %v100_v42 = vld [vmem:[#allocation3 + $0x88] sm:$0xff] }
  0x1a   :  { %v4636_v39 = vand.u32 4294901760, %v115_v35  ;;  %v4638_v40 = vand.u32 4294901760, %v117_v36  ;;  %v95_v44 = vsel %vm87_vm2, %v93_v7, %v94_v37  ;;  %366 = vmatpush.msrb.mxu0 %v190_v26  ;;  %v533_v7 = vsub.f32 %v4617_v8, %v6860_v38  ;;  %523 = vmatpush.msrb.mxu3 %v522_v60  ;;  %v77_v33 = vld [vmem:[#allocation3 + $0x60] sm:$0xff] }
  0x1b   :  { %v119_v63 = vsel %vm43_vm0, %v95_v44, 0  ;;  %462 = vmatpush.msrb.mxu2 %v4579_v53  ;;  %223 = vmatpush.msra.mxu1 %v222_v58  ;;  %v539_v16 = vsub.f32 %v4620_v9, %v6859_v47  ;;  %v4676_v26 = vand.u32 4294901760, %v104_v62  ;;  %v4689_v44 = vand.u32 4294901760, %v102_v13 }
  0x1c   :  { %v4654_v48 = vsub.f32 %v115_v35, %v4636_v39  ;;  %v4658_v57 = vsub.f32 %v117_v36, %v4638_v40  ;;  %v96_v35 = vrot.slane %v64_v45, 1  ;;  %v4679_v36 = vsub.f32 %v106_v30, %v4649_v46  ;;  %529 = vmatpush.msrb.mxu3 %v528_v51  ;;  %370 = vmatpush.msrb.mxu0 %v196_v27 }
  0x1d   :  { %464 = vmatpush.msrb.mxu2 %v4581_v54  ;;  %229 = vmatpush.msra.mxu1 %v228_v49  ;;  %v4687_v43 = vand.u32 4294901760, %v119_v63  ;;  %v534_v45 = vand.u32 4294901760, %v533_v7  ;;  %v4694_v60 = vsub.f32 %v104_v62, %v4676_v26  ;;  %v4701_v38 = vand.u32 4294901760, %v100_v42 }
  0x1e   :  { %287 = vmatmul.f32.vlgmr.msra.gmra.mxu2 %v4654_v48  ;;  %v4669_v59 = vand.u32 4294901760, %v4654_v48  ;;  %v4685_v3 = vand.u32 4294901760, %v4658_v57  ;;  %v544_v30 = vand.u32 4294901760, %v4679_v36  ;;  %v97_v49 = vsel %vm87_vm2, %v94_v37, %v96_v35  ;;  %374 = vmatpush.msrb.mxu0 %v202_v28 }
  0x1f   :  { %466 = vmatpush.msrb.mxu2 %v4583_v55  ;;  %235 = vmatpush.msra.mxu1 %v234_v14  ;;  %v4704_v21 = vsub.f32 %v102_v13, %v4689_v44  ;;  %v540_v51 = vand.u32 4294901760, %v539_v16  ;;  %v550_v7 = vand.u32 4294901760, %v4694_v60  ;;  %v4716_v27 = vsub.f32 %v119_v63, %v4687_v43 }
  0x20   :  { %333 = vmatmul.f32.vlgmr.msra.gmra.mxu3 %v4669_v59  ;;  %v150_v58 = vsub.f32 %v4654_v48, %v4669_v59  ;;  %237 = vmatmul.f32.vlgmr.msra.gmra.mxu1 %v4636_v39  ;;  %v545_v62 = vsub.f32 %v4679_v36, %v544_v30  ;;  %v158_v17 = vsub.f32 %v4658_v57, %v4685_v3  ;;  %v121_v14 = vsel %vm43_vm0, %v97_v49, 0 }
  0x21   :  { %468 = vmatpush.msrb.mxu2 %v4596_v61  ;;  %421 = vmatpush.msrb.mxu1 %v4478_v4  ;;  %v556_v37 = vand.u32 4294901760, %v4704_v21  ;;  %v4721_v13 = vsub.f32 %v100_v42, %v4701_v38  ;;  %v551_v35 = vsub.f32 %v4694_v60, %v550_v7  ;;  %v4740_v28 = vand.u32 4294901760, %v4716_v27 }
  0x22   :  { %v4696_v47 = vand.u32 4294901760, %v150_v58  ;;  %535 = vmatpush.msrb.mxu3 %v534_v45  ;;  %v546_v4 = vand.u32 4294901760, %v545_v62  ;;  %v4737_v18 = vand.u32 4294901760, %v158_v17  ;;  %v4742_v42 = vand.u32 4294901760, %v121_v14  ;;  %378 = vmatpush.msrb.mxu0 %v208_v31  ;;  %v67_v62 = vld [vmem:[#allocation3 + $0x10] sm:$0xff] }
  0x23   :  { %423 = vmatpush.msrb.mxu1 %v4480_v5  ;;  %v562_v63 = vand.u32 4294901760, %v4721_v13  ;;  %470 = vmatpush.msrb.mxu2 %v4649_v46  ;;  %v557_v16 = vsub.f32 %v4704_v21, %v556_v37  ;;  %v552_v5 = vand.u32 4294901760, %v551_v35  ;;  %v65_v35 = vld [vmem:[#allocation3] sm:$0xff] }
  0x24   :  { %152 = vmatmul.f32.vlgmr.msra.gmra.mxu0 %v4696_v47  ;;  %541 = vmatpush.msrb.mxu3 %v540_v51  ;;  %v4759_v22 = vsub.f32 %v121_v14, %v4742_v42 }
  0x25   :  { %425 = vmatpush.msrb.mxu1 %v4482_v6  ;;  %472 = vmatpush.msrb.mxu2 %v4676_v26  ;;  %v563_v58 = vsub.f32 %v4721_v13, %v562_v63  ;;  %v558_v45 = vand.u32 4294901760, %v557_v16  ;;  %v166_v6 = vsub.f32 %v4716_v27, %v4740_v28 }
  0x26   :  { %292 = vmatmul.f32.gmra.mxu2 %v4658_v57  ;;  %547 = vmatpush.msrb.mxu3 %v546_v4 }
  0x27   :  { %382 = vmatpush.msrb.mxu0 %v214_v32  ;;  %474 = vmatpush.msrb.mxu2 %v4689_v44  ;;  %v564_v23 = vand.u32 4294901760, %v563_v58  ;;  %v167_v31 = vand.u32 4294901760, %v166_v6  ;;  %v4769_v32 = vand.u32 4294901760, %v4759_v22 }
  0x28   :  { %339 = vmatmul.f32.gmra.mxu3 %v4685_v3  ;;  %241 = vmatmul.f32.gmra.mxu1 %v4638_v40 }
  0x29   :  { %427 = vmatpush.msrb.mxu1 %v4484_v10  ;;  %553 = vmatpush.msrb.mxu3 %v552_v5  ;;  %v174_v10 = vsub.f32 %v4759_v22, %v4769_v32 }
  0x2a   :  { %386 = vmatpush.msrb.mxu0 %v220_v34  ;;  %476 = vmatpush.msrb.mxu2 %v4701_v38 }
  0x2b   :  { %429 = vmatpush.msrb.mxu1 %v4486_v11  ;;  %559 = vmatpush.msrb.mxu3 %v558_v45  ;;  %v7019_v11 = vand.u32 4294901760, %v4606_v2  ;;  %v4792_v24 = vand.u32 4294901760, %v174_v10 }
  0x2c   :  { %160 = vmatmul.f32.gmra.mxu0 %v4737_v18  ;;  %696 = vmatpush.msra.mxu2 %v520_v20  ;;  %v71_v20 = vld [vmem:[#allocation3 + $0x30] sm:$0xff] }
  0x2d   :  { %390 = vmatpush.msrb.mxu0 %v226_v41  ;;  %431 = vmatpush.msrb.mxu1 %v4488_v12  ;;  %v7020_v12 = vand.u32 4294901760, %v4617_v8  ;;  %v4841_v41 = vand.u32 4294901760, %v77_v33 }
  0x2e   :  { %297 = vmatmul.f32.gmra.mxu2 %v4716_v27  ;;  %565 = vmatpush.msrb.mxu3 %v564_v23 }
  0x2f   :  { %394 = vmatpush.msrb.mxu0 %v232_v50  ;;  %433 = vmatpush.msrb.mxu1 %v4504_v19  ;;  %v7021_v19 = vand.u32 4294901760, %v4620_v9  ;;  %v75_v50 = vld [vmem:[#allocation3 + $0x50] sm:$0xff] }
  0x30   :  { %345 = vmatmul.f32.gmra.mxu3 %v4740_v28  ;;  %245 = vmatmul.f32.gmra.mxu1 %v4687_v43 }
  0x31   :  { %751 = vmatpush.msra.mxu3 %v4579_v53  ;;  %700 = vmatpush.msra.mxu2 %v7019_v11 }
  0x32   :  { %593 = vmatpush.msra.mxu0 %v4603_v1  ;;  %435 = vmatpush.msrb.mxu1 %v4521_v25  ;;  %v79_v25 = vld [vmem:[#allocation3 + $0x70] sm:$0xff] }
  0x33   :  { %704 = vmatpush.msra.mxu2 %v7020_v12  ;;  %753 = vmatpush.msra.mxu3 %v4581_v54  ;;  %v4835_v29 = vand.u32 4294901760, %v79_v25 }
  0x34   :  { %168 = vmatmul.f32.gmra.mxu0 %v167_v31  ;;  %645 = vmatpush.msra.mxu1 %v4579_v53  ;;  %v4847_v53 = vsub.f32 %v77_v33, %v4841_v41 }
  0x35   :  { %596 = vmatpush.msra.mxu0 %v4606_v2  ;;  %708 = vmatpush.msra.mxu2 %v7021_v19  ;;  %v4839_v34 = vsub.f32 %v79_v25, %v4835_v29  ;;  %v80_v19 = vld [vmem:[#allocation3 + $0x78] sm:$0xff] }
  0x36   :  { %302 = vmatmul.f32.gmra.mxu2 %v4759_v22  ;;  %755 = vmatpush.msra.mxu3 %v4583_v55 }
  0x37   :  { %599 = vmatpush.msra.mxu0 %v4617_v8  ;;  %712 = vmatpush.msra.mxu2 %v544_v30 }
  0x38   :  { %351 = vmatmul.f32.gmra.mxu3 %v4769_v32  ;;  %249 = vmatmul.f32.gmra.mxu1 %v4742_v42 }
  0x39   :  { %647 = vmatpush.msra.mxu1 %v4581_v54  ;;  %757 = vmatpush.msra.mxu3 %v4596_v61  ;;  %v4849_v54 = vand.u32 4294901760, %v75_v50 }
  0x3a   :  { %602 = vmatpush.msra.mxu0 %v4620_v9  ;;  %716 = vmatpush.msra.mxu2 %v550_v7  ;;  %v864_v9 = vand.u32 4294901760, %v4847_v53 }
  0x3b   :  { %649 = vmatpush.msra.mxu1 %v4583_v55  ;;  %759 = vmatpush.msra.mxu3 %v4649_v46  ;;  %v858_v55 = vand.u32 4294901760, %v4839_v34  ;;  %v4858_v1 = vsub.f32 %v75_v50, %v4849_v54  ;;  %v74_v50 = vld [vmem:[#allocation3 + $0x48] sm:$0xff] }
  0x3c   :  { %176 = vmatmul.f32.gmra.mxu0 %v4792_v24  ;;  %720 = vmatpush.msra.mxu2 %v556_v37  ;;  %v4899_v37 = vand.u32 4294901760, %v67_v62 }
  0x3d   :  { %605 = vmatpush.msra.mxu0 %v4679_v36  ;;  %651 = vmatpush.msra.mxu1 %v4596_v61  ;;  %v73_v61 = vld [vmem:[#allocation3 + $0x40] sm:$0xff]  ;;  %v859_v2 = vsub.f32 %v4839_v34, %v858_v55 }
  0x3e   :  { %482 = vmatmul.f32.vlgmr.msrb.gmra.mxu2 %v4696_v47  ;;  %761 = vmatpush.msra.mxu3 %v4676_v26  ;;  %v4863_v8 = vand.u32 4294901760, %v73_v61  ;;  %v4875_v47 = vand.u32 4294901760, %v71_v20  ;;  %v69_v36 = vld [vmem:[#allocation3 + $0x20] sm:$0xff] }
  0x3f   :  { %608 = vmatpush.msra.mxu0 %v4694_v60  ;;  %724 = vmatpush.msra.mxu2 %v562_v63  ;;  %v4884_v60 = vand.u32 4294901760, %v69_v36  ;;  %v4906_v63 = vsub.f32 %v67_v62, %v4899_v37 }
  0x40   :  { %567 = vmatmul.f32.vlgmr.msrb.gmra.mxu3 %v4636_v39  ;;  %437 = vmatmul.f32.vlgmr.msrb.gmra.mxu1 %v4636_v39  ;;  %v4882_v30 = vsub.f32 %v71_v20, %v4875_v47 }
  0x41   :  { %653 = vmatpush.msra.mxu1 %v4649_v46  ;;  %763 = vmatpush.msra.mxu3 %v4689_v44  ;;  %v865_v46 = vsub.f32 %v4847_v53, %v864_v9  ;;  %v4893_v7 = vsub.f32 %v69_v36, %v4884_v60  ;;  %v894_v6 = vand.u32 4294901760, %v4906_v63 }
  0x42   :  { %611 = vmatpush.msra.mxu0 %v4704_v21  ;;  %931 = vmatpush.msrb.mxu2 %v4839_v34  ;;  %v860_v21 = vand.u32 4294901760, %v859_v2 }
  0x43   :  { %655 = vmatpush.msra.mxu1 %v4676_v26  ;;  %765 = vmatpush.msra.mxu3 %v4701_v38  ;;  %v870_v26 = vand.u32 4294901760, %v4858_v1  ;;  %v888_v5 = vand.u32 4294901760, %v4893_v7 }
  0x44   :  { %396 = vmatmul.f32.vlgmr.msrb.gmra.mxu0 %v4636_v39  ;;  %934 = vmatpush.msrb.mxu2 %v4847_v53 }
  0x45   :  { %614 = vmatpush.msra.mxu0 %v4721_v13  ;;  %657 = vmatpush.msra.mxu1 %v4689_v44  ;;  %v866_v44 = vand.u32 4294901760, %v865_v46  ;;  %v871_v51 = vsub.f32 %v4858_v1, %v870_v26  ;;  %v882_v13 = vand.u32 4294901760, %v4882_v30  ;;  %v889_v23 = vsub.f32 %v4893_v7, %v888_v5 }
  0x46   :  { %490 = vmatmul.f32.gmra.mxu2 %v4737_v18  ;;  %983 = vmatpush.msrb.mxu3 %v4835_v29  ;;  %v4912_v18 = vand.u32 4294901760, %v65_v35 }
  0x47   :  { %659 = vmatpush.msra.mxu1 %v4701_v38  ;;  %800 = vmatpush.msrb.mxu0 %v4835_v29  ;;  %v4870_v38 = vsub.f32 %v73_v61, %v4863_v8  ;;  %v872_v14 = vand.u32 4294901760, %v871_v51  ;;  %v883_v16 = vsub.f32 %v4882_v30, %v882_v13  ;;  %v890_v11 = vand.u32 4294901760, %v889_v23 }
  0x48   :  { %571 = vmatmul.f32.gmra.mxu3 %v4638_v40  ;;  %441 = vmatmul.f32.gmra.mxu1 %v4638_v40  ;;  %v4919_v45 = vsub.f32 %v65_v35, %v4912_v18 }
  0x49   :  { %802 = vmatpush.msrb.mxu0 %v4841_v41  ;;  %985 = vmatpush.msrb.mxu3 %v4841_v41  ;;  %v876_v49 = vand.u32 4294901760, %v4870_v38  ;;  %v884_v58 = vand.u32 4294901760, %v883_v16 }
  0x4a   :  { %937 = vmatpush.msrb.mxu2 %v4858_v1  ;;  %861 = vmatpush.msrb.mxu1 %v860_v21  ;;  %v900_v10 = vand.u32 4294901760, %v4919_v45  ;;  %v72_v1 = vld [vmem:[#allocation3 + $0x38] sm:$0xff]  ;;  %v70_v21 = vld [vmem:[#allocation3 + $0x28] sm:$0xff] }
  0x4b   :  { %987 = vmatpush.msrb.mxu3 %v4849_v54  ;;  %804 = vmatpush.msrb.mxu0 %v4849_v54  ;;  %v877_v17 = vsub.f32 %v4870_v38, %v876_v49  ;;  %v5002_v20 = vand.u32 4294901760, %v72_v1  ;;  %v5008_v46 = vand.u32 4294901760, %v70_v21 }
  0x4c   :  { %400 = vmatmul.f32.gmra.mxu0 %v4638_v40  ;;  %940 = vmatpush.msrb.mxu2 %v4870_v38 }
  0x4d   :  { %989 = vmatpush.msrb.mxu3 %v4863_v8  ;;  %806 = vmatpush.msrb.mxu0 %v4863_v8  ;;  %v878_v4 = vand.u32 4294901760, %v877_v17 }
  0x4e   :  { %498 = vmatmul.f32.gmra.mxu2 %v167_v31  ;;  %867 = vmatpush.msrb.mxu1 %v866_v44  ;;  %v895_v31 = vsub.f32 %v4906_v63, %v894_v6  ;;  %v5018_v44 = vsub.f32 %v72_v1, %v5002_v20 }
  0x4f   :  { %991 = vmatpush.msrb.mxu3 %v4875_v47  ;;  %943 = vmatpush.msrb.mxu2 %v4882_v30  ;;  %v68_v30 = vld [vmem:[#allocation3 + $0x18] sm:$0xff] }
  0x50   :  { %575 = vmatmul.f32.gmra.mxu3 %v4687_v43  ;;  %445 = vmatmul.f32.gmra.mxu1 %v4687_v43  ;;  %v896_v12 = vand.u32 4294901760, %v895_v31 }
  0x51   :  { %993 = vmatpush.msrb.mxu3 %v4884_v60  ;;  %873 = vmatpush.msrb.mxu1 %v872_v14 }
  0x52   :  { %946 = vmatpush.msrb.mxu2 %v4893_v7  ;;  %808 = vmatpush.msrb.mxu0 %v4875_v47  ;;  %v66_v7 = vld [vmem:[#allocation3 + $0x8] sm:$0xff] }
  0x53   :  { %879 = vmatpush.msrb.mxu1 %v878_v4  ;;  %995 = vmatpush.msrb.mxu3 %v4899_v37  ;;  %v5041_v14 = vand.u32 4294901760, %v66_v7 }
  0x54   :  { %404 = vmatmul.f32.gmra.mxu0 %v4687_v43  ;;  %949 = vmatpush.msrb.mxu2 %v4906_v63 }
  0x55   :  { %810 = vmatpush.msrb.mxu0 %v4884_v60  ;;  %885 = vmatpush.msrb.mxu1 %v884_v58 }
  0x56   :  { %506 = vmatmul.f32.gmra.mxu2 %v4792_v24  ;;  %997 = vmatpush.msrb.mxu3 %v4912_v18 }
  0x57   :  { %952 = vmatpush.msrb.mxu2 %v4919_v45  ;;  %812 = vmatpush.msrb.mxu0 %v4899_v37 }
  0x58   :  { %579 = vmatmul.f32.gmra.mxu3 %v4742_v42  ;;  %449 = vmatmul.f32.gmra.mxu1 %v4742_v42 }
  0x59   :  { %891 = vmatpush.msrb.mxu1 %v890_v11  ;;  %814 = vmatpush.msrb.mxu0 %v4912_v18 }
  0x5b   :  { %897 = vmatpush.msrb.mxu1 %v896_v12 }
  0x5c   :  { %408 = vmatmul.f32.gmra.mxu0 %v4742_v42 }
  0x5e   :  { %726 = vmatmul.f32.vlgmr.msra.gmra.mxu2 %v4636_v39 }
  0x60   :  { %767 = vmatmul.f32.vlgmr.msra.gmra.mxu3 %v4636_v39  ;;  %v901_v39 = vsub.f32 %v4919_v45, %v900_v10  ;;  %663 = vmatmul.f32.vlgmr.msra.gmra.mxu1 %v4669_v59  ;;  %v78_v59 = vld [vmem:[#allocation3 + $0x68] sm:$0xff] }
  0x61   :  { %v4961_v33 = vand.u32 4294901760, %v78_v59 }
  0x62   :  { %v902_v24 = vand.u32 4294901760, %v901_v39 }
  0x64   :  { %617 = vmatmul.f32.vlgmr.msra.gmra.mxu0 %v4654_v48  ;;  %903 = vmatpush.msrb.mxu1 %v902_v24  ;;  %v4949_v48 = vand.u32 4294901760, %v80_v19  ;;  %v789_v24 = vsel %vm43_vm0, %v4625_v15, 0 }
  0x65   :  { %1034 = vmatpush.msra.mxu0 %v858_v55  ;;  %v4982_v55 = vand.u32 4294901760, %v74_v50  ;;  %v5108_v15 = vand.u32 4294901760, %v789_v24 }
  0x66   :  { %730 = vmatmul.f32.gmra.mxu2 %v4638_v40  ;;  %1089 = vmatpush.msra.mxu1 %v4835_v29  ;;  %v4959_v25 = vsub.f32 %v80_v19, %v4949_v48  ;;  %v76_v29 = vld [vmem:[#allocation3 + $0x58] sm:$0xff] }
  0x67   :  { %1038 = vmatpush.msra.mxu0 %v864_v9  ;;  %1130 = vmatpush.msra.mxu2 %v4949_v48 }
  0x68   :  { %771 = vmatmul.f32.gmra.mxu3 %v4638_v40  ;;  %669 = vmatmul.f32.gmra.mxu1 %v4685_v3  ;;  %v783_v40 = vsel %vm43_vm0, %v4577_v52, 0  ;;  %v4968_v3 = vand.u32 4294901760, %v76_v29  ;;  %v4971_v52 = vsub.f32 %v78_v59, %v4961_v33 }
  0x69   :  { %1042 = vmatpush.msra.mxu0 %v870_v26  ;;  %1091 = vmatpush.msra.mxu1 %v4841_v41  ;;  %v4973_v34 = vand.u32 4294901760, %v783_v40 }
  0x6a   :  { %1132 = vmatpush.msra.mxu2 %v4961_v33  ;;  %v1194_v53 = vand.u32 4294901760, %v4971_v52  ;;  %v4988_v61 = vsub.f32 %v76_v29, %v4968_v3 }
  0x6b   :  { %1046 = vmatpush.msra.mxu0 %v876_v49  ;;  %1093 = vmatpush.msra.mxu1 %v4849_v54  ;;  %v4998_v2 = vsub.f32 %v783_v40, %v4973_v34  ;;  %v5121_v40 = vsub.f32 %v789_v24, %v5108_v15 }
  0x6c   :  { %622 = vmatmul.f32.gmra.mxu0 %v4658_v57  ;;  %v1188_v57 = vand.u32 4294901760, %v4959_v25  ;;  %1134 = vmatpush.msra.mxu2 %v4968_v3  ;;  %v1195_v54 = vsub.f32 %v4971_v52, %v1194_v53  ;;  %v1200_v9 = vand.u32 4294901760, %v4988_v61 }
  0x6d   :  { %1050 = vmatpush.msra.mxu0 %v882_v13  ;;  %1095 = vmatpush.msra.mxu1 %v4863_v8  ;;  %v5005_v8 = vsub.f32 %v74_v50, %v4982_v55  ;;  %v5028_v49 = vand.u32 4294901760, %v4998_v2 }
  0x6e   :  { %734 = vmatmul.f32.gmra.mxu2 %v4687_v43  ;;  %v1189_v41 = vsub.f32 %v4959_v25, %v1188_v57  ;;  %v1196_v38 = vand.u32 4294901760, %v1195_v54  ;;  %v1201_v26 = vsub.f32 %v4988_v61, %v1200_v9 }
  0x6f   :  { %1054 = vmatpush.msra.mxu0 %v888_v5  ;;  %1136 = vmatpush.msra.mxu2 %v4982_v55  ;;  %v1206_v36 = vand.u32 4294901760, %v5005_v8  ;;  %v5056_v5 = vsub.f32 %v66_v7, %v5041_v14 }
  0x70   :  { %775 = vmatmul.f32.gmra.mxu3 %v4687_v43  ;;  %v1190_v43 = vand.u32 4294901760, %v1189_v41  ;;  %675 = vmatmul.f32.gmra.mxu1 %v4740_v28  ;;  %v785_v28 = vsel %vm43_vm0, %v4587_v56, 0  ;;  %v5025_v56 = vsub.f32 %v70_v21, %v5008_v46  ;;  %v1202_v51 = vand.u32 4294901760, %v1201_v26  ;;  %v1477_v21 = vld [vmem:[#allocation3 + $0x170] sm:$0xff] }
  0x71   :  { %1138 = vmatpush.msra.mxu2 %v5002_v20  ;;  %1097 = vmatpush.msra.mxu1 %v4875_v47  ;;  %v1207_v62 = vsub.f32 %v5005_v8, %v1206_v36  ;;  %v1212_v47 = vand.u32 4294901760, %v5018_v44  ;;  %v5038_v17 = vand.u32 4294901760, %v785_v28 }
  0x72   :  { %1191 = vmatpush.msra.mxu3 %v1190_v43  ;;  %1058 = vmatpush.msra.mxu0 %v894_v6  ;;  %v1218_v13 = vand.u32 4294901760, %v5025_v56 }
  0x73   :  { %1140 = vmatpush.msra.mxu2 %v5008_v46  ;;  %1099 = vmatpush.msra.mxu1 %v4884_v60  ;;  %v1208_v4 = vand.u32 4294901760, %v1207_v62  ;;  %v1213_v63 = vsub.f32 %v5018_v44, %v1212_v47  ;;  %v818_v60 = vsub.f32 %v4998_v2, %v5028_v49  ;;  %v5066_v6 = vsub.f32 %v785_v28, %v5038_v17  ;;  %v1475_v28 = vld [vmem:[#allocation3 + $0x160] sm:$0xff] }
  0x74   :  { %627 = vmatmul.f32.gmra.mxu0 %v4716_v27  ;;  %1197 = vmatpush.msra.mxu3 %v1196_v38  ;;  %v5022_v27 = vand.u32 4294901760, %v68_v30 }
  0x75   :  { %1062 = vmatpush.msra.mxu0 %v900_v10  ;;  %1101 = vmatpush.msra.mxu1 %v4899_v37  ;;  %v1214_v58 = vand.u32 4294901760, %v1213_v63  ;;  %v1230_v37 = vand.u32 4294901760, %v5056_v5  ;;  %v819_v10 = vand.u32 4294901760, %v818_v60  ;;  %v5082_v11 = vand.u32 4294901760, %v5066_v6 }
  0x76   :  { %738 = vmatmul.f32.gmra.mxu2 %v4742_v42  ;;  %v5044_v35 = vsub.f32 %v68_v30, %v5022_v27  ;;  %1203 = vmatpush.msra.mxu3 %v1202_v51 }
  0x77   :  { %1142 = vmatpush.msra.mxu2 %v5022_v27  ;;  %1103 = vmatpush.msra.mxu1 %v4912_v18  ;;  %v1231_v31 = vsub.f32 %v5056_v5, %v1230_v37  ;;  %v826_v18 = vsub.f32 %v5066_v6, %v5082_v11 }
  0x78   :  { %779 = vmatmul.f32.gmra.mxu3 %v4742_v42  ;;  %v1219_v42 = vsub.f32 %v5025_v56, %v1218_v13  ;;  %v1224_v16 = vand.u32 4294901760, %v5044_v35  ;;  %681 = vmatmul.f32.gmra.mxu1 %v4769_v32  ;;  %v787_v32 = vsel %vm43_vm0, %v4600_v0, 0 }
  0x79   :  { %1209 = vmatpush.msra.mxu3 %v1208_v4  ;;  %1144 = vmatpush.msra.mxu2 %v5041_v14  ;;  %v5084_v12 = vand.u32 4294901760, %v787_v32  ;;  %v1232_v0 = vand.u32 4294901760, %v1231_v31  ;;  %v827_v19 = vand.u32 4294901760, %v826_v18 }
  0x7a   :  { %v1220_v23 = vand.u32 4294901760, %v1219_v42  ;;  %v1225_v45 = vsub.f32 %v5044_v35, %v1224_v16 }
  0x7b   :  { %1215 = vmatpush.msra.mxu3 %v1214_v58  ;;  %v5092_v39 = vsub.f32 %v787_v32, %v5084_v12 }
  0x7c   :  { %632 = vmatmul.f32.gmra.mxu0 %v4759_v22  ;;  %v1226_v22 = vand.u32 4294901760, %v1225_v45 }
  0x7d   :  { %1221 = vmatpush.msra.mxu3 %v1220_v23  ;;  %v5106_v59 = vand.u32 4294901760, %v5092_v39 }
  0x7e   :  { %955 = vmatmul.f32.vlgmr.msrb.gmra.mxu2 %v4998_v2 }
  0x7f   :  { %1364 = vmatpush.msrb.mxu2 %v1188_v57  ;;  %1227 = vmatpush.msra.mxu3 %v1226_v22  ;;  %v1467_v22 = vld [vmem:[#allocation3 + $0x120] sm:$0xff] }
  0x80   :  { %1001 = vmatmul.f32.vlgmr.msrb.gmra.mxu3 %v5028_v49  ;;  %905 = vmatmul.f32.vlgmr.msrb.gmra.mxu1 %v4973_v34  ;;  %v5214_v18 = vand.u32 4294901760, %v1467_v22 }
  0x81   :  { %1368 = vmatpush.msrb.mxu2 %v1194_v53  ;;  %1233 = vmatpush.msra.mxu3 %v1232_v0 }
  0x82   :  { %1313 = vmatpush.msrb.mxu1 %v4949_v48 }
  0x83   :  { %1419 = vmatpush.msrb.mxu3 %v4949_v48  ;;  %1372 = vmatpush.msrb.mxu2 %v1200_v9  ;;  %v834_v48 = vsub.f32 %v5092_v39, %v5106_v59 }
  0x84   :  { %820 = vmatmul.f32.vlgmr.msrb.gmra.mxu0 %v819_v10  ;;  %1315 = vmatpush.msrb.mxu1 %v4961_v33 }
  0x85   :  { %1261 = vmatpush.msrb.mxu0 %v4959_v25  ;;  %1421 = vmatpush.msrb.mxu3 %v4961_v33  ;;  %v835_v25 = vand.u32 4294901760, %v834_v48  ;;  %v5134_v33 = vand.u32 4294901760, %v5121_v40 }
  0x86   :  { %960 = vmatmul.f32.gmra.mxu2 %v5066_v6  ;;  %1317 = vmatpush.msrb.mxu1 %v4968_v3 }
  0x87   :  { %1264 = vmatpush.msrb.mxu0 %v4971_v52  ;;  %1423 = vmatpush.msrb.mxu3 %v4968_v3  ;;  %v842_v29 = vsub.f32 %v5121_v40, %v5134_v33 }
  0x88   :  { %1007 = vmatmul.f32.gmra.mxu3 %v5082_v11  ;;  %1376 = vmatpush.msrb.mxu2 %v1206_v36 }
  0x89   :  { %1267 = vmatpush.msrb.mxu0 %v4988_v61  ;;  %909 = vmatmul.f32.gmra.mxu1 %v5038_v17  ;;  %v843_v57 = vand.u32 4294901760, %v842_v29  ;;  %v1465_v29 = vld [vmem:[#allocation3 + $0x110] sm:$0xff] }
  0x8a   :  { %1425 = vmatpush.msrb.mxu3 %v4982_v55  ;;  %1380 = vmatpush.msrb.mxu2 %v1212_v47 }
  0x8b   :  { %1270 = vmatpush.msrb.mxu0 %v5005_v8  ;;  %1319 = vmatpush.msrb.mxu1 %v4982_v55 }
  0x8c   :  { %828 = vmatmul.f32.gmra.mxu0 %v827_v19  ;;  %1427 = vmatpush.msrb.mxu3 %v5002_v20 }
  0x8d   :  { %1273 = vmatpush.msrb.mxu0 %v5018_v44  ;;  %1384 = vmatpush.msrb.mxu2 %v1218_v13  ;;  %v5171_v44 = vand.u32 4294901760, %v1475_v28 }
  0x8e   :  { %965 = vmatmul.f32.gmra.mxu2 %v5092_v39  ;;  %1321 = vmatpush.msrb.mxu1 %v5002_v20 }
  0x8f   :  { %1429 = vmatpush.msrb.mxu3 %v5008_v46  ;;  %1276 = vmatpush.msrb.mxu0 %v5025_v56  ;;  %v1473_v56 = vld [vmem:[#allocation3 + $0x150] sm:$0xff]  ;;  %v5176_v62 = vsub.f32 %v1475_v28, %v5171_v44 }
  0x90   :  { %1013 = vmatmul.f32.gmra.mxu3 %v5106_v59  ;;  %1388 = vmatpush.msrb.mxu2 %v1224_v16  ;;  %v5180_v7 = vand.u32 4294901760, %v1473_v56 }
  0x91   :  { %1323 = vmatpush.msrb.mxu1 %v5008_v46  ;;  %1431 = vmatpush.msrb.mxu3 %v5022_v27  ;;  %v5164_v46 = vand.u32 4294901760, %v1477_v21  ;;  %v1560_v42 = vand.u32 4294901760, %v5176_v62 }
  0x92   :  { %913 = vmatmul.f32.gmra.mxu1 %v5084_v12  ;;  %1392 = vmatpush.msrb.mxu2 %v1230_v37  ;;  %v5190_v63 = vsub.f32 %v1473_v56, %v5180_v7 }
  0x93   :  { %1279 = vmatpush.msrb.mxu0 %v5044_v35  ;;  %1433 = vmatpush.msrb.mxu3 %v5041_v14  ;;  %v5168_v36 = vsub.f32 %v1477_v21, %v5164_v46  ;;  %v1561_v23 = vsub.f32 %v5176_v62, %v1560_v42 }
  0x94   :  { %836 = vmatmul.f32.gmra.mxu0 %v835_v25  ;;  %1325 = vmatpush.msrb.mxu1 %v5022_v27  ;;  %v1566_v45 = vand.u32 4294901760, %v5190_v63 }
  0x95   :  { %1282 = vmatpush.msrb.mxu0 %v5056_v5  ;;  %v1554_v47 = vand.u32 4294901760, %v5168_v36  ;;  %v1469_v5 = vld [vmem:[#allocation3 + $0x130] sm:$0xff] }
  0x96   :  { %970 = vmatmul.f32.gmra.mxu2 %v5121_v40  ;;  %1327 = vmatpush.msrb.mxu1 %v5041_v14  ;;  %v1471_v14 = vld [vmem:[#allocation3 + $0x140] sm:$0xff]  ;;  %v5208_v32 = vand.u32 4294901760, %v1469_v5  ;;  %v1567_v0 = vsub.f32 %v5190_v63, %v1566_v45 }
  0x97   :  { %v1555_v4 = vsub.f32 %v5168_v36, %v1554_v47  ;;  %v5195_v16 = vand.u32 4294901760, %v1471_v14 }
  0x98   :  { %1019 = vmatmul.f32.gmra.mxu3 %v5134_v33  ;;  %v5219_v48 = vsub.f32 %v1469_v5, %v5208_v32 }
  0x99   :  { %v1556_v58 = vand.u32 4294901760, %v1555_v4  ;;  %v5205_v37 = vsub.f32 %v1471_v14, %v5195_v16 }
  0x9a   :  { %917 = vmatmul.f32.gmra.mxu1 %v5108_v15 }
  0x9c   :  { %844 = vmatmul.f32.gmra.mxu0 %v843_v57 }
  0x9d   :  { %v238_v3 = vpop.f32.mrf.mxu1 }
  0x9e   :  { %1150 = vmatmul.f32.vlgmr.msra.gmra.mxu2 %v819_v10  ;;  %v1562_v10 = vand.u32 4294901760, %v1561_v23 }
  0x9f   :  { %1627 = vmatpush.msra.mxu2 %v5168_v36 }
  0xa0   :  { %1235 = vmatmul.f32.vlgmr.msra.gmra.mxu3 %v4973_v34 }
  0xa1   :  { %v153_v52 = vpop.f32.mrf.mxu0  ;;  %v288_v50 = vpop.f32.mrf.mxu2  ;;  %1679 = vmatpush.msra.mxu3 %v5164_v46  ;;  %1630 = vmatpush.msra.mxu2 %v5176_v62 }
  0xa2   :  { %v239_v41 = vadd.f32 %v238_v3, %v153_v52  ;;  %1105 = vmatmul.f32.vlgmr.msra.gmra.mxu1 %v4973_v34  ;;  %v1568_v3 = vand.u32 4294901760, %v1567_v0  ;;  %v5224_v52 = vsub.f32 %v1467_v22, %v5214_v18  ;;  %v4364_v22 = vld [vmem:[#allocation2] sm:$0xff] }
  0xa3   :  { %v334_v53 = vpop.f32.mrf.mxu3  ;;  %1681 = vmatpush.msra.mxu3 %v5171_v44  ;;  %1633 = vmatpush.msra.mxu2 %v5190_v63 }
  0xa4   :  { %v289_v55 = vadd.f32 %v288_v50, %v239_v41  ;;  %1064 = vmatmul.f32.vlgmr.msra.gmra.mxu0 %v4973_v34  ;;  %1557 = vmatpush.msra.mxu1 %v1556_v58  ;;  %v5226_v50 = vand.u32 4294901760, %v1465_v29 }
  0xa5   :  { %v242_v1 = vpop.f32.mrf.mxu1  ;;  %1496 = vmatpush.msra.mxu0 %v5164_v46  ;;  %1683 = vmatpush.msra.mxu3 %v5180_v7 }
  0xa6   :  { %v5157_v61 = vadd.f32 %v334_v53, %v289_v55  ;;  %1158 = vmatmul.f32.gmra.mxu2 %v827_v19  ;;  %1563 = vmatpush.msra.mxu1 %v1562_v10  ;;  %v1578_v55 = vand.u32 4294901760, %v5219_v48  ;;  %v4365_v10 = vld [vmem:[#allocation2 + $0x8] sm:$0xff] }
  0xa7   :  { %1498 = vmatpush.msra.mxu0 %v5171_v44  ;;  %1685 = vmatpush.msra.mxu3 %v5195_v16  ;;  %v1453_v0 = vrot.slane %v4365_v10, 2 }
  0xa8   :  { %1239 = vmatmul.f32.gmra.mxu3 %v5038_v17  ;;  %1636 = vmatpush.msra.mxu2 %v5205_v37  ;;  %v1579_v21 = vsub.f32 %v5219_v48, %v1578_v55 }
  0xa9   :  { %v161_v43 = vpop.f32.mrf.mxu0  ;;  %v293_v54 = vpop.f32.mrf.mxu2  ;;  %1500 = vmatpush.msra.mxu0 %v5180_v7  ;;  %1687 = vmatpush.msra.mxu3 %v5208_v32 }
  0xaa   :  { %v243_v9 = vadd.f32 %v242_v1, %v161_v43  ;;  %1109 = vmatmul.f32.gmra.mxu1 %v5038_v17  ;;  %1639 = vmatpush.msra.mxu2 %v5219_v48  ;;  %v1463_v1 = vld [vmem:[#allocation3 + $0x100] sm:$0xff] }
  0xab   :  { %v340_v20 = vpop.f32.mrf.mxu3  ;;  %1502 = vmatpush.msra.mxu0 %v5195_v16  ;;  %1569 = vmatpush.msra.mxu1 %v1568_v3 }
  0xac   :  { %v294_v8 = vadd.f32 %v293_v54, %v243_v9  ;;  %1068 = vmatmul.f32.gmra.mxu0 %v5038_v17  ;;  %v5236_v54 = vsub.f32 %v1465_v29, %v5226_v50  ;;  %v1584_v9 = vand.u32 4294901760, %v5224_v52  ;;  %1642 = vmatpush.msra.mxu2 %v5224_v52 }
  0xad   :  { %v246_v26 = vpop.f32.mrf.mxu1  ;;  %1504 = vmatpush.msra.mxu0 %v5208_v32  ;;  %1689 = vmatpush.msra.mxu3 %v5214_v18 }
  0xae   :  { %v5162_v38 = vadd.f32 %v340_v20, %v294_v8  ;;  %1166 = vmatmul.f32.gmra.mxu2 %v835_v25  ;;  %v1572_v25 = vand.u32 4294901760, %v5205_v37  ;;  %v5239_v20 = vand.u32 4294901760, %v1463_v1  ;;  %v1590_v56 = vand.u32 4294901760, %v5236_v54 }
  0xaf   :  { %1506 = vmatpush.msra.mxu0 %v5214_v18  ;;  %1645 = vmatpush.msra.mxu2 %v5236_v54 }
  0xb0   :  { %1243 = vmatmul.f32.gmra.mxu3 %v5084_v12  ;;  %v1573_v53 = vsub.f32 %v5205_v37, %v1572_v25  ;;  %v1591_v5 = vsub.f32 %v5236_v54, %v1590_v56 }
  0xb1   :  { %v169_v30 = vpop.f32.mrf.mxu0  ;;  %v298_v27 = vpop.f32.mrf.mxu2  ;;  %1691 = vmatpush.msra.mxu3 %v5226_v50  ;;  %1508 = vmatpush.msra.mxu0 %v5226_v50 }
  0xb2   :  { %v247_v51 = vadd.f32 %v246_v26, %v169_v30  ;;  %1113 = vmatmul.f32.gmra.mxu1 %v5084_v12  ;;  %v1574_v8 = vand.u32 4294901760, %v1573_v53  ;;  %v1585_v26 = vsub.f32 %v5224_v52, %v1584_v9  ;;  %v5254_v30 = vsub.f32 %v1463_v1, %v5239_v20 }
  0xb3   :  { %v346_v13 = vpop.f32.mrf.mxu3  ;;  %1693 = vmatpush.msra.mxu3 %v5239_v20  ;;  %1510 = vmatpush.msra.mxu0 %v5239_v20 }
  0xb4   :  { %v299_v35 = vadd.f32 %v298_v27, %v247_v51  ;;  %1072 = vmatmul.f32.gmra.mxu0 %v5084_v12  ;;  %1575 = vmatpush.msra.mxu1 %v1574_v8  ;;  %v1580_v27 = vand.u32 4294901760, %v1579_v21  ;;  %v1596_v14 = vand.u32 4294901760, %v5254_v30  ;;  %v1474_v21 = vld [vmem:[#allocation3 + $0x158] sm:$0xff] }
  0xb5   :  { %v250_v31 = vpop.f32.mrf.mxu1  ;;  %1648 = vmatpush.msra.mxu2 %v5254_v30  ;;  %v5314_v63 = vand.u32 4294901760, %v1474_v21 }
  0xb6   :  { %v5197_v60 = vadd.f32 %v346_v13, %v299_v35  ;;  %1174 = vmatmul.f32.gmra.mxu2 %v843_v57  ;;  %v1586_v13 = vand.u32 4294901760, %v1585_v26  ;;  %1581 = vmatpush.msra.mxu1 %v1580_v27  ;;  %v1472_v26 = vld [vmem:[#allocation3 + $0x148] sm:$0xff] }
  0xb7   :  { %v5323_v27 = vsub.f32 %v1474_v21, %v5314_v63 }
  0xb8   :  { %1247 = vmatmul.f32.gmra.mxu3 %v5108_v15  ;;  %1587 = vmatpush.msra.mxu1 %v1586_v13 }
  0xb9   :  { %v177_v24 = vpop.f32.mrf.mxu0  ;;  %v303_v19 = vpop.f32.mrf.mxu2 }
  0xba   :  { %v251_v57 = vadd.f32 %v250_v31, %v177_v24  ;;  %1117 = vmatmul.f32.gmra.mxu1 %v5108_v15  ;;  %v1452_v31 = vrot.slane %v4364_v22, 2  ;;  %v1592_v24 = vand.u32 4294901760, %v1591_v5  ;;  %v1468_v22 = vld [vmem:[#allocation3 + $0x128] sm:$0xff] }
  0xbb   :  { %v352_v41 = vpop.f32.mrf.mxu3 }
  0xbc   :  { %v304_v43 = vadd.f32 %v303_v19, %v251_v57  ;;  %1076 = vmatmul.f32.gmra.mxu0 %v5108_v15  ;;  %1593 = vmatpush.msra.mxu1 %v1592_v24 }
  0xbd   :  { %v438_v51 = vpop.f32.mrf.mxu1 }
  0xbe   :  { %v5246_v28 = vadd.f32 %v352_v41, %v304_v43  ;;  %1394 = vmatmul.f32.vlgmr.msrb.gmra.mxu2 %v4973_v34  ;;  %v1478_v41 = vld [vmem:[#allocation3 + $0x178] sm:$0xff] }
  0xbf   :  { %v5289_v43 = vand.u32 4294901760, %v1478_v41 }
  0xc0   :  { %1435 = vmatmul.f32.vlgmr.msrb.gmra.mxu3 %v4973_v34  ;;  %v1597_v34 = vsub.f32 %v5254_v30, %v1596_v14 }
  0xc1   :  { %v397_v35 = vpop.f32.mrf.mxu0  ;;  %v483_v4 = vpop.f32.mrf.mxu2  ;;  %1826 = vmatpush.msrb.mxu2 %v5289_v43 }
  0xc2   :  { %v398_v58 = vadd.f32 %v397_v35, %v5157_v61  ;;  %1331 = vmatmul.f32.vlgmr.msrb.gmra.mxu1 %v5028_v49  ;;  %v1598_v29 = vand.u32 4294901760, %v1597_v34  ;;  %v1454_v49 = vsel %vm1451_vm3, %v1452_v31, %v1453_v0 }
  0xc3   :  { %v568_v23 = vpop.f32.mrf.mxu3  ;;  %v1479_v1 = vsel %vm43_vm0, %v1454_v49, 0  ;;  %v4367_v49 = vld [vmem:[#allocation2 + $0x18] sm:$0xff] }
  0xc4   :  { %v5273_v19 = vadd.f32 %v438_v51, %v398_v58  ;;  %1285 = vmatmul.f32.vlgmr.msrb.gmra.mxu0 %v4998_v2  ;;  %v5276_v61 = vadd.f32 %v568_v23, %v483_v4  ;;  %1599 = vmatpush.msra.mxu1 %v1598_v29  ;;  %v5302_v8 = vand.u32 4294901760, %v1479_v1  ;;  %v5325_v51 = vand.u32 4294901760, %v1472_v26  ;;  %v1466_v29 = vld [vmem:[#allocation3 + $0x118] sm:$0xff] }
  0xc5   :  { %1730 = vmatpush.msrb.mxu0 %v1554_v47  ;;  %v442_v57 = vpop.f32.mrf.mxu1 }
  0xc6   :  { %1398 = vmatmul.f32.gmra.mxu2 %v5038_v17  ;;  %1785 = vmatpush.msrb.mxu1 %v5164_v46  ;;  %v4366_v46 = vld [vmem:[#allocation2 + $0x10] sm:$0x3]  ;;  %v5330_v4 = vsub.f32 %v1479_v1, %v5302_v8 }
  0xc7   :  { %1734 = vmatpush.msrb.mxu0 %v1560_v42  ;;  %v1455_v42 = vrot.slane %v4366_v46, 2  ;;  %v1464_v46 = vld [vmem:[#allocation3 + $0x108] sm:$0xff] }
  0xc8   :  { %1439 = vmatmul.f32.gmra.mxu3 %v5038_v17  ;;  %v1476_v17 = vld [vmem:[#allocation3 + $0x168] sm:$0xff]  ;;  %1787 = vmatpush.msrb.mxu1 %v5171_v44  ;;  %v5362_v10 = vand.u32 4294901760, %v5330_v4 }
  0xc9   :  { %v401_v2 = vpop.f32.mrf.mxu0  ;;  %v491_v3 = vpop.f32.mrf.mxu2  ;;  %1738 = vmatpush.msrb.mxu0 %v1566_v45  ;;  %v1456_v37 = vsel %vm1451_vm3, %v1453_v0, %v1455_v42 }
  0xca   :  { %v402_v53 = vadd.f32 %v401_v2, %v5162_v38  ;;  %1337 = vmatmul.f32.gmra.mxu1 %v5082_v11  ;;  %v5300_v38 = vand.u32 4294901760, %v1476_v17  ;;  %v5305_v11 = vsub.f32 %v1478_v41, %v5289_v43  ;;  %v1481_v34 = vsel %vm43_vm0, %v1456_v37, 0  ;;  %v5372_v2 = vld [vmem:[#allocation2 + $0x20] sm:$0xff] }
  0xcb   :  { %v572_v36 = vpop.f32.mrf.mxu3  ;;  %1742 = vmatpush.msrb.mxu0 %v1572_v25  ;;  %1789 = vmatpush.msrb.mxu1 %v5180_v7  ;;  %v1470_v7 = vld [vmem:[#allocation3 + $0x138] sm:$0xff]  ;;  %v5375_v41 = vand.u32 4294901760, %v1466_v29 }
  0xcc   :  { %v5294_v47 = vadd.f32 %v442_v57, %v402_v53  ;;  %1290 = vmatmul.f32.gmra.mxu0 %v5066_v6  ;;  %v5297_v62 = vadd.f32 %v572_v36, %v491_v3  ;;  %v5312_v6 = vsub.f32 %v1476_v17, %v5300_v38  ;;  %v1884_v45 = vand.u32 4294901760, %v5305_v11  ;;  %1828 = vmatpush.msrb.mxu2 %v5300_v38 }
  0xcd   :  { %v446_v44 = vpop.f32.mrf.mxu1  ;;  %1746 = vmatpush.msrb.mxu0 %v1578_v55  ;;  %1791 = vmatpush.msrb.mxu1 %v5195_v16  ;;  %v1896_v55 = vand.u32 4294901760, %v5323_v27  ;;  %v5348_v16 = vsub.f32 %v1472_v26, %v5325_v51  ;;  %v1457_v57 = vrot.slane %v4367_v49, 2  ;;  %v5379_v53 = vand.u32 4294901760, %v1481_v34 }
  0xce   :  { %1402 = vmatmul.f32.gmra.mxu2 %v5084_v12  ;;  %v1890_v25 = vand.u32 4294901760, %v5312_v6  ;;  %v5391_v54 = vsub.f32 %v1466_v29, %v5375_v41 }
  0xcf   :  { %1830 = vmatpush.msrb.mxu2 %v5314_v63  ;;  %1750 = vmatpush.msrb.mxu0 %v1584_v9  ;;  %v1902_v0 = vand.u32 4294901760, %v5348_v16 }
  0xd0   :  { %1443 = vmatmul.f32.gmra.mxu3 %v5084_v12  ;;  %v1885_v12 = vsub.f32 %v5305_v11, %v1884_v45  ;;  %v1891_v48 = vsub.f32 %v5312_v6, %v1890_v25  ;;  %1793 = vmatpush.msrb.mxu1 %v5208_v32  ;;  %v1458_v32 = vrot.slane %v5372_v2, 2 }
  0xd1   :  { %v405_v13 = vpop.f32.mrf.mxu0  ;;  %v499_v35 = vpop.f32.mrf.mxu2  ;;  %1832 = vmatpush.msrb.mxu2 %v5325_v51  ;;  %1754 = vmatpush.msrb.mxu0 %v1590_v56  ;;  %v1903_v1 = vsub.f32 %v5348_v16, %v1902_v0  ;;  %v5394_v56 = vand.u32 4294901760, %v1464_v46 }
  0xd2   :  { %v406_v5 = vadd.f32 %v405_v13, %v5197_v60  ;;  %1343 = vmatmul.f32.gmra.mxu1 %v5106_v59  ;;  %v1886_v23 = vand.u32 4294901760, %v1885_v12  ;;  %v5350_v60 = vand.u32 4294901760, %v1470_v7  ;;  %v1892_v9 = vand.u32 4294901760, %v1891_v48 }
  0xd3   :  { %v576_v58 = vpop.f32.mrf.mxu3  ;;  %v1897_v59 = vsub.f32 %v5323_v27, %v1896_v55  ;;  %1795 = vmatpush.msrb.mxu1 %v5214_v18  ;;  %v1459_v18 = vsel %vm1451_vm3, %v1457_v57, %v1458_v32  ;;  %v5407_v12 = vsub.f32 %v1464_v46, %v5394_v56  ;;  %1758 = vmatpush.msrb.mxu0 %v1596_v14 }
  0xd4   :  { %v5352_v31 = vadd.f32 %v446_v44, %v406_v5  ;;  %1295 = vmatmul.f32.gmra.mxu0 %v5092_v39  ;;  %v5355_v52 = vadd.f32 %v576_v58, %v499_v35  ;;  %1887 = vmatpush.msrb.mxu3 %v1886_v23  ;;  %v5367_v24 = vsub.f32 %v1470_v7, %v5350_v60  ;;  %v5369_v39 = vand.u32 4294901760, %v1468_v22 }
  0xd5   :  { %1834 = vmatpush.msrb.mxu2 %v5350_v60  ;;  %v1898_v3 = vand.u32 4294901760, %v1897_v59  ;;  %v450_v42 = vpop.f32.mrf.mxu1  ;;  %v1904_v44 = vand.u32 4294901760, %v1903_v1  ;;  %v1920_v35 = vand.u32 4294901760, %v5391_v54  ;;  %1797 = vmatpush.msrb.mxu1 %v5226_v50  ;;  %v5416_v5 = vsub.f32 %v1481_v34, %v5379_v53 }
  0xd6   :  { %1406 = vmatmul.f32.gmra.mxu2 %v5108_v15  ;;  %1893 = vmatpush.msrb.mxu3 %v1892_v9  ;;  %v1908_v36 = vand.u32 4294901760, %v5367_v24  ;;  %v5387_v17 = vsub.f32 %v1468_v22, %v5369_v39  ;;  %v1926_v30 = vand.u32 4294901760, %v5407_v12  ;;  %v1483_v14 = vsel %vm43_vm0, %v1459_v18, 0  ;;  %v4369_v22 = vld [vmem:[#allocation2 + $0x28] sm:$0x3] }
  0xd7   :  { %1836 = vmatpush.msrb.mxu2 %v5369_v39  ;;  %1799 = vmatpush.msrb.mxu1 %v5239_v20  ;;  %v5443_v20 = vand.u32 4294901760, %v5416_v5  ;;  %v5445_v57 = vand.u32 4294901760, %v1483_v14 }
  0xd8   :  { %1447 = vmatmul.f32.gmra.mxu3 %v5108_v15  ;;  %v1909_v37 = vsub.f32 %v5367_v24, %v1908_v36  ;;  %v1914_v13 = vand.u32 4294901760, %v5387_v17  ;;  %v1927_v59 = vsub.f32 %v5407_v12, %v1926_v30 }
  0xd9   :  { %v409_v21 = vpop.f32.mrf.mxu0  ;;  %v507_v26 = vpop.f32.mrf.mxu2  ;;  %1899 = vmatpush.msrb.mxu3 %v1898_v3  ;;  %1838 = vmatpush.msrb.mxu2 %v5375_v41 }
  0xda   :  { %v410_v15 = vadd.f32 %v409_v21, %v5246_v28  ;;  %1349 = vmatmul.f32.gmra.mxu1 %v5134_v33  ;;  %v1514_v28 = vsub.f32 %v5330_v4, %v5362_v10  ;;  %v1910_v48 = vand.u32 4294901760, %v1909_v37  ;;  %v1915_v58 = vsub.f32 %v5387_v17, %v1914_v13 }
  0xdb   :  { %v580_v7 = vpop.f32.mrf.mxu3  ;;  %1905 = vmatpush.msrb.mxu3 %v1904_v44  ;;  %v1921_v33 = vsub.f32 %v5391_v54, %v1920_v35  ;;  %1840 = vmatpush.msrb.mxu2 %v5394_v56  ;;  %v1928_v3 = vand.u32 4294901760, %v1927_v59  ;;  %v1522_v44 = vsub.f32 %v5416_v5, %v5443_v20  ;;  %v5458_v37 = vsub.f32 %v1483_v14, %v5445_v57 }
  0xdc   :  { %v5421_v23 = vadd.f32 %v450_v42, %v410_v15  ;;  %1300 = vmatmul.f32.gmra.mxu0 %v5121_v40  ;;  %v5424_v50 = vadd.f32 %v580_v7, %v507_v26  ;;  %v1916_v34 = vand.u32 4294901760, %v1915_v58  ;;  %v1460_v40 = vrot.slane %v4369_v22, 2 }
  0xdd   :  { %1911 = vmatpush.msrb.mxu3 %v1910_v48  ;;  %v1922_v9 = vand.u32 4294901760, %v1921_v33  ;;  %v664_v29 = vpop.f32.mrf.mxu1  ;;  %v5440_v49 = vand.u32 4294901760, %v1514_v28  ;;  %v5472_v15 = vand.u32 4294901760, %v1522_v44 }
  0xde   :  { %1651 = vmatmul.f32.vlgmr.msra.gmra.mxu2 %v5330_v4 }
  0xdf   :  { %1917 = vmatpush.msrb.mxu3 %v1916_v34  ;;  %2060 = vmatpush.msra.mxu2 %v1884_v45  ;;  %v1461_v45 = vsel %vm1451_vm3, %v1458_v32, %v1460_v40 }
  0xe0   :  { %1697 = vmatmul.f32.vlgmr.msra.gmra.mxu3 %v5362_v10 }
  0xe1   :  { %v618_v1 = vpop.f32.mrf.mxu0  ;;  %v727_v46 = vpop.f32.mrf.mxu2  ;;  %1923 = vmatpush.msrb.mxu3 %v1922_v9  ;;  %2064 = vmatpush.msra.mxu2 %v1890_v25 }
  0xe2   :  { %v619_v42 = vadd.f32 %v618_v1, %v5276_v61  ;;  %1601 = vmatmul.f32.vlgmr.msra.gmra.mxu1 %v5302_v8  ;;  %v1485_v61 = vsel %vm43_vm0, %v1461_v45, 0  ;;  %vm3664_vm0 = vcmask 130048  }
  0xe3   :  { %v768_v21 = vpop.f32.mrf.mxu3  ;;  %1929 = vmatpush.msrb.mxu3 %v1928_v3  ;;  %2009 = vmatpush.msra.mxu1 %v5289_v43 }
  0xe4   :  { %v665_v26 = vadd.f32 %v664_v29, %v619_v42  ;;  %1516 = vmatmul.f32.vlgmr.msra.gmra.mxu0 %v5440_v49  ;;  %2068 = vmatpush.msra.mxu2 %v1896_v55 }
  0xe5   :  { %2115 = vmatpush.msra.mxu3 %v5289_v43  ;;  %1957 = vmatpush.msra.mxu0 %v5305_v11  ;;  %v670_v32 = vpop.f32.mrf.mxu1  ;;  %v5475_v11 = vand.u32 4294901760, %v5458_v37  ;;  %v5477_v43 = vand.u32 4294901760, %v1485_v61 }
  0xe6   :  { %v728_v25 = vadd.f32 %v727_v46, %v665_v26  ;;  %1656 = vmatmul.f32.gmra.mxu2 %v5416_v5  ;;  %2011 = vmatpush.msra.mxu1 %v5300_v38 }
  0xe7   :  { %2117 = vmatpush.msra.mxu3 %v5300_v38  ;;  %1960 = vmatpush.msra.mxu0 %v5312_v6  ;;  %v1530_v38 = vsub.f32 %v5458_v37, %v5475_v11 }
  0xe8   :  { %v5469_v2 = vadd.f32 %v768_v21, %v728_v25  ;;  %1703 = vmatmul.f32.gmra.mxu3 %v5443_v20  ;;  %2072 = vmatpush.msra.mxu2 %v1902_v0 }
  0xe9   :  { %v623_v18 = vpop.f32.mrf.mxu0  ;;  %v731_v7 = vpop.f32.mrf.mxu2  ;;  %1963 = vmatpush.msra.mxu0 %v5323_v27  ;;  %2119 = vmatpush.msra.mxu3 %v5314_v63  ;;  %v5492_v27 = vsub.f32 %v1485_v61, %v5477_v43  ;;  %v1531_v0 = vand.u32 4294901760, %v1530_v38 }
  0xea   :  { %7022 = vst [vmem:[#allocation9_spill] sm:$0xff] %v5469_v2  ;;  %v624_v6 = vadd.f32 %v623_v18, %v5297_v62  ;;  %2013 = vmatpush.msra.mxu1 %v5314_v63  ;;  %2076 = vmatpush.msra.mxu2 %v1908_v36 }
  0xeb   :  { %v772_v55 = vpop.f32.mrf.mxu3  ;;  %1605 = vmatmul.f32.gmra.mxu1 %v5379_v53  ;;  %1966 = vmatpush.msra.mxu0 %v5348_v16  ;;  %v5507_v36 = vand.u32 4294901760, %v5492_v27 }
  0xec   :  { %v671_v28 = vadd.f32 %v670_v32, %v624_v6  ;;  %1524 = vmatmul.f32.gmra.mxu0 %v5472_v15  ;;  %2121 = vmatpush.msra.mxu3 %v5325_v51 }
  0xed   :  { %1969 = vmatpush.msra.mxu0 %v5367_v24  ;;  %2015 = vmatpush.msra.mxu1 %v5325_v51  ;;  %v676_v16 = vpop.f32.mrf.mxu1 }
  0xee   :  { %v732_v62 = vadd.f32 %v731_v7, %v671_v28  ;;  %1661 = vmatmul.f32.gmra.mxu2 %v5458_v37  ;;  %2123 = vmatpush.msra.mxu3 %v5350_v60 }
  0xef   :  { %2080 = vmatpush.msra.mxu2 %v1914_v13  ;;  %1972 = vmatpush.msra.mxu0 %v5387_v17 }
  0xf0   :  { %v5503_v63 = vadd.f32 %v772_v55, %v732_v62  ;;  %1709 = vmatmul.f32.gmra.mxu3 %v5475_v11  ;;  %2017 = vmatpush.msra.mxu1 %v5350_v60  ;;  %v1538_v60 = vsub.f32 %v5492_v27, %v5507_v36 }
  0xf1   :  { %v628_v24 = vpop.f32.mrf.mxu0  ;;  %v735_v48 = vpop.f32.mrf.mxu2  ;;  %2084 = vmatpush.msra.mxu2 %v1920_v35  ;;  %2125 = vmatpush.msra.mxu3 %v5369_v39 }
  0xf2   :  { %7023 = vst [vmem:[#allocation10_spill] sm:$0xff] %v5503_v63  ;;  %v629_v51 = vadd.f32 %v628_v24, %v5355_v52  ;;  %1975 = vmatpush.msra.mxu0 %v5391_v54  ;;  %2019 = vmatpush.msra.mxu1 %v5369_v39  ;;  %v1539_v58 = vand.u32 4294901760, %v1538_v60 }
  0xf3   :  { %v776_v13 = vpop.f32.mrf.mxu3  ;;  %1609 = vmatmul.f32.gmra.mxu1 %v5445_v57  ;;  %2088 = vmatpush.msra.mxu2 %v1926_v30 }
  0xf4   :  { %v677_v17 = vadd.f32 %v676_v16, %v629_v51  ;;  %1532 = vmatmul.f32.gmra.mxu0 %v1531_v0  ;;  %2127 = vmatpush.msra.mxu3 %v5375_v41 }
  0xf5   :  { %1978 = vmatpush.msra.mxu0 %v5407_v12  ;;  %2021 = vmatpush.msra.mxu1 %v5375_v41  ;;  %v682_v35 = vpop.f32.mrf.mxu1 }
  0xf6   :  { %v736_v52 = vadd.f32 %v735_v48, %v677_v17  ;;  %1666 = vmatmul.f32.gmra.mxu2 %v5492_v27  ;;  %2129 = vmatpush.msra.mxu3 %v5394_v56  ;;  %v2251_v48 = vld [vmem:[%s6856_s5 + $0x70] sm:$0xff] }
  0xf7   :  { %2023 = vmatpush.msra.mxu1 %v5394_v56  ;;  %v5658_v17 = vand.u32 4294901760, %v2251_v48 }
  0xf8   :  { %v5527_v54 = vadd.f32 %v776_v13, %v736_v52  ;;  %1715 = vmatmul.f32.gmra.mxu3 %v5507_v36 }
  0xf9   :  { %v633_v39 = vpop.f32.mrf.mxu0  ;;  %v739_v33 = vpop.f32.mrf.mxu2  ;;  %7054 = vst [vmem:[#allocation41_spill] sm:$0xff] %v5658_v17 }
  0xfa   :  { %7024 = vst [vmem:[#allocation11_spill] sm:$0xff] %v5527_v54  ;;  %v634_v30 = vadd.f32 %v633_v39, %v5424_v50  ;;  %v5673_v39 = vsub.f32 %v2251_v48, %v5658_v17 }
  0xfb   :  { %v780_v12 = vpop.f32.mrf.mxu3  ;;  %1613 = vmatmul.f32.gmra.mxu1 %v5477_v43 }
  0xfc   :  { %v683_v14 = vadd.f32 %v682_v35, %v634_v30  ;;  %1540 = vmatmul.f32.gmra.mxu0 %v1539_v58  ;;  %v2250_v35 = vld [vmem:[%s6856_s5 + $0x68] sm:$0xff]  ;;  %7058 = vst [vmem:[#allocation45_spill] sm:$0xff] %v5673_v39 }
  0xfd   :  { %v5537_v22 = vpop.f32.mrf.mxu1 }
  0xfe   :  { %v740_v41 = vadd.f32 %v739_v33, %v683_v14  ;;  %1846 = vmatmul.f32.vlgmr.msrb.gmra.mxu2 %v5440_v49  ;;  %v5675_v33 = vand.u32 4294901760, %v2250_v35 }
 0x100   :  { %v5534_v34 = vadd.f32 %v780_v12, %v740_v41  ;;  %1931 = vmatmul.f32.vlgmr.msrb.gmra.mxu3 %v5302_v8  ;;  %7059 = vst [vmem:[#allocation46_spill] sm:$0xff] %v5675_v33  ;;  %v2249_v12 = vld [vmem:[%s6856_s5 + $0x60] sm:$0xff]  ;;  %v5688_v41 = vand.u32 4294901760, %v5673_v39 }
 0x101   :  { %v5539_v40 = vpop.f32.mrf.mxu0  ;;  %v5541_v56 = vpop.f32.mrf.mxu2  ;;  %v5695_v48 = vand.u32 4294901760, %v2249_v12 }
 0x102   :  { %7025 = vst [vmem:[#allocation12_spill] sm:$0xff] %v5534_v34 }
 0x103   :  { %v5543_v9 = vpop.f32.mrf.mxu3  ;;  %1801 = vmatmul.f32.vlgmr.msrb.gmra.mxu1 %v5302_v8  ;;  %7061 = vst [vmem:[#allocation48_spill] sm:$0xff] %v5688_v41 }
 0x104   :  { %1760 = vmatmul.f32.vlgmr.msrb.gmra.mxu0 %v5302_v8  ;;  %7063 = vst [vmem:[#allocation50_spill] sm:$0xff] %v5695_v48 }
 0x106   :  { %1854 = vmatmul.f32.gmra.mxu2 %v5472_v15  ;;  %v5549_v50 = vpop.f32.mrf.mxu1 }
 0x108   :  { %1935 = vmatmul.f32.gmra.mxu3 %v5379_v53 }
 0x109   :  { %v5551_v59 = vpop.f32.mrf.mxu0  ;;  %v5553_v29 = vpop.f32.mrf.mxu2 }
 0x10b   :  { %v5555_v49 = vpop.f32.mrf.mxu3  ;;  %1805 = vmatmul.f32.gmra.mxu1 %v5379_v53 }
 0x10c   :  { %1764 = vmatmul.f32.gmra.mxu0 %v5379_v53 }
 0x10e   :  { %1862 = vmatmul.f32.gmra.mxu2 %v1531_v0 }
 0x10f   :  { %v5560_v3 = vpop.f32.mrf.mxu1 }
 0x110   :  { %1939 = vmatmul.f32.gmra.mxu3 %v5445_v57 }
 0x111   :  { %v5562_v1 = vpop.f32.mrf.mxu0  ;;  %v5564_v46 = vpop.f32.mrf.mxu2 }
 0x113   :  { %v5566_v42 = vpop.f32.mrf.mxu3  ;;  %1809 = vmatmul.f32.gmra.mxu1 %v5445_v57 }
 0x114   :  { %1768 = vmatmul.f32.gmra.mxu0 %v5445_v57 }
 0x116   :  { %1870 = vmatmul.f32.gmra.mxu2 %v1539_v58 }
 0x117   :  { %v5571_v45 = vpop.f32.mrf.mxu1 }
 0x118   :  { %1943 = vmatmul.f32.gmra.mxu3 %v5477_v43 }
 0x119   :  { %v5573_v21 = vpop.f32.mrf.mxu0  ;;  %v5575_v26 = vpop.f32.mrf.mxu2 }
 0x11a   :  { %7026 = vst [vmem:[#allocation13_spill] sm:$0xff] %v5575_v26 }
 0x11b   :  { %v5577_v44 = vpop.f32.mrf.mxu3  ;;  %1813 = vmatmul.f32.gmra.mxu1 %v5477_v43 }
 0x11c   :  { %7027 = vst [vmem:[#allocation14_spill] sm:$0xff] %v5577_v44  ;;  %1772 = vmatmul.f32.gmra.mxu0 %v5477_v43 }
 0x11e   :  { %2090 = vmatmul.f32.vlgmr.msra.gmra.mxu2 %v5302_v8 }
 0x11f   :  { %v5582_v61 = vpop.f32.mrf.mxu1 }
 0x120   :  { %7028 = vst [vmem:[#allocation15_spill] sm:$0xff] %v5582_v61  ;;  %2131 = vmatmul.f32.vlgmr.msra.gmra.mxu3 %v5302_v8 }
 0x121   :  { %v5585_v25 = vpop.f32.mrf.mxu0  ;;  %v5587_v32 = vpop.f32.mrf.mxu2 }
 0x122   :  { %7029 = vst [vmem:[#allocation16_spill] sm:$0xff] %v5585_v25 }
 0x123   :  { %7030 = vst [vmem:[#allocation17_spill] sm:$0xff] %v5587_v32  ;;  %v5589_v15 = vpop.f32.mrf.mxu3  ;;  %2027 = vmatmul.f32.vlgmr.msra.gmra.mxu1 %v5362_v10 }
 0x124   :  { %7031 = vst [vmem:[#allocation18_spill] sm:$0xff] %v5589_v15  ;;  %1981 = vmatmul.f32.vlgmr.msra.gmra.mxu0 %v5330_v4 }
 0x126   :  { %2094 = vmatmul.f32.gmra.mxu2 %v5379_v53 }
 0x127   :  { %v5594_v18 = vpop.f32.mrf.mxu1 }
 0x128   :  { %7032 = vst [vmem:[#allocation19_spill] sm:$0xff] %v5594_v18  ;;  %2135 = vmatmul.f32.gmra.mxu3 %v5379_v53 }
 0x129   :  { %v5597_v7 = vpop.f32.mrf.mxu0  ;;  %v5599_v6 = vpop.f32.mrf.mxu2 }
 0x12a   :  { %7033 = vst [vmem:[#allocation20_spill] sm:$0xff] %v5599_v6 }
 0x12b   :  { %v5601_v8 = vpop.f32.mrf.mxu3  ;;  %2033 = vmatmul.f32.gmra.mxu1 %v5443_v20 }
 0x12c   :  { %7034 = vst [vmem:[#allocation21_spill] sm:$0xff] %v5601_v8  ;;  %1986 = vmatmul.f32.gmra.mxu0 %v5416_v5  ;;  %v2242_v8 = vld [vmem:[%s6856_s5 + $0x28] sm:$0xff] }
 0x12d   :  { %v5830_v54 = vand.u32 4294901760, %v2242_v8 }
 0x12e   :  { %2098 = vmatmul.f32.gmra.mxu2 %v5445_v57 }
 0x12f   :  { %v5606_v10 = vpop.f32.mrf.mxu1  ;;  %7093 = vst [vmem:[#allocation80_spill] sm:$0xff] %v5830_v54 }
 0x130   :  { %7035 = vst [vmem:[#allocation22_spill] sm:$0xff] %v5606_v10  ;;  %2139 = vmatmul.f32.gmra.mxu3 %v5445_v57 }
 0x131   :  { %v5609_v4 = vpop.f32.mrf.mxu0  ;;  %v5611_v55 = vpop.f32.mrf.mxu2 }
 0x132   :  { %7036 = vst [vmem:[#allocation23_spill] sm:$0xff] %v5609_v4 }
 0x133   :  { %7037 = vst [vmem:[#allocation24_spill] sm:$0xff] %v5611_v55  ;;  %v5613_v53 = vpop.f32.mrf.mxu3  ;;  %2039 = vmatmul.f32.gmra.mxu1 %v5475_v11 }
 0x134   :  { %7038 = vst [vmem:[#allocation25_spill] sm:$0xff] %v5613_v53  ;;  %1991 = vmatmul.f32.gmra.mxu0 %v5458_v37 }
 0x136   :  { %2102 = vmatmul.f32.gmra.mxu2 %v5477_v43 }
 0x137   :  { %v5618_v20 = vpop.f32.mrf.mxu1 }
 0x138   :  { %7039 = vst [vmem:[#allocation26_spill] sm:$0xff] %v5618_v20  ;;  %2143 = vmatmul.f32.gmra.mxu3 %v5477_v43 }
 0x139   :  { %v5621_v5 = vpop.f32.mrf.mxu0  ;;  %v5623_v28 = vpop.f32.mrf.mxu2 }
 0x13a   :  { %7040 = vst [vmem:[#allocation27_spill] sm:$0xff] %v5621_v5  ;;  %v2239_v5 = vld [vmem:[%s6856_s5 + $0x10] sm:$0xff] }
 0x13b   :  { %7041 = vst [vmem:[#allocation28_spill] sm:$0xff] %v5623_v28  ;;  %v5625_v57 = vpop.f32.mrf.mxu3  ;;  %2045 = vmatmul.f32.gmra.mxu1 %v5507_v36 }
 0x13c   :  { %7042 = vst [vmem:[#allocation29_spill] sm:$0xff] %v5625_v57  ;;  %1996 = vmatmul.f32.gmra.mxu0 %v5492_v27  ;;  %v2252_v27 = vld [vmem:[%s6856_s5 + $0x78] sm:$0xff] }
 0x13d   :  { %v5648_v36 = vand.u32 4294901760, %v2252_v27 }
 0x13f   :  { %v5629_v38 = vpop.f32.mrf.mxu1  ;;  %7051 = vst [vmem:[#allocation38_spill] sm:$0xff] %v5648_v36  ;;  %v5656_v13 = vsub.f32 %v2252_v27, %v5648_v36  ;;  %2466 = vmatpush.msrb.mxu3 %v5648_v36  ;;  %2270 = vmatpush.msrb.mxu0 %v5648_v36  ;;  %v5691_v27 = vsub.f32 %v2250_v35, %v5675_v33 }
 0x140   :  { %7043 = vst [vmem:[#allocation30_spill] sm:$0xff] %v5629_v38 }
 0x141   :  { %v5631_v11 = vpop.f32.mrf.mxu0  ;;  %v5633_v37 = vpop.f32.mrf.mxu2  ;;  %7053 = vst [vmem:[#allocation40_spill] sm:$0xff] %v5656_v13  ;;  %v5670_v58 = vand.u32 4294901760, %v5656_v13  ;;  %2468 = vmatpush.msrb.mxu3 %v5658_v17  ;;  %2272 = vmatpush.msrb.mxu0 %v5658_v17  ;;  %v5706_v35 = vand.u32 4294901760, %v5691_v27 }
 0x142   :  { %7044 = vst [vmem:[#allocation31_spill] sm:$0xff] %v5631_v11  ;;  %2413 = vmatpush.msrb.mxu2 %v5656_v13  ;;  %v2243_v11 = vld [vmem:[%s6856_s5 + $0x30] sm:$0xff] }
 0x143   :  { %7045 = vst [vmem:[#allocation32_spill] sm:$0xff] %v5633_v37  ;;  %v5635_v62 = vpop.f32.mrf.mxu3  ;;  %v2313_v14 = vsub.f32 %v5656_v13, %v5670_v58  ;;  %2470 = vmatpush.msrb.mxu3 %v5675_v33  ;;  %2274 = vmatpush.msrb.mxu0 %v5675_v33  ;;  %v2319_v13 = vsub.f32 %v5673_v39, %v5688_v41  ;;  %v2247_v37 = vld [vmem:[%s6856_s5 + $0x50] sm:$0xff] }
 0x144   :  { %7046 = vst [vmem:[#allocation33_spill] sm:$0xff] %v5635_v62  ;;  %2416 = vmatpush.msrb.mxu2 %v5673_v39  ;;  %v5725_v57 = vand.u32 4294901760, %v2247_v37 }
 0x145   :  { %7057 = vst [vmem:[#allocation44_spill] sm:$0xff] %v5670_v58  ;;  %v5701_v62 = vand.u32 4294901760, %v2313_v14  ;;  %2472 = vmatpush.msrb.mxu3 %v5695_v48  ;;  %2276 = vmatpush.msrb.mxu0 %v5695_v48  ;;  %v5721_v39 = vand.u32 4294901760, %v2319_v13  ;;  %v2246_v13 = vld [vmem:[%s6856_s5 + $0x48] sm:$0xff] }
 0x146   :  { %7062 = vst [vmem:[#allocation49_spill] sm:$0xff] %v5691_v27  ;;  %2419 = vmatpush.msrb.mxu2 %v5691_v27 }
 0x147   :  { %v5637_v16 = vpop.f32.mrf.mxu1  ;;  %7064 = vst [vmem:[#allocation51_spill] sm:$0xff] %v5701_v62  ;;  %2315 = vmatpush.msrb.mxu1 %v5701_v62  ;;  %v5747_v62 = vsub.f32 %v2247_v37, %v5725_v57 }
 0x148   :  { %7047 = vst [vmem:[#allocation34_spill] sm:$0xff] %v5637_v16  ;;  %v2244_v16 = vld [vmem:[%s6856_s5 + $0x38] sm:$0xff] }
 0x149   :  { %v5639_v43 = vpop.f32.mrf.mxu0  ;;  %v5641_v0 = vpop.f32.mrf.mxu2  ;;  %7065 = vst [vmem:[#allocation52_spill] sm:$0xff] %v5706_v35  ;;  %2321 = vmatpush.msrb.mxu1 %v5721_v39  ;;  %v5766_v37 = vand.u32 4294901760, %v5747_v62 }
 0x14a   :  { %7048 = vst [vmem:[#allocation35_spill] sm:$0xff] %v5639_v43 }
 0x14b   :  { %7049 = vst [vmem:[#allocation36_spill] sm:$0xff] %v5641_v0  ;;  %v5643_v24 = vpop.f32.mrf.mxu3 }
 0x14c   :  { %7050 = vst [vmem:[#allocation37_spill] sm:$0xff] %v5643_v24  ;;  %v5709_v24 = vsub.f32 %v2249_v12, %v5695_v48  ;;  %v2325_v12 = vsub.f32 %v5691_v27, %v5706_v35 }
 0x14d   :  { %7069 = vst [vmem:[#allocation56_spill] sm:$0xff] %v5721_v39 }
 0x14e   :  { %7066 = vst [vmem:[#allocation53_spill] sm:$0xff] %v5709_v24  ;;  %v5733_v38 = vand.u32 4294901760, %v5709_v24  ;;  %v5744_v27 = vand.u32 4294901760, %v2325_v12  ;;  %2422 = vmatpush.msrb.mxu2 %v5709_v24  ;;  %v2245_v12 = vld [vmem:[%s6856_s5 + $0x40] sm:$0xff] }
 0x14f   :  { %v5653_v51 = vpop.f32.mrf.mxu1  ;;  %7070 = vst [vmem:[#allocation57_spill] sm:$0xff] %v5725_v57 }
 0x150   :  { %7052 = vst [vmem:[#allocation39_spill] sm:$0xff] %v5653_v51  ;;  %2327 = vmatpush.msrb.mxu1 %v5744_v27 }
 0x151   :  { %v5662_v60 = vpop.f32.mrf.mxu0  ;;  %v5664_v52 = vpop.f32.mrf.mxu2  ;;  %7073 = vst [vmem:[#allocation60_spill] sm:$0xff] %v5733_v38 }
 0x152   :  { %7055 = vst [vmem:[#allocation42_spill] sm:$0xff] %v5662_v60  ;;  %v5795_v60 = vand.u32 4294901760, %v2244_v16 }
 0x153   :  { %7056 = vst [vmem:[#allocation43_spill] sm:$0xff] %v5664_v52  ;;  %v5679_v30 = vpop.f32.mrf.mxu3 }
 0x154   :  { %7060 = vst [vmem:[#allocation47_spill] sm:$0xff] %v5679_v30  ;;  %v2248_v30 = vld [vmem:[%s6856_s5 + $0x58] sm:$0xff]  ;;  %v5818_v15 = vsub.f32 %v2244_v16, %v5795_v60 }
 0x155   :  { %v5711_v52 = vand.u32 4294901760, %v2248_v30  ;;  %7075 = vst [vmem:[#allocation62_spill] sm:$0xff] %v5744_v27 }
 0x156   :  { %7076 = vst [vmem:[#allocation63_spill] sm:$0xff] %v5747_v62 }
 0x157   :  { %7067 = vst [vmem:[#allocation54_spill] sm:$0xff] %v5711_v52  ;;  %v5718_v14 = vpop.f32.mrf.mxu1  ;;  %2474 = vmatpush.msrb.mxu3 %v5711_v52  ;;  %2278 = vmatpush.msrb.mxu0 %v5711_v52 }
 0x158   :  { %7068 = vst [vmem:[#allocation55_spill] sm:$0xff] %v5718_v14  ;;  %v5736_v14 = vsub.f32 %v2248_v30, %v5711_v52 }
 0x159   :  { %v5728_v0 = vpop.f32.mrf.mxu0  ;;  %v5730_v51 = vpop.f32.mrf.mxu2  ;;  %2476 = vmatpush.msrb.mxu3 %v5725_v57  ;;  %2280 = vmatpush.msrb.mxu0 %v5725_v57  ;;  %7080 = vst [vmem:[#allocation67_spill] sm:$0xff] %v5766_v37 }
 0x15a   :  { %7071 = vst [vmem:[#allocation58_spill] sm:$0xff] %v5728_v0  ;;  %v2331_v0 = vsub.f32 %v5709_v24, %v5733_v38  ;;  %v5757_v28 = vand.u32 4294901760, %v5736_v14  ;;  %v5771_v24 = vand.u32 4294901760, %v2245_v12  ;;  %2425 = vmatpush.msrb.mxu2 %v5736_v14 }
 0x15b   :  { %7072 = vst [vmem:[#allocation59_spill] sm:$0xff] %v5730_v51  ;;  %v5749_v51 = vand.u32 4294901760, %v2246_v13  ;;  %v5752_v30 = vpop.f32.mrf.mxu3 }
 0x15c   :  { %7074 = vst [vmem:[#allocation61_spill] sm:$0xff] %v5736_v14  ;;  %v2337_v34 = vsub.f32 %v5736_v14, %v5757_v28  ;;  %2428 = vmatpush.msrb.mxu2 %v5747_v62 }
 0x15d   :  { %7077 = vst [vmem:[#allocation64_spill] sm:$0xff] %v5749_v51  ;;  %v5769_v39 = vsub.f32 %v2246_v13, %v5749_v51  ;;  %2478 = vmatpush.msrb.mxu3 %v5749_v51  ;;  %2282 = vmatpush.msrb.mxu0 %v5749_v51  ;;  %v2343_v13 = vsub.f32 %v5747_v62, %v5766_v37 }
 0x15e   :  { %7078 = vst [vmem:[#allocation65_spill] sm:$0xff] %v5752_v30  ;;  %v5774_v30 = vand.u32 4294901760, %v2331_v0  ;;  %v5789_v0 = vsub.f32 %v2245_v12, %v5771_v24  ;;  %v5793_v14 = vand.u32 4294901760, %v2337_v34 }
 0x15f   :  { %7079 = vst [vmem:[#allocation66_spill] sm:$0xff] %v5757_v28  ;;  %v5786_v27 = vand.u32 4294901760, %v5769_v39  ;;  %2480 = vmatpush.msrb.mxu3 %v5771_v24  ;;  %v5801_v53 = vpop.f32.mrf.mxu1  ;;  %v5803_v43 = vand.u32 4294901760, %v2343_v13  ;;  %2284 = vmatpush.msrb.mxu0 %v5771_v24  ;;  %v5820_v13 = vand.u32 4294901760, %v2243_v11 }
 0x160   :  { %7081 = vst [vmem:[#allocation68_spill] sm:$0xff] %v5769_v39  ;;  %2333 = vmatpush.msrb.mxu1 %v5774_v30  ;;  %v5808_v62 = vand.u32 4294901760, %v5789_v0  ;;  %2431 = vmatpush.msrb.mxu2 %v5769_v39 }
 0x161   :  { %7082 = vst [vmem:[#allocation69_spill] sm:$0xff] %v5771_v24  ;;  %v2349_v12 = vsub.f32 %v5769_v39, %v5786_v27  ;;  %v5812_v34 = vpop.f32.mrf.mxu0  ;;  %2482 = vmatpush.msrb.mxu3 %v5795_v60  ;;  %2286 = vmatpush.msrb.mxu0 %v5795_v60  ;;  %v5841_v32 = vsub.f32 %v2243_v11, %v5820_v13 }
 0x162   :  { %7083 = vst [vmem:[#allocation70_spill] sm:$0xff] %v5774_v30  ;;  %v5814_v30 = vpop.f32.mrf.mxu2  ;;  %2339 = vmatpush.msrb.mxu1 %v5793_v14  ;;  %v2355_v39 = vsub.f32 %v5789_v0, %v5808_v62  ;;  %2434 = vmatpush.msrb.mxu2 %v5789_v0 }
 0x163   :  { %7084 = vst [vmem:[#allocation71_spill] sm:$0xff] %v5786_v27  ;;  %v5826_v55 = vand.u32 4294901760, %v2349_v12  ;;  %v5834_v16 = vpop.f32.mrf.mxu3  ;;  %v2241_v12 = vld [vmem:[%s6856_s5 + $0x20] sm:$0xff]  ;;  %2484 = vmatpush.msrb.mxu3 %v5820_v13  ;;  %2288 = vmatpush.msrb.mxu0 %v5820_v13 }
 0x164   :  { %7085 = vst [vmem:[#allocation72_spill] sm:$0xff] %v5789_v0  ;;  %2345 = vmatpush.msrb.mxu1 %v5803_v43  ;;  %v5847_v2 = vand.u32 4294901760, %v2355_v39  ;;  %v5850_v0 = vsub.f32 %v2242_v8, %v5830_v54  ;;  %v5852_v6 = vand.u32 4294901760, %v2241_v12  ;;  %2437 = vmatpush.msrb.mxu2 %v5818_v15  ;;  %v2240_v39 = vld [vmem:[%s6856_s5 + $0x18] sm:$0xff] }
 0x165   :  { %7086 = vst [vmem:[#allocation73_spill] sm:$0xff] %v5793_v14  ;;  %v5838_v14 = vand.u32 4294901760, %v5818_v15  ;;  %2486 = vmatpush.msrb.mxu3 %v5830_v54  ;;  %v5872_v20 = vand.u32 4294901760, %v2240_v39  ;;  %2290 = vmatpush.msrb.mxu0 %v5830_v54  ;;  %v2238_v54 = vld [vmem:[%s6856_s5 + $0x8] sm:$0xff] }
 0x166   :  { %7087 = vst [vmem:[#allocation74_spill] sm:$0xff] %v5795_v60  ;;  %2351 = vmatpush.msrb.mxu1 %v5826_v55  ;;  %v5867_v8 = vand.u32 4294901760, %v5850_v0  ;;  %v5870_v63 = vsub.f32 %v2241_v12, %v5852_v6  ;;  %2440 = vmatpush.msrb.mxu2 %v5841_v32  ;;  %v5925_v4 = vand.u32 4294901760, %v2238_v54 }
 0x167   :  { %7088 = vst [vmem:[#allocation75_spill] sm:$0xff] %v5803_v43  ;;  %v2361_v11 = vsub.f32 %v5818_v15, %v5838_v14  ;;  %v5860_v43 = vand.u32 4294901760, %v5841_v32  ;;  %2488 = vmatpush.msrb.mxu3 %v5852_v6  ;;  %2292 = vmatpush.msrb.mxu0 %v5852_v6 }
 0x168   :  { %7089 = vst [vmem:[#allocation76_spill] sm:$0xff] %v5808_v62  ;;  %2357 = vmatpush.msrb.mxu1 %v5847_v2  ;;  %v5885_v12 = vpop.f32.mrf.mxu1  ;;  %v2373_v44 = vsub.f32 %v5850_v0, %v5867_v8  ;;  %v5890_v10 = vand.u32 4294901760, %v5870_v63  ;;  %2443 = vmatpush.msrb.mxu2 %v5850_v0 }
 0x169   :  { %7090 = vst [vmem:[#allocation77_spill] sm:$0xff] %v5818_v15  ;;  %v5877_v15 = vand.u32 4294901760, %v2361_v11  ;;  %v5893_v11 = vsub.f32 %v2240_v39, %v5872_v20  ;;  %2490 = vmatpush.msrb.mxu3 %v5872_v20  ;;  %2294 = vmatpush.msrb.mxu0 %v5872_v20 }
 0x16a   :  { %7091 = vst [vmem:[#allocation78_spill] sm:$0xff] %v5820_v13  ;;  %v5901_v61 = vpop.f32.mrf.mxu2  ;;  %v5910_v39 = vand.u32 4294901760, %v2373_v44  ;;  %2446 = vmatpush.msrb.mxu2 %v5870_v63  ;;  %v2237_v44 = vld [vmem:[%s6856_s5] sm:$0xff] }
 0x16b   :  { %7092 = vst [vmem:[#allocation79_spill] sm:$0xff] %v5826_v55  ;;  %v2367_v55 = vsub.f32 %v5841_v32, %v5860_v43  ;;  %2363 = vmatpush.msrb.mxu1 %v5877_v15 }
 0x16c   :  { %7094 = vst [vmem:[#allocation81_spill] sm:$0xff] %v5838_v14  ;;  %2449 = vmatpush.msrb.mxu2 %v5893_v11 }
 0x16d   :  { %7095 = vst [vmem:[#allocation82_spill] sm:$0xff] %v5841_v32  ;;  %v5899_v32 = vpop.f32.mrf.mxu0  ;;  %v5904_v26 = vand.u32 4294901760, %v2367_v55  ;;  %v5919_v55 = vpop.f32.mrf.mxu3 }
 0x16e   :  { %7096 = vst [vmem:[#allocation83_spill] sm:$0xff] %v5847_v2  ;;  %v5895_v2 = vand.u32 4294901760, %v2239_v5 }
 0x16f   :  { %7097 = vst [vmem:[#allocation84_spill] sm:$0xff] %v5850_v0  ;;  %v5915_v0 = vand.u32 4294901760, %v5893_v11  ;;  %2369 = vmatpush.msrb.mxu1 %v5904_v26 }
 0x170   :  { %7098 = vst [vmem:[#allocation85_spill] sm:$0xff] %v5852_v6  ;;  %v2379_v6 = vsub.f32 %v5870_v63, %v5890_v10  ;;  %2492 = vmatpush.msrb.mxu3 %v5895_v2  ;;  %2296 = vmatpush.msrb.mxu0 %v5895_v2 }
 0x171   :  { %7099 = vst [vmem:[#allocation86_spill] sm:$0xff] %v5860_v43  ;;  %2375 = vmatpush.msrb.mxu1 %v5910_v39 }
 0x172   :  { %7100 = vst [vmem:[#allocation87_spill] sm:$0xff] %v5867_v8  ;;  %v5931_v18 = vand.u32 4294901760, %v2379_v6  ;;  %2494 = vmatpush.msrb.mxu3 %v5925_v4  ;;  %2298 = vmatpush.msrb.mxu0 %v5925_v4 }
 0x173   :  { %7101 = vst [vmem:[#allocation88_spill] sm:$0xff] %v5870_v63  ;;  %v2385_v63 = vsub.f32 %v5893_v11, %v5915_v0 }
 0x174   :  { %7102 = vst [vmem:[#allocation89_spill] sm:$0xff] %v5872_v20  ;;  %v5935_v20 = vand.u32 4294901760, %v2237_v44  ;;  %2381 = vmatpush.msrb.mxu1 %v5931_v18 }
 0x175   :  { %7103 = vst [vmem:[#allocation90_spill] sm:$0xff] %v5877_v15  ;;  %v5923_v15 = vsub.f32 %v2239_v5, %v5895_v2  ;;  %v5947_v6 = vand.u32 4294901760, %v2385_v63  ;;  %v5986_v13 = vpop.f32.mrf.mxu3 }
 0x176   :  { %7104 = vst [vmem:[#allocation91_spill] sm:$0xff] %v5890_v10  ;;  %v5950_v25 = vsub.f32 %v2237_v44, %v5935_v20  ;;  %2496 = vmatpush.msrb.mxu3 %v5935_v20  ;;  %2300 = vmatpush.msrb.mxu0 %v5935_v20  ;;  %v5968_v44 = vpop.f32.mrf.mxu0 }
 0x177   :  { %7105 = vst [vmem:[#allocation92_spill] sm:$0xff] %v5893_v11  ;;  %v5941_v5 = vand.u32 4294901760, %v5923_v15  ;;  %2452 = vmatpush.msrb.mxu2 %v5923_v15  ;;  %2387 = vmatpush.msrb.mxu1 %v5947_v6 }
 0x178   :  { %7106 = vst [vmem:[#allocation93_spill] sm:$0xff] %v5895_v2  ;;  %v5964_v63 = vand.u32 4294901760, %v5950_v25  ;;  %v2268_v2 = vld [vmem:[%s6856_s5 + $0xf8] sm:$0xff]  ;;  %2507 = vmatpush.msra.mxu0 %v5670_v58 }
 0x179   :  { %7107 = vst [vmem:[#allocation94_spill] sm:$0xff] %v5904_v26  ;;  %v5944_v26 = vsub.f32 %v2238_v54, %v5925_v4  ;;  %v2391_v11 = vsub.f32 %v5923_v15, %v5941_v5  ;;  %v5961_v54 = vpop.f32.mrf.mxu1 }
 0x17a   :  { %7108 = vst [vmem:[#allocation95_spill] sm:$0xff] %v5910_v39  ;;  %2511 = vmatpush.msra.mxu0 %v5688_v41 }
 0x17b   :  { %7109 = vst [vmem:[#allocation96_spill] sm:$0xff] %v5915_v0  ;;  %v5958_v39 = vand.u32 4294901760, %v5944_v26  ;;  %2455 = vmatpush.msrb.mxu2 %v5944_v26 }
 0x17c   :  { %7110 = vst [vmem:[#allocation97_spill] sm:$0xff] %v5923_v15  ;;  %v5973_v15 = vand.u32 4294901760, %v2391_v11  ;;  %2515 = vmatpush.msra.mxu0 %v5706_v35  ;;  %v2265_v35 = vld [vmem:[%s6856_s5 + $0xe0] sm:$0xff] }
 0x17d   :  { %7111 = vst [vmem:[#allocation98_spill] sm:$0xff] %v5925_v4  ;;  %v2397_v4 = vsub.f32 %v5944_v26, %v5958_v39  ;;  %2458 = vmatpush.msrb.mxu2 %v5950_v25 }
 0x17e   :  { %7112 = vst [vmem:[#allocation99_spill] sm:$0xff] %v5931_v18  ;;  %v5970_v18 = vpop.f32.mrf.mxu2  ;;  %2393 = vmatpush.msrb.mxu1 %v5973_v15  ;;  %2519 = vmatpush.msra.mxu0 %v5733_v38 }
 0x17f   :  { %7113 = vst [vmem:[#allocation100_spill] sm:$0xff] %v5935_v20  ;;  %v2403_v20 = vsub.f32 %v5950_v25, %v5964_v63  ;;  %v5989_v11 = vand.u32 4294901760, %v2397_v4  ;;  %v2266_v4 = vld [vmem:[%s6856_s5 + $0xe8] sm:$0xff] }
 0x180   :  { %7114 = vst [vmem:[#allocation101_spill] sm:$0xff] %v5941_v5  ;;  %v5983_v5 = vand.u32 4294901760, %v2268_v2  ;;  %v6016_v41 = vand.u32 4294901760, %v2266_v4  ;;  %2523 = vmatpush.msra.mxu0 %v5757_v28  ;;  %v6061_v28 = vpop.f32.mrf.mxu3 }
 0x181   :  { %7115 = vst [vmem:[#allocation102_spill] sm:$0xff] %v5944_v26  ;;  %v2267_v26 = vld [vmem:[%s6856_s5 + $0xf0] sm:$0xff]  ;;  %v5995_v58 = vand.u32 4294901760, %v2403_v20  ;;  %2399 = vmatpush.msrb.mxu1 %v5989_v11 }
 0x182   :  { %7116 = vst [vmem:[#allocation103_spill] sm:$0xff] %v5947_v6  ;;  %v5998_v6 = vsub.f32 %v2268_v2, %v5983_v5  ;;  %2611 = vmatpush.msra.mxu2 %v5983_v5  ;;  %2527 = vmatpush.msra.mxu0 %v5766_v37  ;;  %v2262_v37 = vld [vmem:[%s6856_s5 + $0xc8] sm:$0xff] }
 0x183   :  { %7117 = vst [vmem:[#allocation104_spill] sm:$0xff] %v5950_v25  ;;  %v822_v25 = vadd.f32 %v5539_v40, %v5273_v19  ;;  %2405 = vmatpush.msrb.mxu1 %v5995_v58  ;;  %v6026_v19 = vpop.f32.mrf.mxu1 }
 0x184   :  { %7118 = vst [vmem:[#allocation105_spill] sm:$0xff] %v5958_v39  ;;  %v6011_v20 = vand.u32 4294901760, %v5998_v6  ;;  %2531 = vmatpush.msra.mxu0 %v5786_v27 }
 0x185   :  { %7119 = vst [vmem:[#allocation106_spill] sm:$0xff] %v5964_v63  ;;  %v6000_v63 = vand.u32 4294901760, %v2267_v26  ;;  %2574 = vmatpush.msra.mxu1 %v5648_v36  ;;  %v907_v36 = vadd.f32 %v5537_v22, %v822_v25 }
 0x186   :  { %7120 = vst [vmem:[#allocation107_spill] sm:$0xff] %v5973_v15  ;;  %v2654_v40 = vsub.f32 %v5998_v6, %v6011_v20  ;;  %v6042_v38 = vpop.f32.mrf.mxu2  ;;  %v2264_v15 = vld [vmem:[%s6856_s5 + $0xd8] sm:$0xff]  ;;  %2535 = vmatpush.msra.mxu0 %v5808_v62 }
 0x187   :  { %7121 = vst [vmem:[#allocation108_spill] sm:$0xff] %v5989_v11  ;;  %v6014_v2 = vsub.f32 %v2267_v26, %v6000_v63  ;;  %2613 = vmatpush.msra.mxu2 %v6000_v63  ;;  %v830_v11 = vadd.f32 %v5551_v59, %v5294_v47  ;;  %v6035_v47 = vsub.f32 %v2266_v4, %v6016_v41  ;;  %v6037_v59 = vand.u32 4294901760, %v2265_v35 }
 0x188   :  { %7122 = vst [vmem:[#allocation109_spill] sm:$0xff] %v5995_v58  ;;  %v6040_v58 = vpop.f32.mrf.mxu0  ;;  %2576 = vmatpush.msra.mxu1 %v5658_v17  ;;  %v6050_v4 = vand.u32 4294901760, %v2654_v40  ;;  %v6066_v25 = vand.u32 4294901760, %v2264_v15  ;;  %v2263_v40 = vld [vmem:[%s6856_s5 + $0xd0] sm:$0xff]  ;;  %2539 = vmatpush.msra.mxu0 %v5838_v14 }
 0x189   :  { %7123 = vst [vmem:[#allocation110_spill] sm:$0xff] %v5998_v6  ;;  %v6032_v26 = vand.u32 4294901760, %v6014_v2  ;;  %2615 = vmatpush.msra.mxu2 %v6016_v41  ;;  %v6064_v22 = vsub.f32 %v2265_v35, %v6037_v59 }
 0x18a   :  { %7124 = vst [vmem:[#allocation111_spill] sm:$0xff] %v6000_v63  ;;  %v838_v63 = vadd.f32 %v5562_v1, %v5352_v31  ;;  %2578 = vmatpush.msra.mxu1 %v5675_v33  ;;  %2656 = vmatpush.msra.mxu3 %v6050_v4  ;;  %v6078_v1 = vand.u32 4294901760, %v2263_v40 }
 0x18b   :  { %7125 = vst [vmem:[#allocation112_spill] sm:$0xff] %v6011_v20  ;;  %v2660_v6 = vsub.f32 %v6014_v2, %v6032_v26  ;;  %2617 = vmatpush.msra.mxu2 %v6037_v59  ;;  %v911_v20 = vadd.f32 %v5549_v50, %v830_v11  ;;  %v6081_v35 = vand.u32 4294901760, %v6064_v22  ;;  %v6084_v11 = vsub.f32 %v2264_v15, %v6066_v25 }
 0x18c   :  { %7126 = vst [vmem:[#allocation113_spill] sm:$0xff] %v6016_v41  ;;  %v6055_v41 = vand.u32 4294901760, %v6035_v47  ;;  %2580 = vmatpush.msra.mxu1 %v5695_v48  ;;  %v6097_v33 = vsub.f32 %v2263_v40, %v6078_v1  ;;  %v6099_v15 = vand.u32 4294901760, %v2262_v37  ;;  %v1607_v40 = vadd.f32 %v5885_v12, %v5899_v32  ;;  %v2260_v12 = vld [vmem:[%s6856_s5 + $0xb8] sm:$0xff]  ;;  %2543 = vmatpush.msra.mxu0 %v5860_v43 }
 0x18d   :  { %7127 = vst [vmem:[#allocation114_spill] sm:$0xff] %v6035_v47  ;;  %v6074_v50 = vand.u32 4294901760, %v2660_v6  ;;  %2619 = vmatpush.msra.mxu2 %v6066_v25  ;;  %v957_v6 = vadd.f32 %v5541_v56, %v907_v36  ;;  %v962_v17 = vadd.f32 %v5553_v29, %v911_v20  ;;  %v2672_v27 = vsub.f32 %v6064_v22, %v6081_v35  ;;  %v2261_v36 = vld [vmem:[%s6856_s5 + $0xc0] sm:$0xff]  ;;  %v6115_v29 = vpop.f32.mrf.mxu1 }
 0x18e   :  { %7128 = vst [vmem:[#allocation115_spill] sm:$0xff] %v6050_v4  ;;  %v2666_v31 = vsub.f32 %v6035_v47, %v6055_v41  ;;  %v915_v47 = vadd.f32 %v5560_v3, %v838_v63  ;;  %v6106_v56 = vand.u32 4294901760, %v6084_v11  ;;  %2582 = vmatpush.msra.mxu1 %v5711_v52  ;;  %v6120_v3 = vand.u32 4294901760, %v6097_v33  ;;  %v6129_v62 = vpop.f32.mrf.mxu2  ;;  %2547 = vmatpush.msra.mxu0 %v5867_v8 }
 0x18f   :  { %7129 = vst [vmem:[#allocation116_spill] sm:$0xff] %v6074_v50  ;;  %2662 = vmatpush.msra.mxu3 %v6074_v50  ;;  %2621 = vmatpush.msra.mxu2 %v6078_v1  ;;  %v6123_v63 = vsub.f32 %v2262_v37, %v6099_v15  ;;  %v6125_v20 = vand.u32 4294901760, %v2261_v36  ;;  %v6131_v50 = vand.u32 4294901760, %v2672_v27  ;;  %v1603_v37 = vadd.f32 %v5801_v53, %v5812_v34 }
 0x190   :  { %7130 = vst [vmem:[#allocation117_spill] sm:$0xff] %v6084_v11  ;;  %v6094_v4 = vand.u32 4294901760, %v2666_v31  ;;  %v6127_v31 = vpop.f32.mrf.mxu0  ;;  %v2678_v32 = vsub.f32 %v6084_v11, %v6106_v56  ;;  %2584 = vmatpush.msra.mxu1 %v5725_v57  ;;  %v2684_v27 = vsub.f32 %v6097_v33, %v6120_v3  ;;  %v1003_v48 = vadd.f32 %v5543_v9, %v957_v6  ;;  %v6153_v11 = vpop.f32.mrf.mxu3  ;;  %v2259_v57 = vld [vmem:[%s6856_s5 + $0xb0] sm:$0xff] }
 0x191   :  { %7132 = vst [vmem:[#allocation119_spill] sm:$0xff] %v6131_v50  ;;  %2623 = vmatpush.msra.mxu2 %v6099_v15  ;;  %v6149_v52 = vsub.f32 %v2261_v36, %v6125_v20  ;;  %v967_v14 = vadd.f32 %v5564_v46, %v915_v47  ;;  %v6158_v34 = vand.u32 4294901760, %v2260_v12  ;;  %v1009_v36 = vadd.f32 %v5555_v49, %v962_v17  ;;  %v2258_v17 = vld [vmem:[%s6856_s5 + $0xa8] sm:$0xff] }
 0x192   :  { %7131 = vst [vmem:[#allocation118_spill] sm:$0xff] %v6094_v4  ;;  %2668 = vmatpush.msra.mxu3 %v6094_v4  ;;  %v6146_v4 = vand.u32 4294901760, %v6123_v63  ;;  %v6156_v53 = vand.u32 4294901760, %v2678_v32  ;;  %v1658_v9 = vadd.f32 %v5901_v61, %v1607_v40  ;;  %2586 = vmatpush.msra.mxu1 %v5749_v51  ;;  %v6167_v46 = vand.u32 4294901760, %v2684_v27 }
 0x193   :  { %2625 = vmatpush.msra.mxu2 %v6125_v20  ;;  %v1611_v6 = vadd.f32 %v5961_v54, %v5968_v44  ;;  %v6176_v32 = vand.u32 4294901760, %v6149_v52  ;;  %v6179_v49 = vsub.f32 %v2260_v12, %v6158_v34  ;;  %v6181_v61 = vand.u32 4294901760, %v2259_v57  ;;  %2551 = vmatpush.msra.mxu0 %v5890_v10 }
 0x194   :  { %2674 = vmatpush.msra.mxu3 %v6131_v50  ;;  %7133 = vst [vmem:[#allocation120_spill] sm:$0xff] %v6156_v53  ;;  %v2690_v47 = vsub.f32 %v6123_v63, %v6146_v4  ;;  %v846_v40 = vadd.f32 %v5573_v21, %v5421_v23  ;;  %v1653_v54 = vadd.f32 %v5814_v30, %v1603_v37  ;;  %v6193_v27 = vand.u32 4294901760, %v2258_v17  ;;  %v2257_v21 = vld [vmem:[%s6856_s5 + $0xa0] sm:$0xff] }
 0x195   :  { %7134 = vst [vmem:[#allocation121_spill] sm:$0xff] %v6167_v46  ;;  %2588 = vmatpush.msra.mxu1 %v5771_v24  ;;  %2627 = vmatpush.msra.mxu2 %v6158_v34  ;;  %v1015_v12 = vadd.f32 %v5566_v42, %v967_v14  ;;  %v2696_v8 = vsub.f32 %v6149_v52, %v6176_v32  ;;  %v6201_v43 = vand.u32 4294901760, %v6179_v49  ;;  %v1806_v14 = vpop.f32.mrf.mxu1 }
 0x196   :  { %2680 = vmatpush.msra.mxu3 %v6156_v53  ;;  %7135 = vst [vmem:[#allocation122_spill] sm:$0xff] %v6179_v49  ;;  %v6191_v44 = vand.u32 4294901760, %v2690_v47  ;;  %v6204_v23 = vsub.f32 %v2259_v57, %v6181_v61  ;;  %v1070_v30 = vadd.f32 %v5597_v7, %v1009_v36  ;;  %v1705_v42 = vadd.f32 %v5919_v55, %v1658_v9  ;;  %v6220_v53 = vpop.f32.mrf.mxu2 }
 0x197   :  { %2590 = vmatpush.msra.mxu1 %v5795_v60  ;;  %v6214_v37 = vsub.f32 %v2258_v17, %v6193_v27  ;;  %v6216_v47 = vand.u32 4294901760, %v2257_v21  ;;  %2629 = vmatpush.msra.mxu2 %v6181_v61  ;;  %v1663_v57 = vadd.f32 %v5970_v18, %v1611_v6  ;;  %v6223_v7 = vand.u32 4294901760, %v2696_v8  ;;  %v7141_v6 = vld [vmem:[#allocation78_spill] sm:$0xff] }
 0x198   :  { %7136 = vst [vmem:[#allocation123_spill] sm:$0xff] %v6191_v44  ;;  %2686 = vmatpush.msra.mxu3 %v6167_v46  ;;  %v1765_v46 = vpop.f32.mrf.mxu0  ;;  %v2702_v55 = vsub.f32 %v6179_v49, %v6201_v43  ;;  %v6228_v36 = vand.u32 4294901760, %v6204_v23  ;;  %2555 = vmatpush.msra.mxu0 %v5915_v0  ;;  %v919_v9 = vadd.f32 %v5571_v45, %v846_v40  ;;  %v2256_v8 = vld [vmem:[%s6856_s5 + $0x98] sm:$0xff]  ;;  %v6242_v60 = vpop.f32.mrf.mxu3  ;;  %v2255_v40 = vld [vmem:[%s6856_s5 + $0x90] sm:$0xff]  ;;  %v7199_v49 = vld [vmem:[#allocation12_spill] sm:$0xff] }
 0x199   :  { %7137 = vst [vmem:[#allocation124_spill] sm:$0xff] %v6204_v23  ;;  %v1699_v17 = vadd.f32 %v5834_v16, %v1653_v54  ;;  %v1766_v18 = vadd.f32 %v1765_v46, %v1705_v42  ;;  %2592 = vmatpush.msra.mxu1 %v7141_v6  ;;  %v6235_v10 = vand.u32 4294901760, %v6214_v37  ;;  %2631 = vmatpush.msra.mxu2 %v6193_v27  ;;  %v7146_v54 = vld [vmem:[#allocation101_spill] sm:$0xff]  ;;  %v7147_v42 = vld [vmem:[#allocation19_spill] sm:$0xff] }
 0x19a   :  { %7138 = vst [vmem:[#allocation125_spill] sm:$0xff] %v6214_v37  ;;  %2692 = vmatpush.msra.mxu3 %v6191_v44  ;;  %v7143_v44 = vld [vmem:[#allocation16_spill] sm:$0xff]  ;;  %v6245_v45 = vand.u32 4294901760, %v2702_v55  ;;  %v2708_v16 = vsub.f32 %v6204_v23, %v6228_v36  ;;  %v6250_v46 = vsub.f32 %v2257_v21, %v6216_v47  ;;  %2559 = vmatpush.msra.mxu0 %v7146_v54  ;;  %v6269_v54 = vand.u32 4294901760, %v2256_v8  ;;  %v7168_v23 = vld [vmem:[#allocation93_spill] sm:$0xff] }
 0x19b   :  { %7139 = vst [vmem:[#allocation126_spill] sm:$0xff] %v6223_v7  ;;  %v1066_v50 = vadd.f32 %v7143_v44, %v1003_v48  ;;  %v1111_v48 = vadd.f32 %v7147_v42, %v1070_v30  ;;  %v7148_v44 = vld [vmem:[#allocation23_spill] sm:$0xff]  ;;  %v7149_v55 = vld [vmem:[#allocation80_spill] sm:$0xff]  ;;  %v2714_v6 = vsub.f32 %v6214_v37, %v6235_v10  ;;  %v1711_v21 = vadd.f32 %v5986_v13, %v1663_v57  ;;  %v7153_v30 = vld [vmem:[#allocation85_spill] sm:$0xff] }
 0x19c   :  { %7140 = vst [vmem:[#allocation127_spill] sm:$0xff] %v6228_v36  ;;  %2698 = vmatpush.msra.mxu3 %v6223_v7  ;;  %v1074_v0 = vadd.f32 %v7148_v44, %v1015_v12  ;;  %v1762_v7 = vadd.f32 %v6127_v31, %v1699_v17  ;;  %2594 = vmatpush.msra.mxu1 %v7149_v55  ;;  %v6264_v24 = vand.u32 4294901760, %v2708_v16  ;;  %v6267_v51 = vand.u32 4294901760, %v6250_v46  ;;  %v2254_v31 = vld [vmem:[%s6856_s5 + $0x88] sm:$0xff]  ;;  %v7158_v44 = vld [vmem:[#allocation89_spill] sm:$0xff]  ;;  %v7197_v36 = vld [vmem:[#allocation42_spill] sm:$0xff] }
 0x19d   :  { %7142 = vst [vmem:[#allocation128_spill] sm:$0xff] %v6235_v10  ;;  %2633 = vmatpush.msra.mxu2 %v6216_v47  ;;  %v1807_v12 = vadd.f32 %v1806_v14, %v1766_v18  ;;  %v6276_v17 = vand.u32 4294901760, %v2714_v6  ;;  %v6278_v13 = vand.u32 4294901760, %v2255_v40  ;;  %v6280_v57 = vand.u32 4294901760, %v2254_v31  ;;  %2563 = vmatpush.msra.mxu0 %v5958_v39  ;;  %v2253_v18 = vld [vmem:[%s6856_s5 + $0x80] sm:$0xff] }
 0x19e   :  { %7144 = vst [vmem:[#allocation16_spill] sm:$0xff] %v6245_v45  ;;  %2704 = vmatpush.msra.mxu3 %v6245_v45  ;;  %2596 = vmatpush.msra.mxu1 %v7153_v30  ;;  %v1615_v16 = vadd.f32 %v6026_v19, %v6040_v58  ;;  %v2720_v42 = vsub.f32 %v6250_v46, %v6267_v51  ;;  %v6299_v58 = vld [vmem:[%s6853_s2] sm:$0x3]  ;;  %v1810_v19 = vpop.f32.mrf.mxu1  ;;  %v7162_v45 = vld [vmem:[#allocation106_spill] sm:$0xff]  ;;  %v7163_v30 = vld [vmem:[#allocation13_spill] sm:$0xff] }
 0x19f   :  { %7145 = vst [vmem:[#allocation129_spill] sm:$0xff] %v6250_v46  ;;  %v6289_v14 = vsub.f32 %v2256_v8, %v6269_v54  ;;  %2635 = vmatpush.msra.mxu2 %v6269_v54  ;;  %v1803_v6 = vadd.f32 %v6115_v29, %v1762_v7  ;;  %v6303_v39 = vsub.f32 %v2255_v40, %v6278_v13  ;;  %v7164_v7 = vld [vmem:[#allocation15_spill] sm:$0xff] }
 0x1a0   :  { %7150 = vst [vmem:[#allocation19_spill] sm:$0xff] %v6264_v24  ;;  %2710 = vmatpush.msra.mxu3 %v6264_v24  ;;  %2598 = vmatpush.msra.mxu1 %v7158_v44  ;;  %v6306_v8 = vsub.f32 %v2254_v31, %v6280_v57  ;;  %v6308_v24 = vand.u32 4294901760, %v2253_v18  ;;  %v972_v29 = vadd.f32 %v7163_v30, %v919_v9  ;;  %v1769_v46 = vpop.f32.mrf.mxu0  ;;  %v6316_v44 = vand.u32 4294901760, %v2720_v42  ;;  %v7167_v31 = vld [vmem:[#allocation22_spill] sm:$0xff]  ;;  %v6328_v30 = vpop.f32.mrf.mxu3 }
 0x1a1   :  { %7151 = vst [vmem:[#allocation23_spill] sm:$0xff] %v6267_v51  ;;  %2567 = vmatpush.msra.mxu0 %v7162_v45  ;;  %v1107_v55 = vadd.f32 %v7164_v7, %v1066_v50  ;;  %v6313_v51 = vpop.f32.mrf.mxu2  ;;  %v6319_v40 = vand.u32 4294901760, %v6289_v14  ;;  %2637 = vmatpush.msra.mxu2 %v6278_v13  ;;  %v1115_v37 = vadd.f32 %v7167_v31, %v1074_v0  ;;  %v6325_v50 = vand.u32 4294901760, %v6303_v39 }
 0x1a2   :  { %7152 = vst [vmem:[#allocation130_spill] sm:$0xff] %v6269_v54  ;;  %2716 = vmatpush.msra.mxu3 %v6276_v17  ;;  %v2149_v10 = vadd.f32 %v1807_v12, %v1111_v48  ;;  %v1770_v45 = vadd.f32 %v1769_v46, %v1711_v21  ;;  %2600 = vmatpush.msra.mxu1 %v7168_v23  ;;  %v2157_v9 = vperm.slane %v6299_v58, 0  ;;  %v6334_v7 = vand.u32 4294901760, %v6306_v8  ;;  %v7172_v12 = vld [vmem:[#allocation98_spill] sm:$0xff] }
 0x1a3   :  { %7154 = vst [vmem:[#allocation131_spill] sm:$0xff] %v6276_v17  ;;  %v2726_v42 = vsub.f32 %v6289_v14, %v6319_v40  ;;  %v6337_v0 = vsub.f32 %v2253_v18, %v6308_v24  ;;  %2639 = vmatpush.msra.mxu2 %v6280_v57  ;;  %v1668_v46 = vadd.f32 %v6042_v38, %v1615_v16 }
 0x1a4   :  { %7155 = vst [vmem:[#allocation132_spill] sm:$0xff] %v6278_v13  ;;  %2722 = vmatpush.msra.mxu3 %v6316_v44  ;;  %v2147_v48 = vadd.f32 %v1803_v6, %v1107_v55  ;;  %v1811_v21 = vadd.f32 %v1810_v19, %v1770_v45  ;;  %2602 = vmatpush.msra.mxu1 %v7172_v12  ;;  %v7178_v55 = vld [vmem:[#allocation27_spill] sm:$0xff] }
 0x1a5   :  { %7156 = vst [vmem:[#allocation133_spill] sm:$0xff] %v6280_v57  ;;  %v2732_v31 = vsub.f32 %v6303_v39, %v6325_v50  ;;  %v6345_v23 = vand.u32 4294901760, %v2726_v42  ;;  %2641 = vmatpush.msra.mxu2 %v6308_v24  ;;  %v2163_v18 = vadd.f32 %v2157_v9, %v2149_v10  ;;  %v7175_v57 = vld [vmem:[#allocation100_spill] sm:$0xff]  ;;  %v6354_v45 = vand.u32 4294901760, %v6337_v0  ;;  %v7196_v13 = vld [vmem:[#allocation31_spill] sm:$0xff] }
 0x1a6   :  { %7157 = vst [vmem:[#allocation134_spill] sm:$0xff] %v6289_v14  ;;  %v2151_v14 = vadd.f32 %v1811_v21, %v1115_v37  ;;  %2604 = vmatpush.msra.mxu1 %v7175_v57  ;;  %v1717_v19 = vadd.f32 %v6061_v28, %v1668_v46  ;;  %v1814_v42 = vpop.f32.mrf.mxu1  ;;  %v7181_v28 = vld [vmem:[#allocation26_spill] sm:$0xff] }
 0x1a7   :  { %7159 = vst [vmem:[#allocation135_spill] sm:$0xff] %v6303_v39  ;;  %v6351_v38 = vand.u32 4294901760, %v2732_v31  ;;  %2728 = vmatpush.msra.mxu3 %v6345_v23  ;;  %v2744_v10 = vsub.f32 %v6337_v0, %v6354_v45  ;;  %v2179_v31 = vmul.f32 0.01, %v2163_v18  ;;  %vm2171_vm4 = vcmp.ge.f32.partialorder %v2163_v18, 0.0 }
 0x1a8   :  { %7160 = vst [vmem:[#allocation136_spill] sm:$0xff] %v6306_v8  ;;  %v1773_v37 = vpop.f32.mrf.mxu0 }
 0x1a9   :  { %7161 = vst [vmem:[#allocation137_spill] sm:$0xff] %v6308_v24  ;;  %v6363_v21 = vpop.f32.mrf.mxu2  ;;  %2734 = vmatpush.msra.mxu3 %v6351_v38  ;;  %v1774_v57 = vadd.f32 %v1773_v37, %v1717_v19 }
 0x1aa   :  { %7165 = vst [vmem:[#allocation13_spill] sm:$0xff] %v6316_v44  ;;  %v7173_v44 = vld [vmem:[#allocation14_spill] sm:$0xff] }
 0x1ab   :  { %7166 = vst [vmem:[#allocation15_spill] sm:$0xff] %v6319_v40  ;;  %v1021_v17 = vadd.f32 %v7173_v44, %v972_v29  ;;  %v2738_v40 = vsub.f32 %v6306_v8, %v6334_v7  ;;  %v2161_v44 = vadd.f32 %v2157_v9, %v2147_v48  ;;  %v2165_v29 = vadd.f32 %v2157_v9, %v2151_v14  ;;  %v7193_v8 = vld [vmem:[#allocation18_spill] sm:$0xff] }
 0x1ac   :  { %7169 = vst [vmem:[#allocation22_spill] sm:$0xff] %v6325_v50 }
 0x1ad   :  { %7170 = vst [vmem:[#allocation138_spill] sm:$0xff] %v6334_v7  ;;  %v1078_v16 = vadd.f32 %v7178_v55, %v1021_v17  ;;  %v6358_v6 = vand.u32 4294901760, %v2738_v40  ;;  %v6366_v17 = vand.u32 4294901760, %v2744_v10  ;;  %v6368_v40 = vpop.f32.mrf.mxu3  ;;  %v2177_v46 = vmul.f32 0.01, %v2161_v44 }
 0x1ae   :  { %7171 = vst [vmem:[#allocation139_spill] sm:$0xff] %v6337_v0  ;;  %v2181_v48 = vmul.f32 0.01, %v2165_v29  ;;  %v1815_v55 = vadd.f32 %v1814_v42, %v1774_v57  ;;  %vm2169_vm5 = vcmp.ge.f32.partialorder %v2161_v44, 0.0  ;;  %vm2173_vm6 = vcmp.ge.f32.partialorder %v2165_v29, 0.0  ;;  %v2028_v12 = vpop.f32.mrf.mxu1  ;;  %v7186_v57 = vld [vmem:[#allocation20_spill] sm:$0xff] }
 0x1af   :  { %7174 = vst [vmem:[#allocation14_spill] sm:$0xff] %v6345_v23  ;;  %2740 = vmatpush.msra.mxu3 %v6358_v6  ;;  %v1119_v14 = vadd.f32 %v7181_v28, %v1078_v16  ;;  %v6373_v23 = vsel %vm2171_vm4, %v2163_v18, %v2179_v31  ;;  %v6375_v19 = vsel %vm2169_vm5, %v2161_v44, %v2177_v46  ;;  %v7188_v44 = vld [vmem:[#allocation17_spill] sm:$0xff] }
 0x1b0   :  { %7176 = vst [vmem:[#allocation140_spill] sm:$0xff] %v6351_v38  ;;  %v6377_v10 = vsel %vm2173_vm6, %v2165_v29, %v2181_v48  ;;  %v1982_v16 = vpop.f32.mrf.mxu0 }
 0x1b1   :  { %7177 = vst [vmem:[#allocation141_spill] sm:$0xff] %v6354_v45  ;;  %2746 = vmatpush.msra.mxu3 %v6366_v17  ;;  %v2153_v38 = vadd.f32 %v1815_v55, %v1119_v14  ;;  %v2091_v28 = vpop.f32.mrf.mxu2  ;;  %v7185_v45 = vld [vmem:[#allocation10_spill] sm:$0xff]  ;;  %v7187_v14 = vld [vmem:[#allocation9_spill] sm:$0xff] }
 0x1b2   :  { %7179 = vst [vmem:[#allocation27_spill] sm:$0xff] %v6358_v6  ;;  %v2193_v6 = vadd.f32 %v6373_v23, %v6375_v19  ;;  %v1160_v42 = vadd.f32 %v7186_v57, %v7185_v45  ;;  %v1152_v46 = vadd.f32 %v7188_v44, %v7187_v14  ;;  %v1933_v45 = vadd.f32 %v6153_v11, %v6129_v62  ;;  %v7195_v44 = vld [vmem:[#allocation25_spill] sm:$0xff] }
 0x1b3   :  { %7180 = vst [vmem:[#allocation142_spill] sm:$0xff] %v6366_v17  ;;  %v2167_v37 = vadd.f32 %v2157_v9, %v2153_v38  ;;  %v7190_v9 = vld [vmem:[#allocation11_spill] sm:$0xff]  ;;  %v7191_v38 = vld [vmem:[#allocation24_spill] sm:$0xff]  ;;  %v7192_v17 = vld [vmem:[#allocation21_spill] sm:$0xff]  ;;  %v1937_v14 = vadd.f32 %v6242_v60, %v6220_v53 }
 0x1b4   :  { %7182 = vst [vmem:[#allocation26_spill] sm:$0xff] %v6373_v23  ;;  %v2194_v18 = vadd.f32 %v2193_v6, %v6377_v10  ;;  %v1168_v48 = vadd.f32 %v7191_v38, %v7190_v9  ;;  %v1241_v0 = vadd.f32 %v7192_v17, %v1160_v42  ;;  %v1237_v50 = vadd.f32 %v7193_v8, %v1152_v46  ;;  %v7194_v6 = vld [vmem:[#allocation35_spill] sm:$0xff]  ;;  %v7198_v8 = vld [vmem:[#allocation34_spill] sm:$0xff]  ;;  %v7200_v60 = vld [vmem:[#allocation28_spill] sm:$0xff] }
 0x1b5   :  { %7183 = vst [vmem:[#allocation143_spill] sm:$0xff] %v6375_v19  ;;  %vm2175_vm7 = vcmp.ge.f32.partialorder %v2167_v37, 0.0  ;;  %v2183_v7 = vmul.f32 0.01, %v2167_v37  ;;  %v2132_v31 = vpop.f32.mrf.mxu3  ;;  %v1176_v53 = vadd.f32 %v7200_v60, %v7199_v49  ;;  %v7205_v49 = vld [vmem:[#allocation32_spill] sm:$0xff]  ;;  %v7208_v60 = vld [vmem:[#allocation37_spill] sm:$0xff] }
 0x1b6   :  { %7184 = vst [vmem:[#allocation144_spill] sm:$0xff] %v6377_v10  ;;  %v1292_v39 = vadd.f32 %v7194_v6, %v1241_v0  ;;  %v1245_v24 = vadd.f32 %v7195_v44, %v1168_v48  ;;  %v1287_v17 = vadd.f32 %v7196_v13, %v1237_v50  ;;  %v7203_v13 = vld [vmem:[#allocation36_spill] sm:$0xff] }
 0x1b7   :  { %v6386_v29 = vsel %vm2175_vm7, %v2167_v37, %v2183_v7  ;;  %v1983_v7 = vadd.f32 %v1982_v16, %v1933_v45  ;;  %v2034_v37 = vpop.f32.mrf.mxu1  ;;  %v7201_v45 = vld [vmem:[#allocation30_spill] sm:$0xff] }
 0x1b8   :  { %7189 = vst [vmem:[#allocation10_spill] sm:$0xff] %v6386_v29  ;;  %v2195_v55 = vadd.f32 %v2194_v18, %v6386_v29  ;;  %v1987_v38 = vpop.f32.mrf.mxu0  ;;  %v1297_v62 = vadd.f32 %v7197_v36, %v1245_v24  ;;  %v1339_v46 = vadd.f32 %v7198_v8, %v1292_v39  ;;  %v1333_v48 = vadd.f32 %v7201_v45, %v1287_v17  ;;  %v7204_v39 = vld [vmem:[#allocation29_spill] sm:$0xff]  ;;  %v7210_v45 = vld [vmem:[#allocation47_spill] sm:$0xff] }
 0x1b9   :  { %v2095_v18 = vpop.f32.mrf.mxu2  ;;  %v1988_v42 = vadd.f32 %v1987_v38, %v1937_v14  ;;  %v2029_v0 = vadd.f32 %v2028_v12, %v1983_v7  ;;  %v1941_v24 = vadd.f32 %v6328_v30, %v6313_v51  ;;  %v1249_v12 = vadd.f32 %v7204_v39, %v1176_v53 }
 0x1ba   :  { %v2196_v57 = vrot.slane %v2195_v55, 4  ;;  %v1400_v50 = vadd.f32 %v7203_v13, %v1339_v46 }
 0x1bb   :  { %v2035_v6 = vadd.f32 %v2034_v37, %v1988_v42  ;;  %v2092_v36 = vadd.f32 %v2091_v28, %v2029_v0 }
 0x1bc   :  { %v2197_v9 = vadd.f32 %v2196_v57, %v2195_v55  ;;  %v7202_v57 = vld [vmem:[#allocation39_spill] sm:$0xff]  ;;  %v1441_v51 = vadd.f32 %v7208_v60, %v1400_v50  ;;  %v2158_v50 = vperm.slane %v6299_v58, 1  ;;  %v7216_v60 = vld [vmem:[#allocation110_spill] sm:$0xff] }
 0x1bd   :  { %v2136_v54 = vpop.f32.mrf.mxu3  ;;  %v2096_v55 = vadd.f32 %v2095_v18, %v2035_v6  ;;  %v1345_v44 = vadd.f32 %v7202_v57, %v1297_v62  ;;  %v7206_v18 = vld [vmem:[#allocation43_spill] sm:$0xff]  ;;  %v7207_v62 = vld [vmem:[#allocation58_spill] sm:$0xff]  ;;  %v2133_v30 = vadd.f32 %v2132_v31, %v2092_v36  ;;  %v1945_v31 = vadd.f32 %v6368_v40, %v6363_v21 }
 0x1be   :  { %v2198_v11 = vrot.slane %v2197_v9, 2  ;;  %v1302_v8 = vadd.f32 %v7207_v62, %v1249_v12  ;;  %v7212_v36 = vld [vmem:[#allocation111_spill] sm:$0xff] }
 0x1bf   :  { %v2040_v14 = vpop.f32.mrf.mxu1  ;;  %v2137_v42 = vadd.f32 %v2136_v54, %v2096_v55  ;;  %v7211_v55 = vld [vmem:[#allocation55_spill] sm:$0xff] }
 0x1c0   :  { %v2199_v16 = vadd.f32 %v2198_v11, %v2197_v9  ;;  %v1992_v7 = vpop.f32.mrf.mxu0  ;;  %v1396_v9 = vadd.f32 %v7205_v49, %v1333_v48  ;;  %v1404_v11 = vadd.f32 %v7206_v18, %v1345_v44  ;;  %v1351_v57 = vadd.f32 %v7211_v55, %v1302_v8  ;;  %v7215_v21 = vld [vmem:[#allocation59_spill] sm:$0xff] }
 0x1c1   :  { %v2099_v37 = vpop.f32.mrf.mxu2  ;;  %v1993_v17 = vadd.f32 %v1992_v7, %v1941_v24 }
 0x1c2   :  { %v2200_v29 = vrot.slane %v2199_v16, 1  ;;  %v1445_v48 = vadd.f32 %v7210_v45, %v1404_v11  ;;  %v1408_v40 = vadd.f32 %v7215_v21, %v1351_v57 }
 0x1c3   :  { %v2041_v28 = vadd.f32 %v2040_v14, %v1993_v17  ;;  %v7213_v14 = vld [vmem:[#allocation112_spill] sm:$0xff] }
 0x1c4   :  { %v2201_v38 = vadd.f32 %v2200_v29, %v2199_v16  ;;  %v7209_v29 = vld [vmem:[#allocation33_spill] sm:$0xff]  ;;  %v2150_v16 = vadd.f32 %v2137_v42, %v1441_v51 }
 0x1c5   :  { %v2140_v46 = vpop.f32.mrf.mxu3  ;;  %v1437_v53 = vadd.f32 %v7209_v29, %v1396_v9  ;;  %v2100_v54 = vadd.f32 %v2099_v37, %v2041_v28  ;;  %v7214_v9 = vld [vmem:[#allocation113_spill] sm:$0xff] }
 0x1c6   :  { %v6413_v6 = vand.u32 4294901760, %v2201_v38  ;;  %v2164_v37 = vadd.f32 %v2158_v50, %v2150_v16  ;;  %v7217_v51 = vld [vmem:[#allocation65_spill] sm:$0xff] }
 0x1c7   :  { %v2148_v13 = vadd.f32 %v2133_v30, %v1437_v53  ;;  %v2141_v24 = vadd.f32 %v2140_v46, %v2100_v54  ;;  %v2046_v12 = vpop.f32.mrf.mxu1  ;;  %v1449_v30 = vadd.f32 %v7217_v51, %v1408_v40  ;;  %v7219_v54 = vld [vmem:[#allocation114_spill] sm:$0xff] }
 0x1c8   :  { %2407 = vmatmul.f32.vlgmr.msrb.gmra.mxu1 %v6413_v6  ;;  %v2302_v0 = vsub.f32 %v2201_v38, %v6413_v6  ;;  %v1997_v39 = vpop.f32.mrf.mxu0  ;;  %v2180_v8 = vmul.f32 0.01, %v2164_v37  ;;  %vm2172_vm8 = vcmp.ge.f32.partialorder %v2164_v37, 0.0  ;;  %v7225_v40 = vld [vmem:[#allocation122_spill] sm:$0xff] }
 0x1c9   :  { %2807 = vmatpush.msrb.mxu1 %v5983_v5  ;;  %v2152_v38 = vadd.f32 %v2141_v24, %v1445_v48  ;;  %v1998_v49 = vadd.f32 %v1997_v39, %v1945_v31  ;;  %v2103_v42 = vpop.f32.mrf.mxu2  ;;  %v2162_v17 = vadd.f32 %v2158_v50, %v2148_v13  ;;  %v7222_v31 = vld [vmem:[#allocation117_spill] sm:$0xff]  ;;  %v2213_v24 = vmul.f32 %v6373_v23, %v6373_v23 }
 0x1ca   :  { %2461 = vmatmul.f32.vlgmr.msrb.gmra.mxu2 %v2302_v0  ;;  %v2303_v44 = vand.u32 4294901760, %v2302_v0  ;;  %v6443_v53 = vsel %vm2172_vm8, %v2164_v37, %v2180_v8 }
 0x1cb   :  { %2809 = vmatpush.msrb.mxu1 %v7212_v36  ;;  %2848 = vmatpush.msrb.mxu2 %v7213_v14  ;;  %v2166_v18 = vadd.f32 %v2158_v50, %v2152_v38  ;;  %v2047_v11 = vadd.f32 %v2046_v12, %v1998_v49  ;;  %v2178_v28 = vmul.f32 0.01, %v2162_v17  ;;  %vm2170_vm9 = vcmp.ge.f32.partialorder %v2162_v17, 0.0  ;;  %7218 = vst [vmem:[#allocation20_spill] sm:$0xff] %v6443_v53  ;;  %v7224_v49 = vld [vmem:[#allocation10_spill] sm:$0xff] }
 0x1cc   :  { %2500 = vmatmul.f32.vlgmr.msrb.gmra.mxu3 %v2303_v44  ;;  %v2304_v7 = vsub.f32 %v2302_v0, %v2303_v44  ;;  %v2211_v12 = vmul.f32 %v6375_v19, %v6375_v19  ;;  %v2217_v21 = vmul.f32 %v7224_v49, %v7224_v49  ;;  %v7247_v49 = vld [vmem:[#allocation138_spill] sm:$0xff] }
 0x1cd   :  { %2811 = vmatpush.msrb.mxu1 %v7214_v9  ;;  %2915 = vmatpush.msrb.mxu3 %v5983_v5  ;;  %v2144_v62 = vpop.f32.mrf.mxu3  ;;  %v2104_v46 = vadd.f32 %v2103_v42, %v2047_v11  ;;  %v2182_v0 = vmul.f32 0.01, %v2166_v18  ;;  %vm2174_vm10 = vcmp.ge.f32.partialorder %v2166_v18, 0.0  ;;  %v6449_v45 = vsel %vm2170_vm9, %v2162_v17, %v2178_v28  ;;  %v7226_v42 = vld [vmem:[#allocation130_spill] sm:$0xff]  ;;  %v7227_v17 = vld [vmem:[#allocation127_spill] sm:$0xff]  ;;  %v7228_v11 = vld [vmem:[#allocation124_spill] sm:$0xff] }
 0x1ce   :  { %v2305_v58 = vand.u32 4294901760, %v2304_v7  ;;  %2852 = vmatpush.msrb.mxu2 %v6032_v26  ;;  %7220 = vst [vmem:[#allocation9_spill] sm:$0xff] %v6449_v45  ;;  %v2202_v57 = vadd.f32 %v6443_v53, %v6449_v45  ;;  %v2215_v7 = vmul.f32 %v6377_v10, %v6377_v10  ;;  %v2219_v38 = vadd.f32 %v2213_v24, %v2211_v12  ;;  %v7232_v28 = vld [vmem:[#allocation133_spill] sm:$0xff]  ;;  %v7238_v24 = vld [vmem:[#allocation15_spill] sm:$0xff] }
 0x1cf   :  { %2813 = vmatpush.msrb.mxu1 %v6037_v59  ;;  %2917 = vmatpush.msrb.mxu3 %v7212_v36  ;;  %v2145_v29 = vadd.f32 %v2144_v62, %v2104_v46  ;;  %v6451_v48 = vsel %vm2174_vm10, %v2166_v18, %v2182_v0  ;;  %v7229_v62 = vld [vmem:[#allocation132_spill] sm:$0xff]  ;;  %v7233_v0 = vld [vmem:[#allocation23_spill] sm:$0xff]  ;;  %v7248_v10 = vld [vmem:[#allocation41_spill] sm:$0xff] }
 0x1d0   :  { %2306 = vmatmul.f32.vlgmr.msrb.gmra.mxu0 %v2305_v58  ;;  %2606 = vmatmul.f32.vlgmr.msra.gmra.mxu1 %v6413_v6  ;;  %7221 = vst [vmem:[#allocation17_spill] sm:$0xff] %v6451_v48  ;;  %v2203_v13 = vadd.f32 %v2202_v57, %v6451_v48  ;;  %v2220_v18 = vadd.f32 %v2219_v38, %v2215_v7  ;;  %v7230_v46 = vld [vmem:[#allocation128_spill] sm:$0xff]  ;;  %v7236_v57 = vld [vmem:[#allocation51_spill] sm:$0xff]  ;;  %v7242_v38 = vld [vmem:[#allocation62_spill] sm:$0xff] }
 0x1d1   :  { %2754 = vmatpush.msrb.mxu0 %v7216_v60  ;;  %2815 = vmatpush.msrb.mxu1 %v6066_v25  ;;  %v2154_v16 = vadd.f32 %v2145_v29, %v1449_v30  ;;  %v7231_v30 = vld [vmem:[#allocation125_spill] sm:$0xff]  ;;  %v7240_v7 = vld [vmem:[#allocation135_spill] sm:$0xff] }
 0x1d2   :  { %2919 = vmatpush.msrb.mxu3 %v7214_v9  ;;  %2856 = vmatpush.msrb.mxu2 %v6055_v41  ;;  %v2221_v51 = vadd.f32 %v2220_v18, %v2217_v21  ;;  %v7243_v18 = vld [vmem:[#allocation136_spill] sm:$0xff] }
 0x1d3   :  { %2757 = vmatpush.msrb.mxu0 %v6014_v2  ;;  %2817 = vmatpush.msrb.mxu1 %v6078_v1  ;;  %v2168_v55 = vadd.f32 %v2158_v50, %v2154_v16  ;;  %v7234_v16 = vld [vmem:[#allocation129_spill] sm:$0xff] }
 0x1d4   :  { %2921 = vmatpush.msrb.mxu3 %v6037_v59  ;;  %2860 = vmatpush.msrb.mxu2 %v6081_v35 }
 0x1d5   :  { %2760 = vmatpush.msrb.mxu0 %v7219_v54  ;;  %2819 = vmatpush.msrb.mxu1 %v6099_v15  ;;  %vm2176_vm11 = vcmp.ge.f32.partialorder %v2168_v55, 0.0  ;;  %v2184_v44 = vmul.f32 0.01, %v2168_v55 }
 0x1d6   :  { %2923 = vmatpush.msrb.mxu3 %v6066_v25  ;;  %2864 = vmatpush.msrb.mxu2 %v6106_v56 }
 0x1d7   :  { %2763 = vmatpush.msrb.mxu0 %v6064_v22  ;;  %2821 = vmatpush.msrb.mxu1 %v6125_v20  ;;  %v6464_v50 = vsel %vm2176_vm11, %v2168_v55, %v2184_v44  ;;  %v7235_v55 = vld [vmem:[#allocation137_spill] sm:$0xff] }
 0x1d8   :  { %2925 = vmatpush.msrb.mxu3 %v6078_v1  ;;  %2569 = vmatmul.f32.vlgmr.msra.gmra.mxu0 %v6413_v6  ;;  %7223 = vst [vmem:[#allocation11_spill] sm:$0xff] %v6464_v50  ;;  %v2204_v6 = vadd.f32 %v2203_v13, %v6464_v50  ;;  %v2222_v13 = vrot.slane %v2221_v51, 4 }
 0x1d9   :  { %2766 = vmatpush.msrb.mxu0 %v7222_v31  ;;  %2823 = vmatpush.msrb.mxu1 %v6158_v34 }
 0x1da   :  { %2927 = vmatpush.msrb.mxu3 %v6099_v15  ;;  %2868 = vmatpush.msrb.mxu2 %v6120_v3  ;;  %v2205_v39 = vrot.slane %v2204_v6, 4 }
 0x1db   :  { %2769 = vmatpush.msrb.mxu0 %v6097_v33  ;;  %2825 = vmatpush.msrb.mxu1 %v6181_v61 }
 0x1dc   :  { %2929 = vmatpush.msrb.mxu3 %v6125_v20  ;;  %2872 = vmatpush.msrb.mxu2 %v6146_v4  ;;  %v2206_v37 = vadd.f32 %v2205_v39, %v2204_v6  ;;  %v7237_v6 = vld [vmem:[#allocation134_spill] sm:$0xff]  ;;  %v7239_v39 = vld [vmem:[#allocation56_spill] sm:$0xff] }
 0x1dd   :  { %2772 = vmatpush.msrb.mxu0 %v6123_v63  ;;  %2827 = vmatpush.msrb.mxu1 %v6193_v27 }
 0x1de   :  { %2931 = vmatpush.msrb.mxu3 %v6158_v34  ;;  %2876 = vmatpush.msrb.mxu2 %v6176_v32  ;;  %v2207_v58 = vrot.slane %v2206_v37, 2 }
 0x1df   :  { %2775 = vmatpush.msrb.mxu0 %v6149_v52  ;;  %2829 = vmatpush.msrb.mxu1 %v6216_v47 }
 0x1e0   :  { %2933 = vmatpush.msrb.mxu3 %v6181_v61  ;;  %2880 = vmatpush.msrb.mxu2 %v6201_v43  ;;  %v2208_v8 = vadd.f32 %v2207_v58, %v2206_v37  ;;  %v7241_v37 = vld [vmem:[#allocation22_spill] sm:$0xff]  ;;  %v2223_v58 = vadd.f32 %v2222_v13, %v2221_v51  ;;  %v7249_v51 = vld [vmem:[#allocation73_spill] sm:$0xff] }
 0x1e1   :  { %2778 = vmatpush.msrb.mxu0 %v7225_v40  ;;  %2831 = vmatpush.msrb.mxu1 %v7226_v42 }
 0x1e2   :  { %2935 = vmatpush.msrb.mxu3 %v6193_v27  ;;  %2884 = vmatpush.msrb.mxu2 %v7227_v17  ;;  %v2209_v29 = vrot.slane %v2208_v8, 1  ;;  %v2224_v19 = vrot.slane %v2223_v58, 2  ;;  %v7282_v17 = vld [vmem:[#allocation93_spill] sm:$0xff] }
 0x1e3   :  { %2781 = vmatpush.msrb.mxu0 %v7228_v11  ;;  %2833 = vmatpush.msrb.mxu1 %v7229_v62 }
 0x1e4   :  { %2937 = vmatpush.msrb.mxu3 %v6216_v47  ;;  %2888 = vmatpush.msrb.mxu2 %v7230_v46  ;;  %v2210_v44 = vadd.f32 %v2209_v29, %v2208_v8  ;;  %v7244_v8 = vld [vmem:[#allocation38_spill] sm:$0xff]  ;;  %v7278_v46 = vld [vmem:[#allocation108_spill] sm:$0xff] }
 0x1e5   :  { %2784 = vmatpush.msrb.mxu0 %v7231_v30  ;;  %2835 = vmatpush.msrb.mxu1 %v7232_v28  ;;  %v7245_v29 = vld [vmem:[#allocation70_spill] sm:$0xff] }
 0x1e6   :  { %2939 = vmatpush.msrb.mxu3 %v7226_v42  ;;  %2892 = vmatpush.msrb.mxu2 %v7233_v0  ;;  %v2642_v12 = vand.u32 4294901760, %v2210_v44  ;;  %v7270_v0 = vld [vmem:[#allocation78_spill] sm:$0xff] }
 0x1e7   :  { %2787 = vmatpush.msrb.mxu0 %v7234_v16  ;;  %2837 = vmatpush.msrb.mxu1 %v7235_v55  ;;  %v7287_v16 = vld [vmem:[#allocation100_spill] sm:$0xff] }
 0x1e8   :  { %2941 = vmatpush.msrb.mxu3 %v7229_v62  ;;  %2896 = vmatpush.msrb.mxu2 %v7238_v24  ;;  %v2643_v21 = vsub.f32 %v2210_v44, %v2642_v12  ;;  %v7250_v44 = vld [vmem:[#allocation46_spill] sm:$0xff] }
 0x1e9   :  { %2997 = vmatpush.msra.mxu1 %v7236_v57  ;;  %2790 = vmatpush.msrb.mxu0 %v7237_v6  ;;  %v7260_v24 = vld [vmem:[#allocation90_spill] sm:$0xff]  ;;  %v7279_v6 = vld [vmem:[#allocation89_spill] sm:$0xff] }
 0x1ea   :  { %2943 = vmatpush.msrb.mxu3 %v7232_v28  ;;  %2900 = vmatpush.msrb.mxu2 %v7241_v37  ;;  %v2644_v57 = vand.u32 4294901760, %v2643_v21  ;;  %v2225_v37 = vadd.f32 %v2224_v19, %v2223_v58  ;;  %v7261_v19 = vld [vmem:[#allocation49_spill] sm:$0xff]  ;;  %v7262_v58 = vld [vmem:[#allocation64_spill] sm:$0xff] }
 0x1eb   :  { %3003 = vmatpush.msra.mxu1 %v7239_v39  ;;  %2793 = vmatpush.msrb.mxu0 %v7240_v7  ;;  %v7246_v39 = vld [vmem:[#allocation139_spill] sm:$0xff] }
 0x1ec   :  { %2945 = vmatpush.msrb.mxu3 %v7235_v55  ;;  %2904 = vmatpush.msrb.mxu2 %v7247_v49  ;;  %v2645_v23 = vsub.f32 %v2643_v21, %v2644_v57  ;;  %v7253_v49 = vld [vmem:[#allocation141_spill] sm:$0xff] }
 0x1ed   :  { %3009 = vmatpush.msra.mxu1 %v7242_v38  ;;  %2748 = vmatmul.f32.vlgmr.msra.gmra.mxu3 %v2642_v12  ;;  %v7251_v38 = vld [vmem:[#allocation75_spill] sm:$0xff] }
 0x1ee   :  { %2796 = vmatpush.msrb.mxu0 %v7243_v18  ;;  %3148 = vmatpush.msra.mxu3 %v7244_v8  ;;  %v2646_v13 = vand.u32 4294901760, %v2645_v23  ;;  %v7257_v23 = vld [vmem:[#allocation83_spill] sm:$0xff]  ;;  %v7267_v18 = vld [vmem:[#allocation74_spill] sm:$0xff] }
 0x1ef   :  { %3015 = vmatpush.msra.mxu1 %v7245_v29  ;;  %v7252_v29 = vld [vmem:[#allocation50_spill] sm:$0xff]  ;;  %2908 = vmatpush.msrb.mxu2 %v7253_v49  ;;  %v2226_v49 = vrot.slane %v2225_v37, 1 }
 0x1f0   :  { %2799 = vmatpush.msrb.mxu0 %v7246_v39  ;;  %3150 = vmatpush.msra.mxu3 %v7248_v10  ;;  %v7259_v39 = vld [vmem:[#allocation57_spill] sm:$0xff] }
 0x1f1   :  { %2802 = vmatmul.f32.vlgmr.msrb.gmra.mxu0 %v2643_v21  ;;  %3021 = vmatpush.msra.mxu1 %v7249_v51  ;;  %v7254_v21 = vld [vmem:[#allocation79_spill] sm:$0xff]  ;;  %v7255_v51 = vld [vmem:[#allocation40_spill] sm:$0xff] }
 0x1f2   :  { %2952 = vmatpush.msra.mxu0 %v7244_v8  ;;  %2841 = vmatmul.f32.vlgmr.msrb.gmra.mxu1 %v2644_v57  ;;  %v7256_v57 = vld [vmem:[#allocation54_spill] sm:$0xff] }
 0x1f3   :  { %3152 = vmatpush.msra.mxu3 %v7250_v44  ;;  %3027 = vmatpush.msra.mxu1 %v7251_v38  ;;  %v7258_v38 = vld [vmem:[#allocation45_spill] sm:$0xff] }
 0x1f4   :  { %2954 = vmatpush.msra.mxu0 %v7248_v10  ;;  %2647 = vmatmul.f32.vlgmr.msra.gmra.mxu2 %v2646_v13  ;;  %v7263_v13 = vld [vmem:[#allocation94_spill] sm:$0xff] }
 0x1f5   :  { %3154 = vmatpush.msra.mxu3 %v7252_v29  ;;  %3033 = vmatpush.msra.mxu1 %v7254_v21  ;;  %v7264_v21 = vld [vmem:[#allocation53_spill] sm:$0xff] }
 0x1f6   :  { %2956 = vmatpush.msra.mxu0 %v7250_v44  ;;  %2947 = vmatmul.f32.vlgmr.msrb.gmra.mxu3 %v2642_v12 }
 0x1f7   :  { %3095 = vmatpush.msra.mxu2 %v7255_v51  ;;  %3156 = vmatpush.msra.mxu3 %v7256_v57  ;;  %v7265_v51 = vld [vmem:[#allocation69_spill] sm:$0xff] }
 0x1f8   :  { %2958 = vmatpush.msra.mxu0 %v7252_v29  ;;  %3039 = vmatpush.msra.mxu1 %v7257_v23  ;;  %v2227_v23 = vadd.f32 %v2226_v49, %v2225_v37  ;;  %v7272_v49 = vld [vmem:[#allocation103_spill] sm:$0xff]  ;;  %v7273_v37 = vld [vmem:[#allocation80_spill] sm:$0xff] }
 0x1f9   :  { %3098 = vmatpush.msra.mxu2 %v7258_v38  ;;  %3158 = vmatpush.msra.mxu3 %v7259_v39  ;;  %v7266_v38 = vld [vmem:[#allocation95_spill] sm:$0xff] }
 0x1fa   :  { %2960 = vmatpush.msra.mxu0 %v7256_v57  ;;  %3045 = vmatpush.msra.mxu1 %v7260_v24  ;;  %v7268_v24 = vld [vmem:[#allocation61_spill] sm:$0xff] }
 0x1fb   :  { %3101 = vmatpush.msra.mxu2 %v7261_v19  ;;  %3160 = vmatpush.msra.mxu3 %v7262_v58  ;;  %v7269_v19 = vld [vmem:[#allocation99_spill] sm:$0xff] }
 0x1fc   :  { %2962 = vmatpush.msra.mxu0 %v7259_v39  ;;  %3051 = vmatpush.msra.mxu1 %v7263_v13  ;;  %v6547_v13 = vand.u32 4294901760, %v2227_v23 }
 0x1fd   :  { %3104 = vmatpush.msra.mxu2 %v7264_v21  ;;  %3162 = vmatpush.msra.mxu3 %v7265_v51  ;;  %v7271_v21 = vld [vmem:[#allocation63_spill] sm:$0xff] }
 0x1fe   :  { %2964 = vmatpush.msra.mxu0 %v7262_v58  ;;  %3057 = vmatpush.msra.mxu1 %v7266_v38  ;;  %v2214_v38 = vmul.f32 %v6443_v53, %v6443_v53  ;;  %v2984_v7 = vsub.f32 %v2227_v23, %v6547_v13  ;;  %v7280_v53 = vld [vmem:[#allocation77_spill] sm:$0xff]  ;;  %v2218_v23 = vmul.f32 %v6464_v50, %v6464_v50  ;;  %v7286_v50 = vld [vmem:[#allocation88_spill] sm:$0xff] }
 0x1ff   :  { %2910 = vmatmul.f32.vlgmr.msrb.gmra.mxu2 %v2642_v12  ;;  %3164 = vmatpush.msra.mxu3 %v7267_v18  ;;  %v7274_v12 = vld [vmem:[#allocation68_spill] sm:$0xff] }
 0x200   :  { %3107 = vmatpush.msra.mxu2 %v7268_v24  ;;  %2966 = vmatpush.msra.mxu0 %v7265_v51  ;;  %v7275_v24 = vld [vmem:[#allocation107_spill] sm:$0xff] }
 0x201   :  { %3063 = vmatpush.msra.mxu1 %v7269_v19  ;;  %3166 = vmatpush.msra.mxu3 %v7270_v0  ;;  %v7276_v19 = vld [vmem:[#allocation85_spill] sm:$0xff] }
 0x202   :  { %3110 = vmatpush.msra.mxu2 %v7271_v21  ;;  %2968 = vmatpush.msra.mxu0 %v7267_v18  ;;  %v7277_v21 = vld [vmem:[#allocation72_spill] sm:$0xff] }
 0x203   :  { %3069 = vmatpush.msra.mxu1 %v7272_v49  ;;  %3168 = vmatpush.msra.mxu3 %v7273_v37  ;;  %v2212_v49 = vmul.f32 %v6449_v45, %v6449_v45  ;;  %v2985_v45 = vand.u32 4294901760, %v2984_v7 }
 0x204   :  { %3113 = vmatpush.msra.mxu2 %v7274_v12  ;;  %2970 = vmatpush.msra.mxu0 %v7270_v0  ;;  %v2216_v12 = vmul.f32 %v6451_v48, %v6451_v48  ;;  %v7283_v48 = vld [vmem:[#allocation82_spill] sm:$0xff] }
 0x205   :  { %3075 = vmatpush.msra.mxu1 %v7275_v24  ;;  %3170 = vmatpush.msra.mxu3 %v7276_v19  ;;  %v2228_v24 = vadd.f32 %v2214_v38, %v2212_v49  ;;  %v7285_v38 = vld [vmem:[#allocation98_spill] sm:$0xff] }
 0x206   :  { %3116 = vmatpush.msra.mxu2 %v7277_v21  ;;  %2972 = vmatpush.msra.mxu0 %v7273_v37  ;;  %v7281_v21 = vld [vmem:[#allocation109_spill] sm:$0xff] }
 0x207   :  { %3081 = vmatpush.msra.mxu1 %v7278_v46  ;;  %3172 = vmatpush.msra.mxu3 %v7279_v6  ;;  %v2229_v46 = vadd.f32 %v2228_v24, %v2216_v12  ;;  %v7289_v12 = vld [vmem:[#allocation115_spill] sm:$0xff]  ;;  %v7290_v24 = vld [vmem:[#allocation97_spill] sm:$0xff] }
 0x208   :  { %3119 = vmatpush.msra.mxu2 %v7280_v53  ;;  %2974 = vmatpush.msra.mxu0 %v7276_v19  ;;  %v7284_v53 = vld [vmem:[#allocation84_spill] sm:$0xff] }
 0x209   :  { %3087 = vmatpush.msra.mxu1 %v7281_v21  ;;  %3174 = vmatpush.msra.mxu3 %v7282_v17  ;;  %v2230_v49 = vadd.f32 %v2229_v46, %v2218_v23  ;;  %v2986_v21 = vsub.f32 %v2984_v7, %v2985_v45  ;;  %v7292_v23 = vld [vmem:[#allocation44_spill] sm:$0xff]  ;;  %v7294_v46 = vld [vmem:[#allocation102_spill] sm:$0xff] }
 0x20a   :  { %3089 = vmatmul.f32.vlgmr.msra.gmra.mxu1 %v6547_v13  ;;  %3122 = vmatpush.msra.mxu2 %v7283_v48  ;;  %v7288_v48 = vld [vmem:[#allocation92_spill] sm:$0xff] }
 0x20b   :  { %3256 = vmatpush.msrb.mxu1 %v7244_v8  ;;  %2976 = vmatpush.msra.mxu0 %v7279_v6  ;;  %v2231_v8 = vrot.slane %v2230_v49, 4 }
 0x20c   :  { %3125 = vmatpush.msra.mxu2 %v7284_v53  ;;  %3176 = vmatpush.msra.mxu3 %v7285_v38  ;;  %v7295_v53 = vld [vmem:[#allocation48_spill] sm:$0xff] }
 0x20d   :  { %3258 = vmatpush.msrb.mxu1 %v7248_v10  ;;  %2978 = vmatpush.msra.mxu0 %v7282_v17  ;;  %v2987_v10 = vand.u32 4294901760, %v2986_v21  ;;  %v7297_v21 = vld [vmem:[#allocation104_spill] sm:$0xff] }
 0x20e   :  { %3128 = vmatpush.msra.mxu2 %v7286_v50  ;;  %3178 = vmatpush.msra.mxu3 %v7287_v16  ;;  %v7291_v50 = vld [vmem:[#allocation116_spill] sm:$0xff] }
 0x20f   :  { %3260 = vmatpush.msrb.mxu1 %v7250_v44  ;;  %2980 = vmatpush.msra.mxu0 %v7285_v38  ;;  %v7293_v44 = vld [vmem:[#allocation118_spill] sm:$0xff] }
 0x210   :  { %3182 = vmatmul.f32.vlgmr.msra.gmra.mxu3 %v2985_v45  ;;  %3131 = vmatpush.msra.mxu2 %v7288_v48  ;;  %v2232_v45 = vadd.f32 %v2231_v8, %v2230_v49  ;;  %v7298_v48 = vld [vmem:[#allocation52_spill] sm:$0xff]  ;;  %v7301_v8 = vld [vmem:[#allocation121_spill] sm:$0xff] }
 0x211   :  { %3338 = vmatpush.msrb.mxu3 %v7289_v12  ;;  %3262 = vmatpush.msrb.mxu1 %v7252_v29  ;;  %v7296_v29 = vld [vmem:[#allocation119_spill] sm:$0xff]  ;;  %v7300_v49 = vld [vmem:[#allocation60_spill] sm:$0xff] }
 0x212   :  { %2982 = vmatpush.msra.mxu0 %v7287_v16  ;;  %3134 = vmatpush.msra.mxu2 %v7290_v24  ;;  %v2233_v12 = vrot.slane %v2232_v45, 2  ;;  %v7305_v24 = vld [vmem:[#allocation126_spill] sm:$0xff] }
 0x213   :  { %3344 = vmatpush.msrb.mxu3 %v7291_v50  ;;  %2988 = vmatmul.f32.vlgmr.msra.gmra.mxu0 %v2987_v10  ;;  %v7303_v10 = vld [vmem:[#allocation123_spill] sm:$0xff]  ;;  %v7307_v50 = vld [vmem:[#allocation16_spill] sm:$0xff] }
 0x214   :  { %3189 = vmatpush.msrb.mxu0 %v7292_v23  ;;  %3264 = vmatpush.msrb.mxu1 %v7256_v57  ;;  %v7299_v57 = vld [vmem:[#allocation120_spill] sm:$0xff] }
 0x215   :  { %3350 = vmatpush.msrb.mxu3 %v7293_v44  ;;  %3137 = vmatpush.msra.mxu2 %v7294_v46  ;;  %v7308_v23 = vld [vmem:[#allocation76_spill] sm:$0xff]  ;;  %v7311_v44 = vld [vmem:[#allocation131_spill] sm:$0xff]  ;;  %v7312_v46 = vld [vmem:[#allocation86_spill] sm:$0xff] }
 0x216   :  { %3193 = vmatpush.msrb.mxu0 %v7295_v53  ;;  %3266 = vmatpush.msrb.mxu1 %v7259_v39  ;;  %v7302_v39 = vld [vmem:[#allocation66_spill] sm:$0xff]  ;;  %v7313_v53 = vld [vmem:[#allocation13_spill] sm:$0xff] }
 0x217   :  { %3356 = vmatpush.msrb.mxu3 %v7296_v29  ;;  %3140 = vmatpush.msra.mxu2 %v7297_v21  ;;  %v7315_v29 = vld [vmem:[#allocation14_spill] sm:$0xff]  ;;  %v7316_v21 = vld [vmem:[#allocation91_spill] sm:$0xff] }
 0x218   :  { %3197 = vmatpush.msrb.mxu0 %v7298_v48  ;;  %3268 = vmatpush.msrb.mxu1 %v7262_v58  ;;  %v2234_v58 = vadd.f32 %v2233_v12, %v2232_v45  ;;  %v7309_v45 = vld [vmem:[#allocation19_spill] sm:$0xff]  ;;  %v7317_v48 = vld [vmem:[#allocation140_spill] sm:$0xff] }
 0x219   :  { %3143 = vmatmul.f32.vlgmr.msra.gmra.mxu2 %v2984_v7  ;;  %3362 = vmatpush.msrb.mxu3 %v7299_v57  ;;  %v7304_v7 = vld [vmem:[#allocation67_spill] sm:$0xff]  ;;  %v7321_v57 = vld [vmem:[#allocation142_spill] sm:$0xff] }
 0x21a   :  { %3293 = vmatpush.msrb.mxu2 %v5983_v5  ;;  %3201 = vmatpush.msrb.mxu0 %v7300_v49  ;;  %v7319_v12 = vld [vmem:[#allocation27_spill] sm:$0xff]  ;;  %v7322_v49 = vld [vmem:[#allocation105_spill] sm:$0xff] }
 0x21b   :  { %3270 = vmatpush.msrb.mxu1 %v7265_v51  ;;  %3368 = vmatpush.msrb.mxu3 %v7301_v8  ;;  %v7306_v51 = vld [vmem:[#allocation71_spill] sm:$0xff] }
 0x21c   :  { %3295 = vmatpush.msrb.mxu2 %v7212_v36  ;;  %3205 = vmatpush.msrb.mxu0 %v7302_v39  ;;  %v7323_v39 = vld [vmem:[#allocation106_spill] sm:$0xff] }
 0x21d   :  { %3272 = vmatpush.msrb.mxu1 %v7267_v18  ;;  %3374 = vmatpush.msrb.mxu3 %v7303_v10  ;;  %v2235_v18 = vrot.slane %v2234_v58, 1 }
 0x21e   :  { %3297 = vmatpush.msrb.mxu2 %v7214_v9  ;;  %3209 = vmatpush.msrb.mxu0 %v7304_v7 }
 0x21f   :  { %3274 = vmatpush.msrb.mxu1 %v7270_v0  ;;  %3380 = vmatpush.msrb.mxu3 %v7305_v24  ;;  %v7310_v0 = vld [vmem:[#allocation81_spill] sm:$0xff] }
 0x220   :  { %3299 = vmatpush.msrb.mxu2 %v6037_v59  ;;  %3213 = vmatpush.msrb.mxu0 %v7306_v51 }
 0x221   :  { %3276 = vmatpush.msrb.mxu1 %v7273_v37  ;;  %3386 = vmatpush.msrb.mxu3 %v7307_v50  ;;  %v2236_v37 = vadd.f32 %v2235_v18, %v2234_v58 }
 0x222   :  { %3301 = vmatpush.msrb.mxu2 %v6066_v25  ;;  %3217 = vmatpush.msrb.mxu0 %v7308_v23 }
 0x223   :  { %3278 = vmatpush.msrb.mxu1 %v7276_v19  ;;  %3392 = vmatpush.msrb.mxu3 %v7309_v45  ;;  %v7314_v19 = vld [vmem:[#allocation87_spill] sm:$0xff] }
 0x224   :  { %3303 = vmatpush.msrb.mxu2 %v6078_v1  ;;  %3221 = vmatpush.msrb.mxu0 %v7310_v0 }
 0x225   :  { %3280 = vmatpush.msrb.mxu1 %v7279_v6  ;;  %3398 = vmatpush.msrb.mxu3 %v7311_v44  ;;  %v6635_v6 = vand.u32 4294901760, %v2236_v37 }
 0x226   :  { %3305 = vmatpush.msrb.mxu2 %v6099_v15  ;;  %3225 = vmatpush.msrb.mxu0 %v7312_v46 }
 0x227   :  { %3282 = vmatpush.msrb.mxu1 %v7282_v17  ;;  %3404 = vmatpush.msrb.mxu3 %v7313_v53  ;;  %v7318_v17 = vld [vmem:[#allocation96_spill] sm:$0xff]  ;;  %v3662_v53 = vld [vmem:[%s6857_s6 + $0x10] sm:$0xff] }
 0x228   :  { %3307 = vmatpush.msrb.mxu2 %v6125_v20  ;;  %3229 = vmatpush.msrb.mxu0 %v7314_v19 }
 0x229   :  { %3284 = vmatpush.msrb.mxu1 %v7285_v38  ;;  %3410 = vmatpush.msrb.mxu3 %v7315_v29  ;;  %v6646_v38 = vsub.f32 %v2236_v37, %v6635_v6 }
 0x22a   :  { %3309 = vmatpush.msrb.mxu2 %v6158_v34  ;;  %3233 = vmatpush.msrb.mxu0 %v7316_v21 }
 0x22b   :  { %3286 = vmatpush.msrb.mxu1 %v7287_v16  ;;  %3416 = vmatpush.msrb.mxu3 %v7317_v48  ;;  %v7320_v16 = vld [vmem:[#allocation101_spill] sm:$0xff]  ;;  %v3326_v8 = vand.u32 4294901760, %v6646_v38  ;;  %v3660_v48 = vld [vmem:[%s6857_s6] sm:$0xff] }
 0x22c   :  { %3288 = vmatmul.f32.vlgmr.msrb.gmra.mxu1 %v6547_v13  ;;  %3311 = vmatpush.msrb.mxu2 %v6181_v61 }
 0x22d   :  { %3489 = vmatpush.msra.mxu1 %v5983_v5  ;;  %3237 = vmatpush.msrb.mxu0 %v7318_v17  ;;  %v3327_v10 = vsub.f32 %v6646_v38, %v3326_v8 }
 0x22e   :  { %3313 = vmatpush.msrb.mxu2 %v6193_v27  ;;  %3422 = vmatpush.msrb.mxu3 %v7319_v12 }
 0x22f   :  { %3491 = vmatpush.msra.mxu1 %v7212_v36  ;;  %3241 = vmatpush.msrb.mxu0 %v7320_v16 }
 0x230   :  { %3315 = vmatpush.msrb.mxu2 %v6216_v47  ;;  %3428 = vmatpush.msrb.mxu3 %v7321_v57 }
 0x231   :  { %3493 = vmatpush.msra.mxu1 %v7214_v9  ;;  %3245 = vmatpush.msrb.mxu0 %v7322_v49 }
 0x232   :  { %3430 = vmatmul.f32.vlgmr.msrb.gmra.mxu3 %v6635_v6  ;;  %3317 = vmatpush.msrb.mxu2 %v7226_v42 }
 0x233   :  { %3597 = vmatpush.msra.mxu3 %v5983_v5  ;;  %3495 = vmatpush.msra.mxu1 %v6037_v59  ;;  %v3328_v5 = vand.u32 4294901760, %v3327_v10 }
 0x234   :  { %3249 = vmatpush.msrb.mxu0 %v7323_v39  ;;  %3319 = vmatpush.msrb.mxu2 %v7229_v62 }
 0x235   :  { %3599 = vmatpush.msra.mxu3 %v7212_v36  ;;  %3251 = vmatmul.f32.vlgmr.msrb.gmra.mxu0 %v6547_v13 }
 0x236   :  { %3436 = vmatpush.msra.mxu0 %v7216_v60  ;;  %3497 = vmatpush.msra.mxu1 %v6066_v25 }
 0x237   :  { %3601 = vmatpush.msra.mxu3 %v7214_v9  ;;  %3321 = vmatpush.msrb.mxu2 %v7232_v28 }
 0x238   :  { %3439 = vmatpush.msra.mxu0 %v6014_v2  ;;  %3499 = vmatpush.msra.mxu1 %v6078_v1  ;;  %v7327_v2 = vld [vmem:[#allocation128_spill] sm:$0xff] }
 0x239   :  { %3603 = vmatpush.msra.mxu3 %v6037_v59  ;;  %3323 = vmatpush.msrb.mxu2 %v7235_v55  ;;  %v7330_v59 = vld [vmem:[#allocation136_spill] sm:$0xff] }
 0x23a   :  { %3442 = vmatpush.msra.mxu0 %v7219_v54  ;;  %3501 = vmatpush.msra.mxu1 %v6099_v15 }
 0x23b   :  { %3329 = vmatmul.f32.vlgmr.msrb.gmra.mxu2 %v3328_v5  ;;  %3605 = vmatpush.msra.mxu3 %v6066_v25  ;;  %v7333_v25 = vld [vmem:[#allocation22_spill] sm:$0xff] }
 0x23c   :  { %3530 = vmatpush.msra.mxu2 %v7213_v14  ;;  %3445 = vmatpush.msra.mxu0 %v6064_v22  ;;  %v7332_v22 = vld [vmem:[#allocation139_spill] sm:$0xff] }
 0x23d   :  { %3503 = vmatpush.msra.mxu1 %v6125_v20  ;;  %3607 = vmatpush.msra.mxu3 %v6078_v1  ;;  %v7334_v1 = vld [vmem:[#allocation138_spill] sm:$0xff] }
 0x23e   :  { %3534 = vmatpush.msra.mxu2 %v6032_v26  ;;  %3448 = vmatpush.msra.mxu0 %v7222_v31  ;;  %v7328_v26 = vld [vmem:[#allocation135_spill] sm:$0xff] }
 0x23f   :  { %3505 = vmatpush.msra.mxu1 %v6158_v34  ;;  %3609 = vmatpush.msra.mxu3 %v6099_v15 }
 0x240   :  { %3538 = vmatpush.msra.mxu2 %v6055_v41  ;;  %3451 = vmatpush.msra.mxu0 %v6097_v33  ;;  %v7325_v33 = vld [vmem:[#allocation127_spill] sm:$0xff]  ;;  %v7326_v41 = vld [vmem:[#allocation134_spill] sm:$0xff] }
 0x241   :  { %3507 = vmatpush.msra.mxu1 %v6181_v61  ;;  %3611 = vmatpush.msra.mxu3 %v6125_v20 }
 0x242   :  { %3542 = vmatpush.msra.mxu2 %v6081_v35  ;;  %3454 = vmatpush.msra.mxu0 %v6123_v63  ;;  %v7335_v35 = vld [vmem:[#allocation141_spill] sm:$0xff] }
 0x243   :  { %3509 = vmatpush.msra.mxu1 %v6193_v27  ;;  %3613 = vmatpush.msra.mxu3 %v6158_v34 }
 0x244   :  { %3546 = vmatpush.msra.mxu2 %v6106_v56  ;;  %3457 = vmatpush.msra.mxu0 %v6149_v52  ;;  %v7324_v52 = vld [vmem:[#allocation129_spill] sm:$0xff] }
 0x245   :  { %3511 = vmatpush.msra.mxu1 %v6216_v47  ;;  %3615 = vmatpush.msra.mxu3 %v6181_v61  ;;  %v2408_v56 = vpop.f32.mrf.mxu1 }
 0x246   :  { %3550 = vmatpush.msra.mxu2 %v6120_v3  ;;  %3460 = vmatpush.msra.mxu0 %v7225_v40 }
 0x247   :  { %3513 = vmatpush.msra.mxu1 %v7226_v42  ;;  %3617 = vmatpush.msra.mxu3 %v6193_v27 }
 0x248   :  { %3554 = vmatpush.msra.mxu2 %v6146_v4  ;;  %3463 = vmatpush.msra.mxu0 %v7228_v11  ;;  %v7331_v4 = vld [vmem:[#allocation15_spill] sm:$0xff] }
 0x249   :  { %3515 = vmatpush.msra.mxu1 %v7229_v62  ;;  %3619 = vmatpush.msra.mxu3 %v6216_v47 }
 0x24a   :  { %3558 = vmatpush.msra.mxu2 %v6176_v32  ;;  %3466 = vmatpush.msra.mxu0 %v7231_v30 }
 0x24b   :  { %3517 = vmatpush.msra.mxu1 %v7232_v28  ;;  %3621 = vmatpush.msra.mxu3 %v7226_v42  ;;  %v4426_v42 = vmov 512.0  }
 0x24c   :  { %3562 = vmatpush.msra.mxu2 %v6201_v43  ;;  %3469 = vmatpush.msra.mxu0 %v7324_v52  ;;  %v7329_v43 = vld [vmem:[#allocation23_spill] sm:$0xff]  ;;  %4360 = vrcp.f32 %v4426_v42 }
 0x24d   :  { %3519 = vmatpush.msra.mxu1 %v7235_v55  ;;  %3623 = vmatpush.msra.mxu3 %v7229_v62  ;;  %v2307_v15 = vpop.f32.mrf.mxu0  ;;  %v2462_v3 = vpop.f32.mrf.mxu2 }
 0x24e   :  { %3523 = vmatmul.f32.vlgmr.msra.gmra.mxu1 %v3326_v8  ;;  %3566 = vmatpush.msra.mxu2 %v7325_v33  ;;  %v2607_v32 = vpop.f32.mrf.mxu1  ;;  %v2409_v61 = vadd.f32 %v2408_v56, %v2307_v15 }
 0x24f   :  { %3472 = vmatpush.msra.mxu0 %v7326_v41  ;;  %3625 = vmatpush.msra.mxu3 %v7232_v28  ;;  %v2501_v63 = vpop.f32.mrf.mxu3 }
 0x250   :  { %3570 = vmatpush.msra.mxu2 %v7327_v2  ;;  %v2463_v36 = vadd.f32 %v2462_v3, %v2409_v61 }
 0x251   :  { %3475 = vmatpush.msra.mxu0 %v7328_v26  ;;  %3627 = vmatpush.msra.mxu3 %v7235_v55 }
 0x252   :  { %3574 = vmatpush.msra.mxu2 %v7329_v43  ;;  %3629 = vmatmul.f32.vlgmr.msra.gmra.mxu3 %v6635_v6  ;;  %v2502_v60 = vadd.f32 %v2501_v63, %v2463_v36  ;;  %v4361_v58 = vpop.eup %4360  ;;  %v3661_v63 = vld [vmem:[%s6857_s6 + $0x8] sm:$0xff] }
 0x253   :  { %3478 = vmatpush.msra.mxu0 %v7330_v59  ;;  %v3634_v18 = vmul.f32 512.0, %v4361_v58  ;;  %vm3638_vm12 = vweird.f32 %v4361_v58 }
 0x254   :  { %3578 = vmatpush.msra.mxu2 %v7331_v4 }
 0x255   :  { %3481 = vmatpush.msra.mxu0 %v7332_v22  ;;  %v2570_v20 = vpop.f32.mrf.mxu0  ;;  %v3635_v0 = vsub.f32 1.0, %v3634_v18 }
 0x256   :  { %3484 = vmatmul.f32.vlgmr.msra.gmra.mxu0 %v6646_v38  ;;  %3582 = vmatpush.msra.mxu2 %v7333_v25  ;;  %v2571_v54 = vadd.f32 %v2570_v20, %v2502_v60  ;;  %v6740_v38 = vand.u32 4294901760, %v3660_v48 }
 0x257   :  { %v3636_v21 = vmul.f32 %v4361_v58, %v3635_v0  ;;  %v3657_v0 = vld [vmem:[%s6855_s4] sm:$0x1]  ;;  %s4427_s4 = smov [#allocation6]  }
 0x258   :  { %3586 = vmatpush.msra.mxu2 %v7334_v1  ;;  %v2608_v30 = vadd.f32 %v2607_v32, %v2571_v54  ;;  %v6749_v39 = vsub.f32 %v3660_v48, %v6740_v38  ;;  %v3663_v1 = vld [vmem:[%s6857_s6 + $0x18] sm:$0xff]  ;;  %v6782_v32 = vand.u32 4294901760, %v3661_v63  ;;  %s4339_s19 = sshll.u32 %s4427_s4, 4  ;;  %s4340_s19 = int_to_ptr.vmem [resolvable:$true] %s4339_s19 }
 0x259   :  { %v3637_v10 = vadd.f32 %v4361_v58, %v3636_v21  ;;  %v6772_v56 = vand.u32 4294901760, %v3663_v1 }
 0x25a   :  { %3590 = vmatpush.msra.mxu2 %v7335_v35  ;;  %v6756_v33 = vand.u32 4294901760, %v6749_v39  ;;  %v6790_v36 = vsub.f32 %v3661_v63, %v6782_v32 }
 0x25b   :  { %3592 = vmatmul.f32.vlgmr.msra.gmra.mxu2 %v6635_v6  ;;  %v6732_v6 = vand.u32 4294901760, %v3662_v53  ;;  %v3639_v43 = vsel %vm3638_vm12, %v4361_v58, %v3637_v10 }
 0x25c   :  { %v3718_v26 = vsub.f32 %v6749_v39, %v6756_v33  ;;  %v6795_v60 = vand.u32 4294901760, %v6790_v36 }
 0x25d   :  { %v6738_v17 = vsub.f32 %v3662_v53, %v6732_v6  ;;  %3683 = vmatpush.msrb.mxu0 %v6732_v6  ;;  %3767 = vmatpush.msrb.mxu3 %v6732_v6 }
 0x25e   :  { %v6766_v22 = vand.u32 4294901760, %v3718_v26 }
 0x25f   :  { %v6745_v8 = vand.u32 4294901760, %v6738_v17  ;;  %3742 = vmatpush.msrb.mxu2 %v6738_v17  ;;  %3769 = vmatpush.msrb.mxu3 %v6740_v38 }
 0x260   :  { %3685 = vmatpush.msrb.mxu0 %v6740_v38 }
 0x261   :  { %v3712_v52 = vsub.f32 %v6738_v17, %v6745_v8  ;;  %3745 = vmatpush.msrb.mxu2 %v6749_v39 }
 0x262   :  { %3794 = vmatpush.msra.mxu0 %v6745_v8 }
 0x263   :  { %v6760_v2 = vand.u32 4294901760, %v3712_v52  ;;  %3842 = vmatpush.msra.mxu2 %v6772_v56 }
 0x264   :  { %3798 = vmatpush.msra.mxu0 %v6756_v33 }
 0x265   :  { %3714 = vmatpush.msrb.mxu1 %v6760_v2  ;;  %3844 = vmatpush.msra.mxu2 %v6782_v32 }
 0x267   :  { %3720 = vmatpush.msrb.mxu1 %v6766_v22 }
 0x269   :  { %3819 = vmatpush.msra.mxu1 %v6732_v6 }
 0x26b   :  { %3821 = vmatpush.msra.mxu1 %v6740_v38 }
 0x26e   :  { %v2803_v47 = vpop.f32.mrf.mxu0 }
 0x26f   :  { %v2842_v14 = vpop.f32.mrf.mxu1 }
 0x270   :  { %v2749_v27 = vpop.f32.mrf.mxu3 }
 0x277   :  { %v2648_v34 = vpop.f32.mrf.mxu2 }
 0x278   :  { %v2649_v55 = vadd.f32 %v2648_v34, %v2608_v30  ;;  %v6780_v34 = vsub.f32 %v3663_v1, %v6772_v56 }
 0x279   :  { %v2948_v31 = vpop.f32.mrf.mxu3 }
 0x27a   :  { %v2750_v51 = vadd.f32 %v2749_v27, %v2649_v55 }
 0x27c   :  { %v2804_v45 = vadd.f32 %v2803_v47, %v2750_v51  ;;  %v6786_v47 = vand.u32 4294901760, %v6780_v34 }
 0x27e   :  { %v2843_v19 = vadd.f32 %v2842_v14, %v2804_v45 }
 0x282   :  { %v2911_v9 = vpop.f32.mrf.mxu2 }
 0x283   :  { %v2912_v57 = vadd.f32 %v2911_v9, %v2843_v19  ;;  %v3871_v9 = vsub.f32 %v6780_v34, %v6786_v47 }
 0x285   :  { %v2949_v41 = vadd.f32 %v2948_v31, %v2912_v57  ;;  %v3872_v31 = vand.u32 4294901760, %v3871_v9 }
 0x287   :  { %v3090_v11 = vpop.f32.mrf.mxu1  ;;  %v3640_v35 = vmul.f32 %v3639_v43, %v2949_v41  ;;  %3873 = vmatpush.msra.mxu3 %v3872_v31 }
 0x289   :  { %v3642_v61 = vmul.f32 %v3640_v35, %v3640_v35 }
 0x290   :  { %v2989_v40 = vpop.f32.mrf.mxu0 }
 0x291   :  { %v3091_v28 = vadd.f32 %v3090_v11, %v2989_v40  ;;  %v3877_v40 = vsub.f32 %v6790_v36, %v6795_v60 }
 0x293   :  { %v3183_v7 = vpop.f32.mrf.mxu3  ;;  %v3878_v42 = vand.u32 4294901760, %v3877_v40  ;;  %v7338_v40 = vld [vmem:[#allocation144_spill] sm:$0xff] }
 0x295   :  { %3879 = vmatpush.msra.mxu3 %v3878_v42 }
 0x29c   :  { %v3144_v62 = vpop.f32.mrf.mxu2 }
 0x29d   :  { %v3145_v13 = vadd.f32 %v3144_v62, %v3091_v28 }
 0x29f   :  { %v3184_v50 = vadd.f32 %v3183_v7, %v3145_v13  ;;  %v3644_v13 = vld [vmem:[%s6854_s3] sm:$0x1] }
 0x2a9   :  { %v3289_v44 = vpop.f32.mrf.mxu1 }
 0x2b2   :  { %v3252_v24 = vpop.f32.mrf.mxu0 }
 0x2b3   :  { %v3253_v23 = vadd.f32 %v3252_v24, %v3184_v50 }
 0x2b5   :  { %v3290_v46 = vadd.f32 %v3289_v44, %v3253_v23  ;;  %v3431_v12 = vpop.f32.mrf.mxu3 }
 0x2be   :  { %v3330_v37 = vpop.f32.mrf.mxu2 }
 0x2bf   :  { %v3331_v29 = vadd.f32 %v3330_v37, %v3290_v46 }
 0x2c1   :  { %v3432_v49 = vadd.f32 %v3431_v12, %v3331_v29 }
 0x2cb   :  { %v3524_v59 = vpop.f32.mrf.mxu1 }
 0x2d3   :  { %v3485_v16 = vpop.f32.mrf.mxu0 }
 0x2d4   :  { %v3486_v5 = vadd.f32 %v3485_v16, %v3432_v49 }
 0x2d5   :  { %v3630_v3 = vpop.f32.mrf.mxu3 }
 0x2d6   :  { %v3525_v4 = vadd.f32 %v3524_v59, %v3486_v5 }
 0x2de   :  { %v3593_v25 = vpop.f32.mrf.mxu2 }
 0x2df   :  { %v3594_v15 = vadd.f32 %v3593_v25, %v3525_v4 }
 0x2e1   :  { %v3631_v20 = vadd.f32 %v3630_v3, %v3594_v15 }
 0x2e3   :  { %v3641_v27 = vmul.f32 %v3639_v43, %v3631_v20 }
 0x2e5   :  { %v3643_v14 = vsub.f32 %v3641_v27, %v3642_v61 }
 0x2e7   :  { %v3645_v54 = vadd.f32 1e-05, %v3643_v14  ;;  %v7336_v14 = vld [vmem:[#allocation143_spill] sm:$0xff] }
 0x2e9   :  { %4362 = vrsqrt.f32 %v3645_v54  ;;  %vm3652_vm14 = vweird.f32 %v3645_v54 }
 0x2ef   :  { %v4363_v11 = vpop.eup %4362 }
 0x2f0   :  { %v3647_v62 = vmul.f32 %v4363_v11, %v3645_v54  ;;  %vm3653_vm13 = vweird.f32 %v4363_v11  ;;  %v7337_v54 = vld [vmem:[#allocation26_spill] sm:$0xff] }
 0x2f1   :  { %vm3654_vm15 = vmor %vm3652_vm14, %vm3653_vm13 }
 0x2f2   :  { %v3648_v30 = vmul.f32 %v4363_v11, %v3647_v62 }
 0x2f4   :  { %v3649_v28 = vmul.f32 0.5, %v3648_v30  ;;  %v7339_v30 = vld [vmem:[#allocation10_spill] sm:$0xff] }
 0x2f6   :  { %v3650_v55 = vsub.f32 1.5, %v3649_v28 }
 0x2f8   :  { %v3651_v58 = vmul.f32 %v4363_v11, %v3650_v55 }
 0x2fa   :  { %v3655_v7 = vsel %vm3654_vm15, %v4363_v11, %v3651_v58 }
 0x2fb   :  { %v3656_v24 = vmul.f32 %v3655_v7, %v3644_v13 }
 0x2fd   :  { %v3666_v51 = vsel %vm3664_vm0, %v3656_v24, 0  ;;  %v3658_v45 = vmul.f32 %v3656_v24, %v3640_v35 }
 0x2fe   :  { %v3686_v50 = vand.u32 4294901760, %v3666_v51 }
 0x2ff   :  { %v3659_v46 = vsub.f32 %v3657_v0, %v3658_v45 }
 0x300   :  { %3722 = vmatmul.f32.vlgmr.msrb.gmra.mxu1 %v3686_v50  ;;  %v3687_v18 = vsub.f32 %v3666_v51, %v3686_v50 }
 0x301   :  { %3926 = vmatpush.msrb.mxu1 %v6772_v56  ;;  %v3987_v53 = vsel %vm3664_vm0, %v3659_v46, 0 }
 0x302   :  { %3748 = vmatmul.f32.vlgmr.msrb.gmra.mxu2 %v3687_v18  ;;  %v3688_v23 = vand.u32 4294901760, %v3687_v18  ;;  %v4007_v19 = vand.u32 4294901760, %v3987_v53 }
 0x303   :  { %3953 = vmatpush.msrb.mxu2 %v6786_v47  ;;  %3928 = vmatpush.msrb.mxu1 %v6782_v32 }
 0x304   :  { %3773 = vmatmul.f32.vlgmr.msrb.gmra.mxu3 %v3688_v23  ;;  %v3689_v44 = vsub.f32 %v3687_v18, %v3688_v23  ;;  %v4008_v29 = vsub.f32 %v3987_v53, %v4007_v19 }
 0x305   :  { %3978 = vmatpush.msrb.mxu3 %v6772_v56  ;;  %3957 = vmatpush.msrb.mxu2 %v6795_v60 }
 0x306   :  { %v3690_v37 = vand.u32 4294901760, %v3689_v44  ;;  %v4009_v21 = vand.u32 4294901760, %v4008_v29 }
 0x307   :  { %3980 = vmatpush.msrb.mxu3 %v6782_v32 }
 0x308   :  { %3691 = vmatmul.f32.vlgmr.msrb.gmra.mxu0 %v3690_v37  ;;  %3823 = vmatmul.f32.vlgmr.msra.gmra.mxu1 %v3686_v50 }
 0x309   :  { %3901 = vmatpush.msrb.mxu0 %v6780_v34  ;;  %4035 = vmatpush.msra.mxu1 %v6760_v2 }
 0x30a   :  { %3850 = vmatmul.f32.vlgmr.msra.gmra.mxu2 %v3690_v37 }
 0x30b   :  { %3904 = vmatpush.msrb.mxu0 %v6790_v36  ;;  %4063 = vmatpush.msra.mxu2 %v6738_v17 }
 0x30c   :  { %3881 = vmatmul.f32.vlgmr.msra.gmra.mxu3 %v3686_v50  ;;  %4041 = vmatpush.msra.mxu1 %v6766_v22 }
 0x30d   :  { %4088 = vmatpush.msra.mxu3 %v6732_v6  ;;  %4066 = vmatpush.msra.mxu2 %v6749_v39 }
 0x30f   :  { %4090 = vmatpush.msra.mxu3 %v6740_v38 }
 0x310   :  { %3800 = vmatmul.f32.vlgmr.msra.gmra.mxu0 %v3686_v50  ;;  %3932 = vmatmul.f32.vlgmr.msrb.gmra.mxu1 %v3688_v23 }
 0x311   :  { %4004 = vmatpush.msra.mxu0 %v6732_v6  ;;  %4140 = vmatpush.msrb.mxu1 %v6732_v6  ;;  %v4010_v6 = vsub.f32 %v4008_v29, %v4009_v21 }
 0x312   :  { %3959 = vmatmul.f32.vlgmr.msrb.gmra.mxu2 %v3686_v50 }
 0x313   :  { %4006 = vmatpush.msra.mxu0 %v6740_v38  ;;  %4163 = vmatpush.msrb.mxu2 %v6772_v56  ;;  %v4011_v48 = vand.u32 4294901760, %v4010_v6 }
 0x314   :  { %3982 = vmatmul.f32.vlgmr.msrb.gmra.mxu3 %v3686_v50  ;;  %4142 = vmatpush.msrb.mxu1 %v6740_v38 }
 0x315   :  { %4194 = vmatpush.msrb.mxu3 %v3872_v31  ;;  %4165 = vmatpush.msrb.mxu2 %v6782_v32 }
 0x317   :  { %4200 = vmatpush.msrb.mxu3 %v3878_v42 }
 0x318   :  { %3907 = vmatmul.f32.vlgmr.msrb.gmra.mxu0 %v3687_v18  ;;  %4043 = vmatmul.f32.vlgmr.msra.gmra.mxu1 %v4007_v19 }
 0x319   :  { %4115 = vmatpush.msrb.mxu0 %v6745_v8  ;;  %4247 = vmatpush.msra.mxu1 %v6772_v56 }
 0x31a   :  { %4069 = vmatmul.f32.vlgmr.msra.gmra.mxu2 %v4008_v29 }
 0x31b   :  { %4119 = vmatpush.msrb.mxu0 %v6756_v33  ;;  %4274 = vmatpush.msra.mxu2 %v6786_v47 }
 0x31c   :  { %4094 = vmatmul.f32.vlgmr.msra.gmra.mxu3 %v4009_v21  ;;  %4249 = vmatpush.msra.mxu1 %v6782_v32 }
 0x31d   :  { %4299 = vmatpush.msra.mxu3 %v6772_v56  ;;  %4278 = vmatpush.msra.mxu2 %v6795_v60 }
 0x31f   :  { %4301 = vmatpush.msra.mxu3 %v6782_v32 }
 0x320   :  { %4012 = vmatmul.f32.vlgmr.msra.gmra.mxu0 %v4011_v48  ;;  %4144 = vmatmul.f32.vlgmr.msrb.gmra.mxu1 %v4007_v19 }
 0x321   :  { %4222 = vmatpush.msra.mxu0 %v6780_v34 }
 0x322   :  { %4171 = vmatmul.f32.vlgmr.msrb.gmra.mxu2 %v4011_v48  ;;  %v7342_v48 = vld [vmem:[#allocation17_spill] sm:$0xff] }
 0x323   :  { %4225 = vmatpush.msra.mxu0 %v6790_v36 }
 0x324   :  { %4202 = vmatmul.f32.vlgmr.msrb.gmra.mxu3 %v4007_v19 }
 0x328   :  { %4121 = vmatmul.f32.vlgmr.msrb.gmra.mxu0 %v4007_v19  ;;  %4253 = vmatmul.f32.vlgmr.msra.gmra.mxu1 %v4009_v21  ;;  %v7341_v21 = vld [vmem:[#allocation20_spill] sm:$0xff] }
 0x32a   :  { %4280 = vmatmul.f32.vlgmr.msra.gmra.mxu2 %v4007_v19 }
 0x32c   :  { %4303 = vmatmul.f32.vlgmr.msra.gmra.mxu3 %v4007_v19  ;;  %v7340_v19 = vld [vmem:[#allocation9_spill] sm:$0xff] }
 0x330   :  { %4228 = vmatmul.f32.vlgmr.msra.gmra.mxu0 %v4008_v29 }
 0x37d   :  { %v3723_v17 = vpop.f32.mrf.mxu1 }
 0x385   :  { %v3692_v38 = vpop.f32.mrf.mxu0  ;;  %v3749_v12 = vpop.f32.mrf.mxu2 }
 0x386   :  { %v3824_v16 = vpop.f32.mrf.mxu1  ;;  %v3724_v5 = vadd.f32 %v3723_v17, %v3692_v38 }
 0x387   :  { %v3774_v57 = vpop.f32.mrf.mxu3 }
 0x388   :  { %v3750_v41 = vadd.f32 %v3749_v12, %v3724_v5  ;;  %v7343_v12 = vld [vmem:[#allocation11_spill] sm:$0xff] }
 0x38a   :  { %v3775_v26 = vadd.f32 %v3774_v57, %v3750_v41 }
 0x38d   :  { %v3801_v49 = vpop.f32.mrf.mxu0  ;;  %v3851_v8 = vpop.f32.mrf.mxu2 }
 0x38e   :  { %v3933_v10 = vpop.f32.mrf.mxu1  ;;  %v3802_v59 = vadd.f32 %v3801_v49, %v3775_v26 }
 0x38f   :  { %v3882_v39 = vpop.f32.mrf.mxu3 }
 0x390   :  { %v3883_v35 = vadd.f32 %v3882_v39, %v3851_v8  ;;  %v3825_v15 = vadd.f32 %v3824_v16, %v3802_v59 }
 0x392   :  { %v4307_v20 = vperm.slane %v3825_v15, 0 }
 0x394   :  { %v4309_v9 = vmul.f32 %v4307_v20, %v7336_v14  ;;  %v4311_v31 = vmul.f32 %v4307_v20, %v7337_v54  ;;  %v4313_v42 = vmul.f32 %v4307_v20, %v7338_v40  ;;  %v4315_v28 = vmul.f32 %v4307_v20, %v7339_v30 }
 0x395   :  { %v3908_v52 = vpop.f32.mrf.mxu0  ;;  %v3960_v33 = vpop.f32.mrf.mxu2 }
 0x396   :  { %v4044_v43 = vpop.f32.mrf.mxu1  ;;  %v3909_v3 = vadd.f32 %v3908_v52, %v3883_v35 }
 0x397   :  { %v3983_v2 = vpop.f32.mrf.mxu3 }
 0x398   :  { %v3934_v61 = vadd.f32 %v3933_v10, %v3909_v3 }
 0x39a   :  { %v3961_v11 = vadd.f32 %v3960_v33, %v3934_v61 }
 0x39c   :  { %v3984_v50 = vadd.f32 %v3983_v2, %v3961_v11 }
 0x39d   :  { %v4013_v4 = vpop.f32.mrf.mxu0  ;;  %v4070_v22 = vpop.f32.mrf.mxu2 }
 0x39e   :  { %v4045_v25 = vadd.f32 %v4044_v43, %v4013_v4  ;;  %v4145_v34 = vpop.f32.mrf.mxu1  ;;  %v4308_v44 = vperm.slane %v3984_v50, 0 }
 0x39f   :  { %v4095_v1 = vpop.f32.mrf.mxu3 }
 0x3a0   :  { %v4071_v56 = vadd.f32 %v4070_v22, %v4045_v25  ;;  %v4310_v29 = vmul.f32 %v4308_v44, %v7340_v19  ;;  %v4312_v6 = vmul.f32 %v4308_v44, %v7341_v21  ;;  %v4314_v17 = vmul.f32 %v4308_v44, %v7342_v48 }
 0x3a1   :  { %v4316_v16 = vmul.f32 %v4308_v44, %v7343_v12 }
 0x3a2   :  { %v4096_v63 = vadd.f32 %v4095_v1, %v4071_v56 }
 0x3a5   :  { %v4122_v32 = vpop.f32.mrf.mxu0  ;;  %v4172_v47 = vpop.f32.mrf.mxu2 }
 0x3a6   :  { %v4123_v27 = vadd.f32 %v4122_v32, %v4096_v63  ;;  %v4254_v23 = vpop.f32.mrf.mxu1 }
 0x3a7   :  { %v4203_v60 = vpop.f32.mrf.mxu3 }
 0x3a8   :  { %v4146_v36 = vadd.f32 %v4145_v34, %v4123_v27  ;;  %v4204_v7 = vadd.f32 %v4203_v60, %v4172_v47 }
 0x3aa   :  { %v4317_v62 = vperm.slane %v4146_v36, 0 }
 0x3ac   :  { %v4319_v55 = vadd.f32 %v4317_v62, %v4309_v9  ;;  %v4321_v13 = vadd.f32 %v4317_v62, %v4311_v31  ;;  %v4323_v58 = vadd.f32 %v4317_v62, %v4313_v42  ;;  %v4325_v24 = vadd.f32 %v4317_v62, %v4315_v28 }
 0x3ad   :  { %v4229_v51 = vpop.f32.mrf.mxu0  ;;  %v4281_v0 = vpop.f32.mrf.mxu2 }
 0x3ae   :  { %4327 = vst [vmem:[#allocation6] sm:$0xff] %v4319_v55  ;;  %v4230_v18 = vadd.f32 %v4229_v51, %v4204_v7 }
 0x3af   :  { %4329 = vst [vmem:[#allocation6 + $0x10] sm:$0xff] %v4321_v13  ;;  %v4304_v46 = vpop.f32.mrf.mxu3 }
 0x3b0   :  { %4331 = vst [vmem:[#allocation6 + $0x20] sm:$0xff] %v4323_v58  ;;  %v4255_v45 = vadd.f32 %v4254_v23, %v4230_v18 }
 0x3b1   :  { %4333 = vst [vmem:[#allocation6 + $0x30] sm:$0xff] %v4325_v24 }
 0x3b2   :  { %v4282_v37 = vadd.f32 %v4281_v0, %v4255_v45 }
 0x3b4   :  { %v4305_v53 = vadd.f32 %v4304_v46, %v4282_v37 }
 0x3b6   :  { %v4318_v38 = vperm.slane %v4305_v53, 0 }
 0x3b8   :  { %v4320_v57 = vadd.f32 %v4318_v38, %v4310_v29  ;;  %v4322_v49 = vadd.f32 %v4318_v38, %v4312_v6  ;;  %v4324_v8 = vadd.f32 %v4318_v38, %v4314_v17  ;;  %v4326_v39 = vadd.f32 %v4318_v38, %v4316_v16 }
 0x3ba   :  { %4328 = vst [vmem:[#allocation6 + $0x8] sm:$0xff] %v4320_v57 }
 0x3bb   :  { %4330 = vst [vmem:[#allocation6 + $0x18] sm:$0xff] %v4322_v49 }
 0x3bc   :  { %4332 = vst [vmem:[#allocation6 + $0x28] sm:$0xff] %v4324_v8 }
 0x3bd   :  { %4334 = vst [vmem:[#allocation6 + $0x38] sm:$0xff] %v4326_v39 }
 0x3be   :  { %4347 = dma.vmem_to_hbm [thread:$0]  %s4340_s19, 1024, %s4342_s22, [#allocation5], %s4423_s29, %s4423_s29, %s4424_s30  }
 0x3bf   :  { %4420 = dma.done.wait [#allocation5], 1024  }
 0x3c0   :  { %4421 = vsyncadd [#allocation5], 4294966272 }
 0x3c1   :  { %4352 = vsyncpa [#allocation4], 1 }
 0x3c2   :  { %4353 = vsyncpa [#allocation5], 1 }

</bundles_post_ra>
